<compile_context>
chip_gen: v7x
topology: tpu7x:2x2x1
jax: 0.10.0
libtpu: 0.0.40
codegen_flags: <defaults>
</compile_context>

<pallas_src>
import functools

import jax
import jax.numpy as jnp
from jax.experimental import pallas as pl
from jax.experimental.pallas import tpu as pltpu


def _layer_norm(x, gamma, beta, eps=1e-5):
    mean = jnp.mean(x, axis=-1, keepdims=True)
    var = jnp.mean((x - mean) ** 2, axis=-1, keepdims=True)
    return (x - mean) * jax.lax.rsqrt(var + eps) * gamma + beta


def encoder_layer_kernel(x_ref,
                         wqkv_ref, bqkv_ref,
                         wo_ref, bo_ref,
                         g1_ref, b1_ref,
                         wf_ref, bf_ref,
                         g2_ref, b2_ref,
                         o_ref,
                         *, heads, mxu_dtype):
    TB, L, E = x_ref.shape
    H = wo_ref.shape[1]
    dh = H // heads
    exact = jnp.dtype(mxu_dtype) == jnp.dtype(jnp.float32)

    # Residual / LayerNorm / softmax math stays f32; the MXU is fed mxu_dtype.
    # Read x once per role (no f32 round trip if the input is already bf16).
    x_mxu = x_ref[...].astype(mxu_dtype).reshape(TB * L, E)
    x_f32 = x_ref[...].astype(jnp.float32).reshape(TB * L, E)

    # Fused QKV projection (softmax scale already folded into the Q columns by
    # the wrapper): one tall MXU matmul with f32 accumulation.  Cast the large
    # (TB*L, 3H) activation to the MXU dtype ONCE, right after the bias add.
    qkv = (jnp.dot(x_mxu, wqkv_ref[...], preferred_element_type=jnp.float32)
           + bqkv_ref[...]).astype(mxu_dtype)

    # Head split: column slices + stack along a new leading axis, then
    # leading-dim-only reshapes, so BOTH attention matmuls run as a single
    # batched MXU op over (heads * TB) -- no unrolled per-head loop.
    def split_heads(block):            # (TB*L, H) -> (heads*TB, L, dh)
        cols = [block[:, h * dh:(h + 1) * dh] for h in range(heads)]
        return jnp.stack(cols, axis=0).reshape(heads * TB, L, dh)

    q = split_heads(qkv[:, 0 * H:1 * H])
    k = split_heads(qkv[:, 1 * H:2 * H])
    v = split_heads(qkv[:, 2 * H:3 * H])

    # scores: contract dh directly (no explicit transpose), batched over
    # (heads*TB).  TODO(synk): flash-style online softmax for long L.
    s = jnp.einsum('bqd,bkd->bqk', q, k,
                   preferred_element_type=jnp.float32)         # (heads*TB, L, L)
    s = s - jnp.max(s, axis=-1, keepdims=True)
    p = jnp.exp(s)
    denom = jnp.sum(p, axis=-1, keepdims=True)
    # EUP reciprocal in the fast path; exact divide when checking f32 semantics.
    p = p * pl.reciprocal(denom, approx=not exact)

    ctx = jnp.einsum('bqk,bkd->bqd', p.astype(mxu_dtype), v,
                     preferred_element_type=jnp.float32)       # (heads*TB, L, dh)

    # Concatenate heads back to (TB*L, H).
    ctx = ctx.reshape(heads, TB * L, dh)
    ctx = jnp.concatenate([ctx[h] for h in range(heads)], axis=-1)

    # Output projection + residual + LayerNorm 1 (f32).
    attn = jnp.dot(ctx.astype(mxu_dtype), wo_ref[...],
                   preferred_element_type=jnp.float32) + bo_ref[...]
    h1 = _layer_norm(attn + x_f32, g1_ref[...], b1_ref[...])

    # FFN (single Linear) + residual + LayerNorm 2 (f32).
    ffn = jnp.dot(h1.astype(mxu_dtype), wf_ref[...],
                  preferred_element_type=jnp.float32) + bf_ref[...]
    h2 = _layer_norm(ffn + h1, g2_ref[...], b2_ref[...])

    o_ref[...] = h2.reshape(TB, L, H).astype(o_ref.dtype)


def _pick_seq_block(n, l, target_rows=512):
    """Largest divisor of n with seq_block*l <= target_rows, while keeping at
    least 2 grid steps so the grid can shard across both v7x TensorCores."""
    cap = max(1, target_rows // max(l, 1))
    if n >= 2:
        cap = min(cap, n // 2)
    tb = 1
    for c in range(1, min(n, cap) + 1):
        if n % c == 0:
            tb = c
    return tb


def _vmem_limit_bytes():
    """~3/4 of physical VMEM: ~48 MiB on v7x (64 MiB), ~96 MiB on v5e/v6e."""
    cap = 128 * 1024 * 1024
    try:
        info = pltpu.get_tpu_info()
        cap = int(getattr(info, "vmem_capacity_bytes", cap) or cap)
    except Exception:
        pass
    return min(cap * 3 // 4, 100 * 1024 * 1024)


def encoder_layer(x, params, *, heads, seq_block=None, mxu_dtype=jnp.bfloat16):
    N, L, E = x.shape
    H = params["wq"].shape[1]
    assert H % heads == 0 and E == H
    if seq_block is None:
        seq_block = _pick_seq_block(N, L)
    TB = seq_block
    assert N % TB == 0
    dh = H // heads

    f32 = jnp.float32
    # Fold the 1/sqrt(dh) softmax scale into Wq/bq (one-time constant
    # transform), fuse QKV weights/biases, and cast the MXU operands to the
    # MXU input dtype (f32 accumulation happens in-kernel).
    scale = 1.0 / (dh ** 0.5)
    w_qkv = jnp.concatenate(
        [params["wq"] * scale, params["wk"], params["wv"]],
        axis=1).astype(mxu_dtype)
    b_qkv = jnp.concatenate(
        [params["bq"] * scale, params["bk"], params["bv"]],
        axis=1).astype(f32)
    wo = params["wo"].astype(mxu_dtype)
    wf = params["wf"].astype(mxu_dtype)

    operands = (
        x,
        w_qkv, b_qkv,
        wo, params["bo"].astype(f32),
        params["g1"].astype(f32), params["b1"].astype(f32),
        wf, params["bf"].astype(f32),
        params["g2"].astype(f32), params["b2"].astype(f32),
    )

    kernel = functools.partial(encoder_layer_kernel, heads=heads,
                               mxu_dtype=mxu_dtype)

    def run(single_buffer_weights):
        seq_spec = pl.BlockSpec((TB, L, E), lambda n: (n, 0, 0))

        def weight_spec(arr):
            # Whole-array, constant-index (grid-resident) operand.  Single-
            # buffer it: double-buffering a constant block is pure VMEM waste.
            nd = arr.ndim
            if single_buffer_weights:
                return pl.BlockSpec(arr.shape, lambda n: (0,) * nd,
                                    pipeline_mode=pl.Buffered(1))
            return pl.BlockSpec(arr.shape, lambda n: (0,) * nd)

        in_specs = [seq_spec] + [weight_spec(a) for a in operands[1:]]

        return pl.pallas_call(
            kernel,
            out_shape=jax.ShapeDtypeStruct((N, L, H), x.dtype),
            grid_spec=pltpu.PrefetchScalarGridSpec(
                num_scalar_prefetch=0,
                grid=(N // TB,),
                in_specs=in_specs,
                out_specs=pl.BlockSpec((TB, L, H), lambda n: (n, 0, 0)),
            ),
            compiler_params=pltpu.CompilerParams(
                dimension_semantics=("parallel",),
                vmem_limit_bytes=_vmem_limit_bytes()),
        )(*operands)

    try:
        return run(True)
    except Exception:
        # Fallback for jax versions without BlockSpec(pipeline_mode=...).
        return run(False)


def encoder_layer_ref(x, params, *, heads):
    """Pure-JAX (f32) reference for correctness checking."""
    N, L, E = x.shape
    H = params["wq"].shape[1]
    dh = H // heads
    q = x @ params["wq"] + params["bq"]
    k = x @ params["wk"] + params["bk"]
    v = x @ params["wv"] + params["bv"]

    def split(t):  # (N, L, H) -> (N, heads, L, dh)
        return t.reshape(N, L, heads, dh).transpose(0, 2, 1, 3)

    qh, kh, vh = split(q), split(k), split(v)
    s = jnp.einsum("nhld,nhmd->nhlm", qh, kh) / (dh ** 0.5)
    p = jax.nn.softmax(s, axis=-1)
    ctx = jnp.einsum("nhlm,nhmd->nhld", p, vh)
    ctx = ctx.transpose(0, 2, 1, 3).reshape(N, L, H)
    attn_out = ctx @ params["wo"] + params["bo"]

    def ln(t, g, b, eps=1e-5):
        m = t.mean(-1, keepdims=True)
        var = ((t - m) ** 2).mean(-1, keepdims=True)
        return (t - m) * jax.lax.rsqrt(var + eps) * g + b

    h1 = ln(attn_out + x, params["g1"], params["b1"])
    ffn = h1 @ params["wf"] + params["bf"]
    return ln(ffn + h1, params["g2"], params["b2"])


if __name__ == "__main__":
    N, L = 8, 8
    E = H = 32
    heads = 4

    key = jax.random.PRNGKey(0)
    keys = jax.random.split(key, 8)

    x = jax.random.normal(keys[0], (N, L, E), dtype=jnp.float32)

    def w(k, shape, scale=0.1):
        return (scale * jax.random.normal(k, shape)).astype(jnp.float32)

    params = {
        "wq": w(keys[1], (E, H)), "bq": jnp.zeros((1, H), jnp.float32),
        "wk": w(keys[2], (E, H)), "bk": jnp.zeros((1, H), jnp.float32),
        "wv": w(keys[3], (E, H)), "bv": jnp.zeros((1, H), jnp.float32),
        "wo": w(keys[4], (H, H)), "bo": jnp.zeros((1, H), jnp.float32),
        "g1": jnp.ones((1, H), jnp.float32), "b1": jnp.zeros((1, H), jnp.float32),
        "wf": w(keys[5], (H, H)), "bf": w(keys[6], (1, H), 0.05),
        "g2": jnp.ones((1, H), jnp.float32), "b2": jnp.zeros((1, H), jnp.float32),
    }

    ref = encoder_layer_ref(x, params, heads=heads)

    # Exact-precision path: f32 MXU inputs + exact reciprocal (semantics check).
    out_f32 = encoder_layer(x, params, heads=heads, mxu_dtype=jnp.float32)
    out_f32 = jax.block_until_ready(out_f32)
    assert out_f32.shape == (N, L, H)
    err_f32 = float(jnp.max(jnp.abs(out_f32 - ref)))
    assert err_f32 < 5e-3, f"f32 path max abs error {err_f32}"

    # Performance path: bf16 MXU inputs, f32 accumulation / softmax / LN.
    out_bf16 = encoder_layer(x, params, heads=heads, mxu_dtype=jnp.bfloat16)
    out_bf16 = jax.block_until_ready(out_bf16)
    assert out_bf16.shape == (N, L, H)
    err_bf16 = float(jnp.max(jnp.abs(out_bf16 - ref)))
    assert err_bf16 < 5e-2, f"bf16 path max abs error {err_bf16}"

    print("KERNEL_OK")
</pallas_src>

<mosaic_0001>
module attributes {stable_mosaic.version = 11 : i64} {
  func.func @encoder_layer_kernel(%arg0: i32, %arg1: memref<4x8x32xf32, #tpu.memory_space<vmem>>, %arg2: memref<32x96xf32, #tpu.memory_space<vmem>>, %arg3: memref<1x96xf32, #tpu.memory_space<vmem>>, %arg4: memref<32x32xf32, #tpu.memory_space<vmem>>, %arg5: memref<1x32xf32, #tpu.memory_space<vmem>>, %arg6: memref<1x32xf32, #tpu.memory_space<vmem>>, %arg7: memref<1x32xf32, #tpu.memory_space<vmem>>, %arg8: memref<32x32xf32, #tpu.memory_space<vmem>>, %arg9: memref<1x32xf32, #tpu.memory_space<vmem>>, %arg10: memref<1x32xf32, #tpu.memory_space<vmem>>, %arg11: memref<1x32xf32, #tpu.memory_space<vmem>>, %arg12: memref<4x8x32xf32, #tpu.memory_space<vmem>>) attributes {dimension_semantics = [#tpu.dimension_semantics<parallel>], iteration_bounds = array<i64: 2>, scalar_prefetch = 0 : i64, scratch_operands = 0 : i64, tpu.core_type = #tpu.core_type<tc>, window_params = [{transform_indices = @transform_0, window_bounds = array<i64: 4, 8, 32>}, {pipeline_mode = #tpu.pipeline_mode<synchronous>, transform_indices = @transform_1, window_bounds = array<i64: 32, 96>}, {pipeline_mode = #tpu.pipeline_mode<synchronous>, transform_indices = @transform_2, window_bounds = array<i64: 1, 96>}, {pipeline_mode = #tpu.pipeline_mode<synchronous>, transform_indices = @transform_3, window_bounds = array<i64: 32, 32>}, {pipeline_mode = #tpu.pipeline_mode<synchronous>, transform_indices = @transform_4, window_bounds = array<i64: 1, 32>}, {pipeline_mode = #tpu.pipeline_mode<synchronous>, transform_indices = @transform_5, window_bounds = array<i64: 1, 32>}, {pipeline_mode = #tpu.pipeline_mode<synchronous>, transform_indices = @transform_6, window_bounds = array<i64: 1, 32>}, {pipeline_mode = #tpu.pipeline_mode<synchronous>, transform_indices = @transform_7, window_bounds = array<i64: 32, 32>}, {pipeline_mode = #tpu.pipeline_mode<synchronous>, transform_indices = @transform_8, window_bounds = array<i64: 1, 32>}, {pipeline_mode = #tpu.pipeline_mode<synchronous>, transform_indices = @transform_9, window_bounds = array<i64: 1, 32>}, {pipeline_mode = #tpu.pipeline_mode<synchronous>, transform_indices = @transform_10, window_bounds = array<i64: 1, 32>}, {transform_indices = @transform_11, window_bounds = array<i64: 4, 8, 32>}]} {
    %c0 = arith.constant 0 : index
    %c0_0 = arith.constant 0 : index
    %c0_1 = arith.constant 0 : index
    %0 = vector.load %arg1[%c0, %c0_0, %c0_1] : memref<4x8x32xf32, #tpu.memory_space<vmem>>, vector<4x8x32xf32>
    %1 = vector.shape_cast %0 : vector<4x8x32xf32> to vector<32x32xf32>
    %c0_2 = arith.constant 0 : index
    %c0_3 = arith.constant 0 : index
    %c0_4 = arith.constant 0 : index
    %2 = vector.load %arg1[%c0_2, %c0_3, %c0_4] : memref<4x8x32xf32, #tpu.memory_space<vmem>>, vector<4x8x32xf32>
    %3 = vector.shape_cast %2 : vector<4x8x32xf32> to vector<32x32xf32>
    %c0_5 = arith.constant 0 : index
    %c0_6 = arith.constant 0 : index
    %4 = vector.load %arg2[%c0_5, %c0_6] : memref<32x96xf32, #tpu.memory_space<vmem>>, vector<32x96xf32>
    %cst = arith.constant dense<0.000000e+00> : vector<32x96xf32>
    %5 = tpu.matmul %1, %4, %cst {dimension_numbers = #tpu.dot_dimension_numbers<[1], [0], [0], [1], [0, 0, 1, 1], [], []>} : vector<32x32xf32>, vector<32x96xf32>, vector<32x96xf32> -> vector<32x96xf32>
    %c0_7 = arith.constant 0 : index
    %c0_8 = arith.constant 0 : index
    %6 = vector.load %arg3[%c0_7, %c0_8] : memref<1x96xf32, #tpu.memory_space<vmem>>, vector<1x96xf32>
    %7 = vector.broadcast %6 : vector<1x96xf32> to vector<32x96xf32>
    %8 = arith.addf %5, %7 : vector<32x96xf32>
    %9 = vector.extract_strided_slice %8 {offsets = [0, 0], sizes = [32, 32], strides = [1, 1]} : vector<32x96xf32> to vector<32x32xf32>
    %10 = vector.extract_strided_slice %9 {offsets = [0, 0], sizes = [32, 8], strides = [1, 1]} : vector<32x32xf32> to vector<32x8xf32>
    %11 = vector.extract_strided_slice %9 {offsets = [0, 8], sizes = [32, 8], strides = [1, 1]} : vector<32x32xf32> to vector<32x8xf32>
    %12 = vector.extract_strided_slice %9 {offsets = [0, 16], sizes = [32, 8], strides = [1, 1]} : vector<32x32xf32> to vector<32x8xf32>
    %13 = vector.extract_strided_slice %9 {offsets = [0, 24], sizes = [32, 8], strides = [1, 1]} : vector<32x32xf32> to vector<32x8xf32>
    %14 = vector.shape_cast %10 : vector<32x8xf32> to vector<1x32x8xf32>
    %15 = vector.shape_cast %11 : vector<32x8xf32> to vector<1x32x8xf32>
    %16 = vector.shape_cast %12 : vector<32x8xf32> to vector<1x32x8xf32>
    %17 = vector.shape_cast %13 : vector<32x8xf32> to vector<1x32x8xf32>
    %18 = tpu.concatenate %14, %15, %16, %17 in 0 : vector<1x32x8xf32>, vector<1x32x8xf32>, vector<1x32x8xf32>, vector<1x32x8xf32> -> vector<4x32x8xf32>
    %19 = vector.shape_cast %18 : vector<4x32x8xf32> to vector<16x8x8xf32>
    %20 = vector.extract_strided_slice %8 {offsets = [0, 32], sizes = [32, 32], strides = [1, 1]} : vector<32x96xf32> to vector<32x32xf32>
    %21 = vector.extract_strided_slice %20 {offsets = [0, 0], sizes = [32, 8], strides = [1, 1]} : vector<32x32xf32> to vector<32x8xf32>
    %22 = vector.extract_strided_slice %20 {offsets = [0, 8], sizes = [32, 8], strides = [1, 1]} : vector<32x32xf32> to vector<32x8xf32>
    %23 = vector.extract_strided_slice %20 {offsets = [0, 16], sizes = [32, 8], strides = [1, 1]} : vector<32x32xf32> to vector<32x8xf32>
    %24 = vector.extract_strided_slice %20 {offsets = [0, 24], sizes = [32, 8], strides = [1, 1]} : vector<32x32xf32> to vector<32x8xf32>
    %25 = vector.shape_cast %21 : vector<32x8xf32> to vector<1x32x8xf32>
    %26 = vector.shape_cast %22 : vector<32x8xf32> to vector<1x32x8xf32>
    %27 = vector.shape_cast %23 : vector<32x8xf32> to vector<1x32x8xf32>
    %28 = vector.shape_cast %24 : vector<32x8xf32> to vector<1x32x8xf32>
    %29 = tpu.concatenate %25, %26, %27, %28 in 0 : vector<1x32x8xf32>, vector<1x32x8xf32>, vector<1x32x8xf32>, vector<1x32x8xf32> -> vector<4x32x8xf32>
    %30 = vector.shape_cast %29 : vector<4x32x8xf32> to vector<16x8x8xf32>
    %31 = vector.extract_strided_slice %8 {offsets = [0, 64], sizes = [32, 32], strides = [1, 1]} : vector<32x96xf32> to vector<32x32xf32>
    %32 = vector.extract_strided_slice %31 {offsets = [0, 0], sizes = [32, 8], strides = [1, 1]} : vector<32x32xf32> to vector<32x8xf32>
    %33 = vector.extract_strided_slice %31 {offsets = [0, 8], sizes = [32, 8], strides = [1, 1]} : vector<32x32xf32> to vector<32x8xf32>
    %34 = vector.extract_strided_slice %31 {offsets = [0, 16], sizes = [32, 8], strides = [1, 1]} : vector<32x32xf32> to vector<32x8xf32>
    %35 = vector.extract_strided_slice %31 {offsets = [0, 24], sizes = [32, 8], strides = [1, 1]} : vector<32x32xf32> to vector<32x8xf32>
    %36 = vector.shape_cast %32 : vector<32x8xf32> to vector<1x32x8xf32>
    %37 = vector.shape_cast %33 : vector<32x8xf32> to vector<1x32x8xf32>
    %38 = vector.shape_cast %34 : vector<32x8xf32> to vector<1x32x8xf32>
    %39 = vector.shape_cast %35 : vector<32x8xf32> to vector<1x32x8xf32>
    %40 = tpu.concatenate %36, %37, %38, %39 in 0 : vector<1x32x8xf32>, vector<1x32x8xf32>, vector<1x32x8xf32>, vector<1x32x8xf32> -> vector<4x32x8xf32>
    %41 = vector.shape_cast %40 : vector<4x32x8xf32> to vector<16x8x8xf32>
    "tpu.trace_start"() <{level = 10 : i32, message = "bqd,bkd->bqk"}> : () -> ()
    %cst_9 = arith.constant dense<0.000000e+00> : vector<16x8x8xf32>
    %42 = tpu.matmul %19, %30, %cst_9 {dimension_numbers = #tpu.dot_dimension_numbers<[2], [2], [1], [1], [0, 0, 0, 1, 1, 1], [0], [0]>} : vector<16x8x8xf32>, vector<16x8x8xf32>, vector<16x8x8xf32> -> vector<16x8x8xf32>
    "tpu.trace_stop"() : () -> ()
    %cst_10 = arith.constant dense<0xFF800000> : vector<16x8xf32>
    %43 = vector.multi_reduction <maximumf>, %42, %cst_10 [2] : vector<16x8x8xf32> to vector<16x8xf32>
    %44 = vector.shape_cast %43 : vector<16x8xf32> to vector<16x8x1xf32>
    %45 = vector.broadcast %44 : vector<16x8x1xf32> to vector<16x8x8xf32>
    %46 = arith.subf %42, %45 : vector<16x8x8xf32>
    %47 = math.exp %46 : vector<16x8x8xf32>
    %cst_11 = arith.constant dense<0.000000e+00> : vector<16x8xf32>
    %48 = vector.multi_reduction <add>, %47, %cst_11 [2] : vector<16x8x8xf32> to vector<16x8xf32>
    %49 = vector.shape_cast %48 : vector<16x8xf32> to vector<16x8x1xf32>
    %50 = tpu.reciprocal %49 : vector<16x8x1xf32> -> vector<16x8x1xf32>
    %51 = vector.broadcast %50 : vector<16x8x1xf32> to vector<16x8x8xf32>
    %52 = arith.mulf %47, %51 : vector<16x8x8xf32>
    "tpu.trace_start"() <{level = 10 : i32, message = "bqk,bkd->bqd"}> : () -> ()
    %cst_12 = arith.constant dense<0.000000e+00> : vector<16x8x8xf32>
    %53 = tpu.matmul %52, %41, %cst_12 {dimension_numbers = #tpu.dot_dimension_numbers<[2], [1], [1], [2], [0, 0, 0, 1, 1, 2], [0], [0]>} : vector<16x8x8xf32>, vector<16x8x8xf32>, vector<16x8x8xf32> -> vector<16x8x8xf32>
    "tpu.trace_stop"() : () -> ()
    %54 = vector.shape_cast %53 : vector<16x8x8xf32> to vector<4x32x8xf32>
    %55 = vector.extract_strided_slice %54 {offsets = [0, 0, 0], sizes = [1, 32, 8], strides = [1, 1, 1]} : vector<4x32x8xf32> to vector<1x32x8xf32>
    %56 = vector.shape_cast %55 : vector<1x32x8xf32> to vector<32x8xf32>
    %57 = vector.extract_strided_slice %54 {offsets = [1, 0, 0], sizes = [1, 32, 8], strides = [1, 1, 1]} : vector<4x32x8xf32> to vector<1x32x8xf32>
    %58 = vector.shape_cast %57 : vector<1x32x8xf32> to vector<32x8xf32>
    %59 = vector.extract_strided_slice %54 {offsets = [2, 0, 0], sizes = [1, 32, 8], strides = [1, 1, 1]} : vector<4x32x8xf32> to vector<1x32x8xf32>
    %60 = vector.shape_cast %59 : vector<1x32x8xf32> to vector<32x8xf32>
    %61 = vector.extract_strided_slice %54 {offsets = [3, 0, 0], sizes = [1, 32, 8], strides = [1, 1, 1]} : vector<4x32x8xf32> to vector<1x32x8xf32>
    %62 = vector.shape_cast %61 : vector<1x32x8xf32> to vector<32x8xf32>
    %63 = tpu.concatenate %56, %58, %60, %62 in 1 : vector<32x8xf32>, vector<32x8xf32>, vector<32x8xf32>, vector<32x8xf32> -> vector<32x32xf32>
    %c0_13 = arith.constant 0 : index
    %c0_14 = arith.constant 0 : index
    %64 = vector.load %arg4[%c0_13, %c0_14] : memref<32x32xf32, #tpu.memory_space<vmem>>, vector<32x32xf32>
    %cst_15 = arith.constant dense<0.000000e+00> : vector<32x32xf32>
    %65 = tpu.matmul %63, %64, %cst_15 {dimension_numbers = #tpu.dot_dimension_numbers<[1], [0], [0], [1], [0, 0, 1, 1], [], []>} : vector<32x32xf32>, vector<32x32xf32>, vector<32x32xf32> -> vector<32x32xf32>
    %c0_16 = arith.constant 0 : index
    %c0_17 = arith.constant 0 : index
    %66 = vector.load %arg5[%c0_16, %c0_17] : memref<1x32xf32, #tpu.memory_space<vmem>>, vector<1x32xf32>
    %67 = vector.broadcast %66 : vector<1x32xf32> to vector<32x32xf32>
    %68 = arith.addf %65, %67 : vector<32x32xf32>
    %69 = arith.addf %68, %3 : vector<32x32xf32>
    %c0_18 = arith.constant 0 : index
    %c0_19 = arith.constant 0 : index
    %70 = vector.load %arg6[%c0_18, %c0_19] : memref<1x32xf32, #tpu.memory_space<vmem>>, vector<1x32xf32>
    %c0_20 = arith.constant 0 : index
    %c0_21 = arith.constant 0 : index
    %71 = vector.load %arg7[%c0_20, %c0_21] : memref<1x32xf32, #tpu.memory_space<vmem>>, vector<1x32xf32>
    %cst_22 = arith.constant dense<0.000000e+00> : vector<32xf32>
    %72 = vector.multi_reduction <add>, %69, %cst_22 [1] : vector<32x32xf32> to vector<32xf32>
    %73 = vector.shape_cast %72 : vector<32xf32> to vector<32x1xf32>
    %cst_23 = arith.constant 3.200000e+01 : f32
    %74 = vector.broadcast %cst_23 : f32 to vector<32x1xf32>
    %75 = arith.divf %73, %74 : vector<32x1xf32>
    %76 = vector.broadcast %75 : vector<32x1xf32> to vector<32x32xf32>
    %77 = arith.subf %69, %76 : vector<32x32xf32>
    %78 = arith.mulf %77, %77 : vector<32x32xf32>
    %cst_24 = arith.constant dense<0.000000e+00> : vector<32xf32>
    %79 = vector.multi_reduction <add>, %78, %cst_24 [1] : vector<32x32xf32> to vector<32xf32>
    %80 = vector.shape_cast %79 : vector<32xf32> to vector<32x1xf32>
    %cst_25 = arith.constant 3.200000e+01 : f32
    %81 = vector.broadcast %cst_25 : f32 to vector<32x1xf32>
    %82 = arith.divf %80, %81 : vector<32x1xf32>
    %83 = vector.broadcast %75 : vector<32x1xf32> to vector<32x32xf32>
    %84 = arith.subf %69, %83 : vector<32x32xf32>
    %cst_26 = arith.constant 9.99999974E-6 : f32
    %85 = vector.broadcast %cst_26 : f32 to vector<32x1xf32>
    %86 = arith.addf %82, %85 : vector<32x1xf32>
    %87 = math.rsqrt %86 : vector<32x1xf32>
    %88 = vector.broadcast %87 : vector<32x1xf32> to vector<32x32xf32>
    %89 = arith.mulf %84, %88 : vector<32x32xf32>
    %90 = vector.broadcast %70 : vector<1x32xf32> to vector<32x32xf32>
    %91 = arith.mulf %89, %90 : vector<32x32xf32>
    %92 = vector.broadcast %71 : vector<1x32xf32> to vector<32x32xf32>
    %93 = arith.addf %91, %92 : vector<32x32xf32>
    %c0_27 = arith.constant 0 : index
    %c0_28 = arith.constant 0 : index
    %94 = vector.load %arg8[%c0_27, %c0_28] : memref<32x32xf32, #tpu.memory_space<vmem>>, vector<32x32xf32>
    %cst_29 = arith.constant dense<0.000000e+00> : vector<32x32xf32>
    %95 = tpu.matmul %93, %94, %cst_29 {dimension_numbers = #tpu.dot_dimension_numbers<[1], [0], [0], [1], [0, 0, 1, 1], [], []>} : vector<32x32xf32>, vector<32x32xf32>, vector<32x32xf32> -> vector<32x32xf32>
    %c0_30 = arith.constant 0 : index
    %c0_31 = arith.constant 0 : index
    %96 = vector.load %arg9[%c0_30, %c0_31] : memref<1x32xf32, #tpu.memory_space<vmem>>, vector<1x32xf32>
    %97 = vector.broadcast %96 : vector<1x32xf32> to vector<32x32xf32>
    %98 = arith.addf %95, %97 : vector<32x32xf32>
    %99 = arith.addf %98, %93 : vector<32x32xf32>
    %c0_32 = arith.constant 0 : index
    %c0_33 = arith.constant 0 : index
    %100 = vector.load %arg10[%c0_32, %c0_33] : memref<1x32xf32, #tpu.memory_space<vmem>>, vector<1x32xf32>
    %c0_34 = arith.constant 0 : index
    %c0_35 = arith.constant 0 : index
    %101 = vector.load %arg11[%c0_34, %c0_35] : memref<1x32xf32, #tpu.memory_space<vmem>>, vector<1x32xf32>
    %cst_36 = arith.constant dense<0.000000e+00> : vector<32xf32>
    %102 = vector.multi_reduction <add>, %99, %cst_36 [1] : vector<32x32xf32> to vector<32xf32>
    %103 = vector.shape_cast %102 : vector<32xf32> to vector<32x1xf32>
    %cst_37 = arith.constant 3.200000e+01 : f32
    %104 = vector.broadcast %cst_37 : f32 to vector<32x1xf32>
    %105 = arith.divf %103, %104 : vector<32x1xf32>
    %106 = vector.broadcast %105 : vector<32x1xf32> to vector<32x32xf32>
    %107 = arith.subf %99, %106 : vector<32x32xf32>
    %108 = arith.mulf %107, %107 : vector<32x32xf32>
    %cst_38 = arith.constant dense<0.000000e+00> : vector<32xf32>
    %109 = vector.multi_reduction <add>, %108, %cst_38 [1] : vector<32x32xf32> to vector<32xf32>
    %110 = vector.shape_cast %109 : vector<32xf32> to vector<32x1xf32>
    %cst_39 = arith.constant 3.200000e+01 : f32
    %111 = vector.broadcast %cst_39 : f32 to vector<32x1xf32>
    %112 = arith.divf %110, %111 : vector<32x1xf32>
    %113 = vector.broadcast %105 : vector<32x1xf32> to vector<32x32xf32>
    %114 = arith.subf %99, %113 : vector<32x32xf32>
    %cst_40 = arith.constant 9.99999974E-6 : f32
    %115 = vector.broadcast %cst_40 : f32 to vector<32x1xf32>
    %116 = arith.addf %112, %115 : vector<32x1xf32>
    %117 = math.rsqrt %116 : vector<32x1xf32>
    %118 = vector.broadcast %117 : vector<32x1xf32> to vector<32x32xf32>
    %119 = arith.mulf %114, %118 : vector<32x32xf32>
    %120 = vector.broadcast %100 : vector<1x32xf32> to vector<32x32xf32>
    %121 = arith.mulf %119, %120 : vector<32x32xf32>
    %122 = vector.broadcast %101 : vector<1x32xf32> to vector<32x32xf32>
    %123 = arith.addf %121, %122 : vector<32x32xf32>
    %124 = vector.shape_cast %123 : vector<32x32xf32> to vector<4x8x32xf32>
    %c0_41 = arith.constant 0 : index
    %c0_42 = arith.constant 0 : index
    %c0_43 = arith.constant 0 : index
    %125 = vector.load %arg12[%c0_41, %c0_42, %c0_43] : memref<4x8x32xf32, #tpu.memory_space<vmem>>, vector<4x8x32xf32>
    tpu.vector_store %arg12[%c0_41, %c0_42, %c0_43], %124 {strides = array<i32>} : memref<4x8x32xf32, #tpu.memory_space<vmem>>, vector<4x8x32xf32>,
    return
  }
  func.func @transform_0(%arg0: i32) -> (i32, i32, i32) {
    %c0_i32 = arith.constant 0 : i32
    %c0_i32_0 = arith.constant 0 : i32
    %c0_i32_1 = arith.constant 0 : i32
    return %arg0, %c0_i32, %c0_i32_0 : i32, i32, i32
  }
  func.func @transform_1(%arg0: i32) -> (i32, i32) {
    %c0_i32 = arith.constant 0 : i32
    %c0_i32_0 = arith.constant 0 : i32
    %c0_i32_1 = arith.constant 0 : i32
    return %c0_i32, %c0_i32_0 : i32, i32
  }
  func.func @transform_2(%arg0: i32) -> (i32, i32) {
    %c0_i32 = arith.constant 0 : i32
    %c0_i32_0 = arith.constant 0 : i32
    %c0_i32_1 = arith.constant 0 : i32
    return %c0_i32, %c0_i32_0 : i32, i32
  }
  func.func @transform_3(%arg0: i32) -> (i32, i32) {
    %c0_i32 = arith.constant 0 : i32
    %c0_i32_0 = arith.constant 0 : i32
    %c0_i32_1 = arith.constant 0 : i32
    return %c0_i32, %c0_i32_0 : i32, i32
  }
  func.func @transform_4(%arg0: i32) -> (i32, i32) {
    %c0_i32 = arith.constant 0 : i32
    %c0_i32_0 = arith.constant 0 : i32
    %c0_i32_1 = arith.constant 0 : i32
    return %c0_i32, %c0_i32_0 : i32, i32
  }
  func.func @transform_5(%arg0: i32) -> (i32, i32) {
    %c0_i32 = arith.constant 0 : i32
    %c0_i32_0 = arith.constant 0 : i32
    %c0_i32_1 = arith.constant 0 : i32
    return %c0_i32, %c0_i32_0 : i32, i32
  }
  func.func @transform_6(%arg0: i32) -> (i32, i32) {
    %c0_i32 = arith.constant 0 : i32
    %c0_i32_0 = arith.constant 0 : i32
    %c0_i32_1 = arith.constant 0 : i32
    return %c0_i32, %c0_i32_0 : i32, i32
  }
  func.func @transform_7(%arg0: i32) -> (i32, i32) {
    %c0_i32 = arith.constant 0 : i32
    %c0_i32_0 = arith.constant 0 : i32
    %c0_i32_1 = arith.constant 0 : i32
    return %c0_i32, %c0_i32_0 : i32, i32
  }
  func.func @transform_8(%arg0: i32) -> (i32, i32) {
    %c0_i32 = arith.constant 0 : i32
    %c0_i32_0 = arith.constant 0 : i32
    %c0_i32_1 = arith.constant 0 : i32
    return %c0_i32, %c0_i32_0 : i32, i32
  }
  func.func @transform_9(%arg0: i32) -> (i32, i32) {
    %c0_i32 = arith.constant 0 : i32
    %c0_i32_0 = arith.constant 0 : i32
    %c0_i32_1 = arith.constant 0 : i32
    return %c0_i32, %c0_i32_0 : i32, i32
  }
  func.func @transform_10(%arg0: i32) -> (i32, i32) {
    %c0_i32 = arith.constant 0 : i32
    %c0_i32_0 = arith.constant 0 : i32
    %c0_i32_1 = arith.constant 0 : i32
    return %c0_i32, %c0_i32_0 : i32, i32
  }
  func.func @transform_11(%arg0: i32) -> (i32, i32, i32) {
    %c0_i32 = arith.constant 0 : i32
    %c0_i32_0 = arith.constant 0 : i32
    %c0_i32_1 = arith.constant 0 : i32
    return %arg0, %c0_i32, %c0_i32_0 : i32, i32, i32
  }
}

module attributes {stable_mosaic.version = 11 : i64} {
  func.func @encoder_layer_kernel(%arg0: i32, %arg1: memref<4x8x32xf32, #tpu.memory_space<vmem>>, %arg2: memref<32x96xf32, #tpu.memory_space<vmem>>, %arg3: memref<1x96xf32, #tpu.memory_space<vmem>>, %arg4: memref<32x32xf32, #tpu.memory_space<vmem>>, %arg5: memref<1x32xf32, #tpu.memory_space<vmem>>, %arg6: memref<1x32xf32, #tpu.memory_space<vmem>>, %arg7: memref<1x32xf32, #tpu.memory_space<vmem>>, %arg8: memref<32x32xf32, #tpu.memory_space<vmem>>, %arg9: memref<1x32xf32, #tpu.memory_space<vmem>>, %arg10: memref<1x32xf32, #tpu.memory_space<vmem>>, %arg11: memref<1x32xf32, #tpu.memory_space<vmem>>, %arg12: memref<4x8x32xf32, #tpu.memory_space<vmem>>) attributes {dimension_semantics = [#tpu.dimension_semantics<parallel>], iteration_bounds = array<i64: 2>, scalar_prefetch = 0 : i64, scratch_operands = 0 : i64, tpu.core_type = #tpu.core_type<tc>, window_params = [{transform_indices = @transform_0, window_bounds = array<i64: 4, 8, 32>}, {pipeline_mode = #tpu.pipeline_mode<synchronous>, transform_indices = @transform_1, window_bounds = array<i64: 32, 96>}, {pipeline_mode = #tpu.pipeline_mode<synchronous>, transform_indices = @transform_2, window_bounds = array<i64: 1, 96>}, {pipeline_mode = #tpu.pipeline_mode<synchronous>, transform_indices = @transform_3, window_bounds = array<i64: 32, 32>}, {pipeline_mode = #tpu.pipeline_mode<synchronous>, transform_indices = @transform_4, window_bounds = array<i64: 1, 32>}, {pipeline_mode = #tpu.pipeline_mode<synchronous>, transform_indices = @transform_5, window_bounds = array<i64: 1, 32>}, {pipeline_mode = #tpu.pipeline_mode<synchronous>, transform_indices = @transform_6, window_bounds = array<i64: 1, 32>}, {pipeline_mode = #tpu.pipeline_mode<synchronous>, transform_indices = @transform_7, window_bounds = array<i64: 32, 32>}, {pipeline_mode = #tpu.pipeline_mode<synchronous>, transform_indices = @transform_8, window_bounds = array<i64: 1, 32>}, {pipeline_mode = #tpu.pipeline_mode<synchronous>, transform_indices = @transform_9, window_bounds = array<i64: 1, 32>}, {pipeline_mode = #tpu.pipeline_mode<synchronous>, transform_indices = @transform_10, window_bounds = array<i64: 1, 32>}, {transform_indices = @transform_11, window_bounds = array<i64: 4, 8, 32>}]} {
    %c0 = arith.constant 0 : index
    %c0_0 = arith.constant 0 : index
    %c0_1 = arith.constant 0 : index
    %0 = vector.load %arg1[%c0, %c0_0, %c0_1] : memref<4x8x32xf32, #tpu.memory_space<vmem>>, vector<4x8x32xf32>
    %1 = vector.shape_cast %0 : vector<4x8x32xf32> to vector<32x32xf32>
    %c0_2 = arith.constant 0 : index
    %c0_3 = arith.constant 0 : index
    %c0_4 = arith.constant 0 : index
    %2 = vector.load %arg1[%c0_2, %c0_3, %c0_4] : memref<4x8x32xf32, #tpu.memory_space<vmem>>, vector<4x8x32xf32>
    %3 = vector.shape_cast %2 : vector<4x8x32xf32> to vector<32x32xf32>
    %c0_5 = arith.constant 0 : index
    %c0_6 = arith.constant 0 : index
    %4 = vector.load %arg2[%c0_5, %c0_6] : memref<32x96xf32, #tpu.memory_space<vmem>>, vector<32x96xf32>
    %cst = arith.constant dense<0.000000e+00> : vector<32x96xf32>
    %5 = tpu.matmul %1, %4, %cst {dimension_numbers = #tpu.dot_dimension_numbers<[1], [0], [0], [1], [0, 0, 1, 1], [], []>} : vector<32x32xf32>, vector<32x96xf32>, vector<32x96xf32> -> vector<32x96xf32>
    %c0_7 = arith.constant 0 : index
    %c0_8 = arith.constant 0 : index
    %6 = vector.load %arg3[%c0_7, %c0_8] : memref<1x96xf32, #tpu.memory_space<vmem>>, vector<1x96xf32>
    %7 = vector.broadcast %6 : vector<1x96xf32> to vector<32x96xf32>
    %8 = arith.addf %5, %7 : vector<32x96xf32>
    %9 = vector.extract_strided_slice %8 {offsets = [0, 0], sizes = [32, 32], strides = [1, 1]} : vector<32x96xf32> to vector<32x32xf32>
    %10 = vector.extract_strided_slice %9 {offsets = [0, 0], sizes = [32, 8], strides = [1, 1]} : vector<32x32xf32> to vector<32x8xf32>
    %11 = vector.extract_strided_slice %9 {offsets = [0, 8], sizes = [32, 8], strides = [1, 1]} : vector<32x32xf32> to vector<32x8xf32>
    %12 = vector.extract_strided_slice %9 {offsets = [0, 16], sizes = [32, 8], strides = [1, 1]} : vector<32x32xf32> to vector<32x8xf32>
    %13 = vector.extract_strided_slice %9 {offsets = [0, 24], sizes = [32, 8], strides = [1, 1]} : vector<32x32xf32> to vector<32x8xf32>
    %14 = vector.shape_cast %10 : vector<32x8xf32> to vector<1x32x8xf32>
    %15 = vector.shape_cast %11 : vector<32x8xf32> to vector<1x32x8xf32>
    %16 = vector.shape_cast %12 : vector<32x8xf32> to vector<1x32x8xf32>
    %17 = vector.shape_cast %13 : vector<32x8xf32> to vector<1x32x8xf32>
    %18 = tpu.concatenate %14, %15, %16, %17 in 0 : vector<1x32x8xf32>, vector<1x32x8xf32>, vector<1x32x8xf32>, vector<1x32x8xf32> -> vector<4x32x8xf32>
    %19 = vector.shape_cast %18 : vector<4x32x8xf32> to vector<16x8x8xf32>
    %20 = vector.extract_strided_slice %8 {offsets = [0, 32], sizes = [32, 32], strides = [1, 1]} : vector<32x96xf32> to vector<32x32xf32>
    %21 = vector.extract_strided_slice %20 {offsets = [0, 0], sizes = [32, 8], strides = [1, 1]} : vector<32x32xf32> to vector<32x8xf32>
    %22 = vector.extract_strided_slice %20 {offsets = [0, 8], sizes = [32, 8], strides = [1, 1]} : vector<32x32xf32> to vector<32x8xf32>
    %23 = vector.extract_strided_slice %20 {offsets = [0, 16], sizes = [32, 8], strides = [1, 1]} : vector<32x32xf32> to vector<32x8xf32>
    %24 = vector.extract_strided_slice %20 {offsets = [0, 24], sizes = [32, 8], strides = [1, 1]} : vector<32x32xf32> to vector<32x8xf32>
    %25 = vector.shape_cast %21 : vector<32x8xf32> to vector<1x32x8xf32>
    %26 = vector.shape_cast %22 : vector<32x8xf32> to vector<1x32x8xf32>
    %27 = vector.shape_cast %23 : vector<32x8xf32> to vector<1x32x8xf32>
    %28 = vector.shape_cast %24 : vector<32x8xf32> to vector<1x32x8xf32>
    %29 = tpu.concatenate %25, %26, %27, %28 in 0 : vector<1x32x8xf32>, vector<1x32x8xf32>, vector<1x32x8xf32>, vector<1x32x8xf32> -> vector<4x32x8xf32>
    %30 = vector.shape_cast %29 : vector<4x32x8xf32> to vector<16x8x8xf32>
    %31 = vector.extract_strided_slice %8 {offsets = [0, 64], sizes = [32, 32], strides = [1, 1]} : vector<32x96xf32> to vector<32x32xf32>
    %32 = vector.extract_strided_slice %31 {offsets = [0, 0], sizes = [32, 8], strides = [1, 1]} : vector<32x32xf32> to vector<32x8xf32>
    %33 = vector.extract_strided_slice %31 {offsets = [0, 8], sizes = [32, 8], strides = [1, 1]} : vector<32x32xf32> to vector<32x8xf32>
    %34 = vector.extract_strided_slice %31 {offsets = [0, 16], sizes = [32, 8], strides = [1, 1]} : vector<32x32xf32> to vector<32x8xf32>
    %35 = vector.extract_strided_slice %31 {offsets = [0, 24], sizes = [32, 8], strides = [1, 1]} : vector<32x32xf32> to vector<32x8xf32>
    %36 = vector.shape_cast %32 : vector<32x8xf32> to vector<1x32x8xf32>
    %37 = vector.shape_cast %33 : vector<32x8xf32> to vector<1x32x8xf32>
    %38 = vector.shape_cast %34 : vector<32x8xf32> to vector<1x32x8xf32>
    %39 = vector.shape_cast %35 : vector<32x8xf32> to vector<1x32x8xf32>
    %40 = tpu.concatenate %36, %37, %38, %39 in 0 : vector<1x32x8xf32>, vector<1x32x8xf32>, vector<1x32x8xf32>, vector<1x32x8xf32> -> vector<4x32x8xf32>
    %41 = vector.shape_cast %40 : vector<4x32x8xf32> to vector<16x8x8xf32>
    "tpu.trace_start"() <{level = 10 : i32, message = "bqd,bkd->bqk"}> : () -> ()
    %cst_9 = arith.constant dense<0.000000e+00> : vector<16x8x8xf32>
    %42 = tpu.matmul %19, %30, %cst_9 {dimension_numbers = #tpu.dot_dimension_numbers<[2], [2], [1], [1], [0, 0, 0, 1, 1, 1], [0], [0]>} : vector<16x8x8xf32>, vector<16x8x8xf32>, vector<16x8x8xf32> -> vector<16x8x8xf32>
    "tpu.trace_stop"() : () -> ()
    %cst_10 = arith.constant dense<0xFF800000> : vector<16x8xf32>
    %43 = vector.multi_reduction <maximumf>, %42, %cst_10 [2] : vector<16x8x8xf32> to vector<16x8xf32>
    %44 = vector.shape_cast %43 : vector<16x8xf32> to vector<16x8x1xf32>
    %45 = vector.broadcast %44 : vector<16x8x1xf32> to vector<16x8x8xf32>
    %46 = arith.subf %42, %45 : vector<16x8x8xf32>
    %47 = math.exp %46 : vector<16x8x8xf32>
    %cst_11 = arith.constant dense<0.000000e+00> : vector<16x8xf32>
    %48 = vector.multi_reduction <add>, %47, %cst_11 [2] : vector<16x8x8xf32> to vector<16x8xf32>
    %49 = vector.shape_cast %48 : vector<16x8xf32> to vector<16x8x1xf32>
    %50 = tpu.reciprocal %49 : vector<16x8x1xf32> -> vector<16x8x1xf32>
    %51 = vector.broadcast %50 : vector<16x8x1xf32> to vector<16x8x8xf32>
    %52 = arith.mulf %47, %51 : vector<16x8x8xf32>
    "tpu.trace_start"() <{level = 10 : i32, message = "bqk,bkd->bqd"}> : () -> ()
    %cst_12 = arith.constant dense<0.000000e+00> : vector<16x8x8xf32>
    %53 = tpu.matmul %52, %41, %cst_12 {dimension_numbers = #tpu.dot_dimension_numbers<[2], [1], [1], [2], [0, 0, 0, 1, 1, 2], [0], [0]>} : vector<16x8x8xf32>, vector<16x8x8xf32>, vector<16x8x8xf32> -> vector<16x8x8xf32>
    "tpu.trace_stop"() : () -> ()
    %54 = vector.shape_cast %53 : vector<16x8x8xf32> to vector<4x32x8xf32>
    %55 = vector.extract_strided_slice %54 {offsets = [0, 0, 0], sizes = [1, 32, 8], strides = [1, 1, 1]} : vector<4x32x8xf32> to vector<1x32x8xf32>
    %56 = vector.shape_cast %55 : vector<1x32x8xf32> to vector<32x8xf32>
    %57 = vector.extract_strided_slice %54 {offsets = [1, 0, 0], sizes = [1, 32, 8], strides = [1, 1, 1]} : vector<4x32x8xf32> to vector<1x32x8xf32>
    %58 = vector.shape_cast %57 : vector<1x32x8xf32> to vector<32x8xf32>
    %59 = vector.extract_strided_slice %54 {offsets = [2, 0, 0], sizes = [1, 32, 8], strides = [1, 1, 1]} : vector<4x32x8xf32> to vector<1x32x8xf32>
    %60 = vector.shape_cast %59 : vector<1x32x8xf32> to vector<32x8xf32>
    %61 = vector.extract_strided_slice %54 {offsets = [3, 0, 0], sizes = [1, 32, 8], strides = [1, 1, 1]} : vector<4x32x8xf32> to vector<1x32x8xf32>
    %62 = vector.shape_cast %61 : vector<1x32x8xf32> to vector<32x8xf32>
    %63 = tpu.concatenate %56, %58, %60, %62 in 1 : vector<32x8xf32>, vector<32x8xf32>, vector<32x8xf32>, vector<32x8xf32> -> vector<32x32xf32>
    %c0_13 = arith.constant 0 : index
    %c0_14 = arith.constant 0 : index
    %64 = vector.load %arg4[%c0_13, %c0_14] : memref<32x32xf32, #tpu.memory_space<vmem>>, vector<32x32xf32>
    %cst_15 = arith.constant dense<0.000000e+00> : vector<32x32xf32>
    %65 = tpu.matmul %63, %64, %cst_15 {dimension_numbers = #tpu.dot_dimension_numbers<[1], [0], [0], [1], [0, 0, 1, 1], [], []>} : vector<32x32xf32>, vector<32x32xf32>, vector<32x32xf32> -> vector<32x32xf32>
    %c0_16 = arith.constant 0 : index
    %c0_17 = arith.constant 0 : index
    %66 = vector.load %arg5[%c0_16, %c0_17] : memref<1x32xf32, #tpu.memory_space<vmem>>, vector<1x32xf32>
    %67 = vector.broadcast %66 : vector<1x32xf32> to vector<32x32xf32>
    %68 = arith.addf %65, %67 : vector<32x32xf32>
    %69 = arith.addf %68, %3 : vector<32x32xf32>
    %c0_18 = arith.constant 0 : index
    %c0_19 = arith.constant 0 : index
    %70 = vector.load %arg6[%c0_18, %c0_19] : memref<1x32xf32, #tpu.memory_space<vmem>>, vector<1x32xf32>
    %c0_20 = arith.constant 0 : index
    %c0_21 = arith.constant 0 : index
    %71 = vector.load %arg7[%c0_20, %c0_21] : memref<1x32xf32, #tpu.memory_space<vmem>>, vector<1x32xf32>
    %cst_22 = arith.constant dense<0.000000e+00> : vector<32xf32>
    %72 = vector.multi_reduction <add>, %69, %cst_22 [1] : vector<32x32xf32> to vector<32xf32>
    %73 = vector.shape_cast %72 : vector<32xf32> to vector<32x1xf32>
    %cst_23 = arith.constant 3.200000e+01 : f32
    %74 = vector.broadcast %cst_23 : f32 to vector<32x1xf32>
    %75 = arith.divf %73, %74 : vector<32x1xf32>
    %76 = vector.broadcast %75 : vector<32x1xf32> to vector<32x32xf32>
    %77 = arith.subf %69, %76 : vector<32x32xf32>
    %78 = arith.mulf %77, %77 : vector<32x32xf32>
    %cst_24 = arith.constant dense<0.000000e+00> : vector<32xf32>
    %79 = vector.multi_reduction <add>, %78, %cst_24 [1] : vector<32x32xf32> to vector<32xf32>
    %80 = vector.shape_cast %79 : vector<32xf32> to vector<32x1xf32>
    %cst_25 = arith.constant 3.200000e+01 : f32
    %81 = vector.broadcast %cst_25 : f32 to vector<32x1xf32>
    %82 = arith.divf %80, %81 : vector<32x1xf32>
    %83 = vector.broadcast %75 : vector<32x1xf32> to vector<32x32xf32>
    %84 = arith.subf %69, %83 : vector<32x32xf32>
    %cst_26 = arith.constant 9.99999974E-6 : f32
    %85 = vector.broadcast %cst_26 : f32 to vector<32x1xf32>
    %86 = arith.addf %82, %85 : vector<32x1xf32>
    %87 = math.rsqrt %86 : vector<32x1xf32>
    %88 = vector.broadcast %87 : vector<32x1xf32> to vector<32x32xf32>
    %89 = arith.mulf %84, %88 : vector<32x32xf32>
    %90 = vector.broadcast %70 : vector<1x32xf32> to vector<32x32xf32>
    %91 = arith.mulf %89, %90 : vector<32x32xf32>
    %92 = vector.broadcast %71 : vector<1x32xf32> to vector<32x32xf32>
    %93 = arith.addf %91, %92 : vector<32x32xf32>
    %c0_27 = arith.constant 0 : index
    %c0_28 = arith.constant 0 : index
    %94 = vector.load %arg8[%c0_27, %c0_28] : memref<32x32xf32, #tpu.memory_space<vmem>>, vector<32x32xf32>
    %cst_29 = arith.constant dense<0.000000e+00> : vector<32x32xf32>
    %95 = tpu.matmul %93, %94, %cst_29 {dimension_numbers = #tpu.dot_dimension_numbers<[1], [0], [0], [1], [0, 0, 1, 1], [], []>} : vector<32x32xf32>, vector<32x32xf32>, vector<32x32xf32> -> vector<32x32xf32>
    %c0_30 = arith.constant 0 : index
    %c0_31 = arith.constant 0 : index
    %96 = vector.load %arg9[%c0_30, %c0_31] : memref<1x32xf32, #tpu.memory_space<vmem>>, vector<1x32xf32>
    %97 = vector.broadcast %96 : vector<1x32xf32> to vector<32x32xf32>
    %98 = arith.addf %95, %97 : vector<32x32xf32>
    %99 = arith.addf %98, %93 : vector<32x32xf32>
    %c0_32 = arith.constant 0 : index
    %c0_33 = arith.constant 0 : index
    %100 = vector.load %arg10[%c0_32, %c0_33] : memref<1x32xf32, #tpu.memory_space<vmem>>, vector<1x32xf32>
    %c0_34 = arith.constant 0 : index
    %c0_35 = arith.constant 0 : index
    %101 = vector.load %arg11[%c0_34, %c0_35] : memref<1x32xf32, #tpu.memory_space<vmem>>, vector<1x32xf32>
    %cst_36 = arith.constant dense<0.000000e+00> : vector<32xf32>
    %102 = vector.multi_reduction <add>, %99, %cst_36 [1] : vector<32x32xf32> to vector<32xf32>
    %103 = vector.shape_cast %102 : vector<32xf32> to vector<32x1xf32>
    %cst_37 = arith.constant 3.200000e+01 : f32
    %104 = vector.broadcast %cst_37 : f32 to vector<32x1xf32>
    %105 = arith.divf %103, %104 : vector<32x1xf32>
    %106 = vector.broadcast %105 : vector<32x1xf32> to vector<32x32xf32>
    %107 = arith.subf %99, %106 : vector<32x32xf32>
    %108 = arith.mulf %107, %107 : vector<32x32xf32>
    %cst_38 = arith.constant dense<0.000000e+00> : vector<32xf32>
    %109 = vector.multi_reduction <add>, %108, %cst_38 [1] : vector<32x32xf32> to vector<32xf32>
    %110 = vector.shape_cast %109 : vector<32xf32> to vector<32x1xf32>
    %cst_39 = arith.constant 3.200000e+01 : f32
    %111 = vector.broadcast %cst_39 : f32 to vector<32x1xf32>
    %112 = arith.divf %110, %111 : vector<32x1xf32>
    %113 = vector.broadcast %105 : vector<32x1xf32> to vector<32x32xf32>
    %114 = arith.subf %99, %113 : vector<32x32xf32>
    %cst_40 = arith.constant 9.99999974E-6 : f32
    %115 = vector.broadcast %cst_40 : f32 to vector<32x1xf32>
    %116 = arith.addf %112, %115 : vector<32x1xf32>
    %117 = math.rsqrt %116 : vector<32x1xf32>
    %118 = vector.broadcast %117 : vector<32x1xf32> to vector<32x32xf32>
    %119 = arith.mulf %114, %118 : vector<32x32xf32>
    %120 = vector.broadcast %100 : vector<1x32xf32> to vector<32x32xf32>
    %121 = arith.mulf %119, %120 : vector<32x32xf32>
    %122 = vector.broadcast %101 : vector<1x32xf32> to vector<32x32xf32>
    %123 = arith.addf %121, %122 : vector<32x32xf32>
    %124 = vector.shape_cast %123 : vector<32x32xf32> to vector<4x8x32xf32>
    %c0_41 = arith.constant 0 : index
    %c0_42 = arith.constant 0 : index
    %c0_43 = arith.constant 0 : index
    %125 = vector.load %arg12[%c0_41, %c0_42, %c0_43] : memref<4x8x32xf32, #tpu.memory_space<vmem>>, vector<4x8x32xf32>
    tpu.vector_store %arg12[%c0_41, %c0_42, %c0_43], %124 {strides = array<i32>} : memref<4x8x32xf32, #tpu.memory_space<vmem>>, vector<4x8x32xf32>,
    return
  }
  func.func @transform_0(%arg0: i32) -> (i32, i32, i32) {
    %c0_i32 = arith.constant 0 : i32
    %c0_i32_0 = arith.constant 0 : i32
    %c0_i32_1 = arith.constant 0 : i32
    return %arg0, %c0_i32, %c0_i32_0 : i32, i32, i32
  }
  func.func @transform_1(%arg0: i32) -> (i32, i32) {
    %c0_i32 = arith.constant 0 : i32
    %c0_i32_0 = arith.constant 0 : i32
    %c0_i32_1 = arith.constant 0 : i32
    return %c0_i32, %c0_i32_0 : i32, i32
  }
  func.func @transform_2(%arg0: i32) -> (i32, i32) {
    %c0_i32 = arith.constant 0 : i32
    %c0_i32_0 = arith.constant 0 : i32
    %c0_i32_1 = arith.constant 0 : i32
    return %c0_i32, %c0_i32_0 : i32, i32
  }
  func.func @transform_3(%arg0: i32) -> (i32, i32) {
    %c0_i32 = arith.constant 0 : i32
    %c0_i32_0 = arith.constant 0 : i32
    %c0_i32_1 = arith.constant 0 : i32
    return %c0_i32, %c0_i32_0 : i32, i32
  }
  func.func @transform_4(%arg0: i32) -> (i32, i32) {
    %c0_i32 = arith.constant 0 : i32
    %c0_i32_0 = arith.constant 0 : i32
    %c0_i32_1 = arith.constant 0 : i32
    return %c0_i32, %c0_i32_0 : i32, i32
  }
  func.func @transform_5(%arg0: i32) -> (i32, i32) {
    %c0_i32 = arith.constant 0 : i32
    %c0_i32_0 = arith.constant 0 : i32
    %c0_i32_1 = arith.constant 0 : i32
    return %c0_i32, %c0_i32_0 : i32, i32
  }
  func.func @transform_6(%arg0: i32) -> (i32, i32) {
    %c0_i32 = arith.constant 0 : i32
    %c0_i32_0 = arith.constant 0 : i32
    %c0_i32_1 = arith.constant 0 : i32
    return %c0_i32, %c0_i32_0 : i32, i32
  }
  func.func @transform_7(%arg0: i32) -> (i32, i32) {
    %c0_i32 = arith.constant 0 : i32
    %c0_i32_0 = arith.constant 0 : i32
    %c0_i32_1 = arith.constant 0 : i32
    return %c0_i32, %c0_i32_0 : i32, i32
  }
  func.func @transform_8(%arg0: i32) -> (i32, i32) {
    %c0_i32 = arith.constant 0 : i32
    %c0_i32_0 = arith.constant 0 : i32
    %c0_i32_1 = arith.constant 0 : i32
    return %c0_i32, %c0_i32_0 : i32, i32
  }
  func.func @transform_9(%arg0: i32) -> (i32, i32) {
    %c0_i32 = arith.constant 0 : i32
    %c0_i32_0 = arith.constant 0 : i32
    %c0_i32_1 = arith.constant 0 : i32
    return %c0_i32, %c0_i32_0 : i32, i32
  }
  func.func @transform_10(%arg0: i32) -> (i32, i32) {
    %c0_i32 = arith.constant 0 : i32
    %c0_i32_0 = arith.constant 0 : i32
    %c0_i32_1 = arith.constant 0 : i32
    return %c0_i32, %c0_i32_0 : i32, i32
  }
  func.func @transform_11(%arg0: i32) -> (i32, i32, i32) {
    %c0_i32 = arith.constant 0 : i32
    %c0_i32_0 = arith.constant 0 : i32
    %c0_i32_1 = arith.constant 0 : i32
    return %arg0, %c0_i32, %c0_i32_0 : i32, i32, i32
  }
}

</mosaic_0001>

<bundles_post_ra>
// kernel: tpu_custom_call.1
= control target key start
LH: loop header
LB: loop body
LE: loop exit
PB: predicated region body
PF: predicated region fallthrough
CT: control target
= control target key end

     0   :  { %s5989_s0 = inlined_call_operand.hbm [shape: f32[8,8,32], index: 0, kind: input, shape index: {}]   ;;  %s5990_s1 = inlined_call_operand.hbm [shape: f32[32,96], index: 1, kind: input, shape index: {}]   ;;  %s5991_s2 = inlined_call_operand.hbm [shape: f32[1,96], index: 2, kind: input, shape index: {}]   ;;  %s5992_s3 = inlined_call_operand.hbm [shape: f32[32,32], index: 3, kind: input, shape index: {}]   ;;  %s5993_s4 = inlined_call_operand.hbm [shape: f32[1,32], index: 4, kind: input, shape index: {}]   ;;  %s5994_s5 = inlined_call_operand.hbm [shape: f32[1,32], index: 5, kind: input, shape index: {}]   ;;  %s5995_s6 = inlined_call_operand.hbm [shape: f32[1,32], index: 6, kind: input, shape index: {}]   ;;  %s5996_s7 = inlined_call_operand.hbm [shape: f32[32,32], index: 7, kind: input, shape index: {}]   ;;  %s5997_s8 = inlined_call_operand.hbm [shape: f32[1,32], index: 8, kind: input, shape index: {}]   ;;  %s5998_s9 = inlined_call_operand.hbm [shape: f32[1,32], index: 9, kind: input, shape index: {}]   ;;  %s5999_s10 = inlined_call_operand.hbm [shape: f32[1,32], index: 10, kind: input, shape index: {}]   ;;  %s6000_s11 = inlined_call_operand.hbm [shape: f32[8,8,32], index: 11, kind: output, shape index: {}]  }
   0x1   :  { %6010 = sst [smem:[#allocation29_spill]] %s5989_s0 }
   0x2   :  { %6011 = sst [smem:[#allocation30_spill]] %s5990_s1 }
   0x3   :  { %6012 = sst [smem:[#allocation31_spill]] %s5991_s2 }
   0x4   :  { %6013 = sst [smem:[#allocation32_spill]] %s6000_s11 }
   0x5   :  { %16 = vsyncpa [#allocation3], 0 }
   0x6   :  { %18 = vsyncpa [#allocation3 + $0x1], 0 }
   0x7   :  { %19 = vsyncpa [#allocation6], 0 }
   0x8   :  { %20 = vsyncpa [#allocation9], 0 }
   0x9   :  { %21 = vsyncpa [#allocation12], 0 }
   0xa   :  { %22 = vsyncpa [#allocation15], 0 }
   0xb   :  { %23 = vsyncpa [#allocation18], 0 }
   0xc   :  { %24 = vsyncpa [#allocation4], 0 }
   0xd   :  { %26 = vsyncpa [#allocation4 + $0x1], 0  ;;  %s5053_s17 = smov 0   ;;  %s5055_s18 = smov 0  }
   0xe   :  { %s5057_s19 = smov 0   ;;  %s5059_s20 = smov 0  }
   0xf LB: > { %s4968_s21 = smov [#allocation5]   ;;  %s5074_s23 = sadd.s32 4294967295, %s4966_s20   ;;  %s4966_s20 = sphi %s5059_s20, %s6048_s20   ;;  %s4962_s19 = sphi %s5057_s19, %s6047_s19   ;;  %s4958_s18 = sphi %s5055_s18, %s6046_s18   ;;  %s4954_s17 = sphi %s5053_s17, %s6045_s17  }
  0x10   : > { %s311_s22 = sshll.u32 %s4968_s21, 4  ;;  %p3910_p0 = scmp.ge.s32.totalorder %s4966_s20, 1  ;;  %s5079_s22 = int_to_ptr.vmem [resolvable:$true] %s311_s22 }
  0x11   : > { %p6006_p1 = scmp.eq.s32.totalorder %s5074_s23, 0  ;;  %p299_p2 = scmp.lt.s32.totalorder %s4966_s20, 3 }
  0x12   : > { %s4969_s25 = smov [#allocation8]   ;;  %s4970_s28 = smov [#allocation11]  }
  0x13   : > { %p5081_p3 = pnand %p3910_p0, %p299_p2  ;;  %s335_s26 = sshll.u32 %s4969_s25, 4  ;;  %s5094_s26 = int_to_ptr.vmem [resolvable:$true] %s335_s26 }
  0x14   : > { %s360_s29 = sshll.u32 %s4970_s28, 4  ;;  %s6017_s1 = sld [smem:[#allocation30_spill]]  ;;  %s5096_s29 = int_to_ptr.vmem [resolvable:$true] %s360_s29 }
  0x15   : > { %s6014_s24 = scalar_select %p5081_p3, 1, 0 }
  0x16   : > { %p4370_p5 = pneg %p5081_p3 }
  0x17   : > { %6015 = sst [smem:[#allocation28_spill]] %s6014_s24 }
  0x18   : > { %p5090_p6 = pnand %p4370_p5, %p6006_p1 }
  0x1a   : > { %s4570_s13 = scalar_lea.hbm %s6017_s1, 512  ;;  %p5106_p8 = pneg %p5090_p6 }
  0x1b   : > { %p4571_p7 = scmp.ne.s32.totalorder %s6017_s1, %s4570_s13  ;;  %p4577_p11 = scmp.lt.u32.totalorder %s4570_s13, %s6017_s1 }
  0x1d   : > { %p4573_p9 = pnand %p5106_p8, %p4571_p7 }
  0x1f   : > { %p4574_p10 = pneg %p4573_p9 }
  0x21   : > { %p4579_p12 = pnand %p4577_p11, %p4574_p10 }
  0x23   : > { %4582 = shalt.err (!%p4579_p12)
}
  0x24   : > { %s4583_s28 = scalar_lea.vmem %s5079_s22, 512  ;;  %p4591_p5 = scmp.lt.s32.totalorder %s5079_s22, %s5079_s22 }
  0x25   : > { %p4584_p13 = scmp.ne.s32.totalorder %s5079_s22, %s4583_s28  ;;  %p4592_p4 = scmp.lt.s32.totalorder %s4583_s28, %s4583_s28 }
  0x27   : > { %p4586_p0 = pnand %p4584_p13, %p5106_p8  ;;  %p4593_p7 = por %p4592_p4, %p4591_p5 }
  0x29   : > { %p4587_p2 = pneg %p4586_p0 }
  0x2b   : > { %p4594_p9 = pnand %p4593_p7, %p4587_p2 }
  0x2d   : > { %4597 = shalt.err (!%p4594_p9)
}
  0x2e   : > { %s6004_s30 = smov 128   ;;  %s6008_s12 = smov 8  }
  0x2f   : > { %4373 = dma.hbm_to_vmem [thread:$0]  (!%p5090_p6), %s6017_s1, 512, %s5079_s22, [#allocation6], %s6004_s30, %s6004_s30, %s6008_s12  }
  0x30   : > { %s4598_s25 = scalar_lea.hbm %s5992_s3, 512 }
  0x31   : > { %p4599_p4 = scmp.ne.s32.totalorder %s5992_s3, %s4598_s25  ;;  %p4605_p12 = scmp.lt.u32.totalorder %s4598_s25, %s5992_s3 }
  0x33   : > { %p4601_p10 = pnand %p4599_p4, %p5106_p8 }
  0x35   : > { %p4602_p11 = pneg %p4601_p10 }
  0x37   : > { %p4607_p13 = pnand %p4605_p12, %p4602_p11 }
  0x39   : > { %4610 = shalt.err (!%p4607_p13)
}
  0x3a   : > { %s4611_s22 = scalar_lea.vmem %s5094_s26, 512  ;;  %p4619_p7 = scmp.lt.s32.totalorder %s5094_s26, %s5094_s26 }
  0x3b   : > { %p4612_p0 = scmp.ne.s32.totalorder %s5094_s26, %s4611_s22  ;;  %p4620_p9 = scmp.lt.s32.totalorder %s4611_s22, %s4611_s22 }
  0x3d   : > { %p4614_p2 = pnand %p4612_p0, %p5106_p8  ;;  %p4621_p4 = por %p4620_p9, %p4619_p7 }
  0x3f   : > { %p4615_p5 = pneg %p4614_p2 }
  0x41   : > { %p4622_p10 = pnand %p4621_p4, %p4615_p5 }
  0x43   : > { %4625 = shalt.err (!%p4622_p10)
}
  0x44   : > { %4379 = dma.hbm_to_vmem [thread:$0]  (!%p5090_p6), %s5992_s3, 512, %s5094_s26, [#allocation9], %s6004_s30, %s6004_s30, %s6008_s12  }
  0x45   : > { %s4626_s14 = scalar_lea.hbm %s5994_s5, 16 }
  0x46   : > { %p4627_p11 = scmp.ne.s32.totalorder %s5994_s5, %s4626_s14  ;;  %p4633_p0 = scmp.lt.u32.totalorder %s4626_s14, %s5994_s5 }
  0x48   : > { %p4629_p12 = pnand %p4627_p11, %p5106_p8 }
  0x4a   : > { %p4630_p13 = pneg %p4629_p12 }
  0x4c   : > { %p4635_p2 = pnand %p4633_p0, %p4630_p13 }
  0x4e   : > { %4638 = shalt.err (!%p4635_p2)
}
  0x4f   : > { %s4639_s26 = scalar_lea.vmem %s5096_s29, 16  ;;  %s4646_s22 = scalar_lea.vmem %s5096_s29, 32 }
  0x50   : > { %p4640_p5 = scmp.ne.s32.totalorder %s5096_s29, %s4639_s26  ;;  %p4647_p4 = scmp.lt.s32.totalorder %s5096_s29, %s5096_s29 }
  0x51   : > { %p4648_p10 = scmp.lt.s32.totalorder %s4646_s22, %s4639_s26 }
  0x52   : > { %p4642_p7 = pnand %p4640_p5, %p5106_p8 }
  0x53   : > { %p4649_p11 = por %p4648_p10, %p4647_p4 }
  0x54   : > { %p4643_p9 = pneg %p4642_p7 }
  0x56   : > { %p4650_p12 = pnand %p4649_p11, %p4643_p9 }
  0x58   : > { %4653 = shalt.err (!%p4650_p12)
}
  0x59   : > { %4385 = dma.hbm_to_vmem [thread:$0]  (!%p5090_p6), %s5994_s5, 16, %s5096_s29, [#allocation12]  }
  0x5a   : > { %s4973_s24 = smov [#allocation14]   ;;  %s4974_s14 = smov [#allocation17]  }
  0x5b   : > { %s381_s13 = sshll.u32 %s4973_s24, 4  ;;  %s406_s15 = sshll.u32 %s4974_s14, 4  ;;  %s382_s13 = int_to_ptr.vmem [resolvable:$true] %s381_s13  ;;  %s407_s15 = int_to_ptr.vmem [resolvable:$true] %s406_s15 }
  0x5c   : > { %s4654_s28 = scalar_lea.hbm %s5996_s7, 512 }
  0x5d   : > { %p4655_p13 = scmp.ne.s32.totalorder %s5996_s7, %s4654_s28  ;;  %p4661_p5 = scmp.lt.u32.totalorder %s4654_s28, %s5996_s7 }
  0x5f   : > { %p4657_p0 = pnand %p4655_p13, %p5106_p8 }
  0x61   : > { %p4658_p2 = pneg %p4657_p0 }
  0x63   : > { %p4663_p7 = pnand %p4661_p5, %p4658_p2 }
  0x65   : > { %4666 = shalt.err (!%p4663_p7)
}
  0x66   : > { %s4667_s29 = scalar_lea.vmem %s382_s13, 512  ;;  %p4675_p11 = scmp.lt.s32.totalorder %s382_s13, %s382_s13 }
  0x67   : > { %p4668_p9 = scmp.ne.s32.totalorder %s382_s13, %s4667_s29  ;;  %p4676_p12 = scmp.lt.s32.totalorder %s4667_s29, %s4667_s29 }
  0x69   : > { %p4670_p4 = pnand %p4668_p9, %p5106_p8  ;;  %p4677_p1 = por %p4676_p12, %p4675_p11 }
  0x6b   : > { %p4671_p10 = pneg %p4670_p4 }
  0x6d   : > { %p4678_p3 = pnand %p4677_p1, %p4671_p10 }
  0x6f   : > { %4681 = shalt.err (!%p4678_p3)
}
  0x70   : > { %s6019_s11 = smov 128   ;;  %s4682_s25 = scalar_lea.hbm %s5998_s9, 16 }
  0x71   : > { %4391 = dma.hbm_to_vmem [thread:$0]  (!%p5090_p6), %s5996_s7, 512, %s382_s13, [#allocation15], %s6019_s11, %s6019_s11, %s6008_s12  }
  0x72   : > { %p4683_p1 = scmp.ne.s32.totalorder %s5998_s9, %s4682_s25  ;;  %p4689_p0 = scmp.lt.u32.totalorder %s4682_s25, %s5998_s9 }
  0x74   : > { %p4685_p3 = pnand %p4683_p1, %p5106_p8 }
  0x76   : > { %p4686_p13 = pneg %p4685_p3 }
  0x78   : > { %p4691_p2 = pnand %p4689_p0, %p4686_p13 }
  0x7a   : > { %4694 = shalt.err (!%p4691_p2)
}
  0x7b   : > { %s4695_s29 = scalar_lea.vmem %s407_s15, 16  ;;  %s4702_s13 = scalar_lea.vmem %s407_s15, 32 }
  0x7c   : > { %p4696_p5 = scmp.ne.s32.totalorder %s407_s15, %s4695_s29  ;;  %p4703_p4 = scmp.lt.s32.totalorder %s407_s15, %s407_s15 }
  0x7d   : > { %p4704_p10 = scmp.lt.s32.totalorder %s4702_s13, %s4695_s29 }
  0x7e   : > { %p4698_p7 = pnand %p4696_p5, %p5106_p8 }
  0x7f   : > { %p4705_p11 = por %p4704_p10, %p4703_p4 }
  0x80   : > { %p4699_p9 = pneg %p4698_p7 }
  0x82   : > { %p4706_p12 = pnand %p4705_p11, %p4699_p9 }
  0x84   : > { %4709 = shalt.err (!%p4706_p12)
}
  0x85   : > { %4397 = dma.hbm_to_vmem [thread:$0]  (!%p5090_p6), %s5998_s9, 16, %s407_s15, [#allocation18]  }
  0x86   : > { %s4975_s14 = smov [#allocation7]   ;;  %s4976_s25 = smov [#allocation10]  }
  0x87   : > { %s325_s21 = sshll.u32 %s4975_s14, 4  ;;  %s349_s28 = sshll.u32 %s4976_s25, 4  ;;  %s326_s21 = int_to_ptr.vmem [resolvable:$true] %s325_s21  ;;  %s350_s28 = int_to_ptr.vmem [resolvable:$true] %s349_s28 }
  0x88   : > { %s6020_s2 = sld [smem:[#allocation31_spill]] }
  0x8e   : > { %s4710_s0 = scalar_lea.hbm %s6020_s2, 16 }
  0x8f   : > { %p4711_p1 = scmp.ne.s32.totalorder %s6020_s2, %s4710_s0  ;;  %p4717_p0 = scmp.lt.u32.totalorder %s4710_s0, %s6020_s2 }
  0x91   : > { %p4713_p3 = pnand %p4711_p1, %p5106_p8 }
  0x93   : > { %p4714_p13 = pneg %p4713_p3 }
  0x95   : > { %p4719_p2 = pnand %p4717_p0, %p4714_p13 }
  0x97   : > { %4722 = shalt.err (!%p4719_p2)
}
  0x98   : > { %s4723_s15 = scalar_lea.vmem %s326_s21, 16  ;;  %s4730_s24 = scalar_lea.vmem %s326_s21, 32 }
  0x99   : > { %p4724_p5 = scmp.ne.s32.totalorder %s326_s21, %s4723_s15  ;;  %p4731_p4 = scmp.lt.s32.totalorder %s326_s21, %s326_s21 }
  0x9a   : > { %p4732_p10 = scmp.lt.s32.totalorder %s4730_s24, %s4723_s15 }
  0x9b   : > { %p4726_p7 = pnand %p4724_p5, %p5106_p8 }
  0x9c   : > { %p4733_p11 = por %p4732_p10, %p4731_p4 }
  0x9d   : > { %p4727_p9 = pneg %p4726_p7 }
  0x9f   : > { %p4734_p12 = pnand %p4733_p11, %p4727_p9 }
  0xa1   : > { %4737 = shalt.err (!%p4734_p12)
}
  0xa2   : > { %4376 = dma.hbm_to_vmem [thread:$0]  (!%p5090_p6), %s6020_s2, 16, %s326_s21, [#allocation6]  }
  0xa3   : > { %s4738_s22 = scalar_lea.hbm %s5993_s4, 16 }
  0xa4   : > { %p4739_p1 = scmp.ne.s32.totalorder %s5993_s4, %s4738_s22  ;;  %p4745_p0 = scmp.lt.u32.totalorder %s4738_s22, %s5993_s4 }
  0xa6   : > { %p4741_p3 = pnand %p4739_p1, %p5106_p8 }
  0xa8   : > { %p4742_p13 = pneg %p4741_p3 }
  0xaa   : > { %p4747_p2 = pnand %p4745_p0, %p4742_p13 }
  0xac   : > { %4750 = shalt.err (!%p4747_p2)
}
  0xad   : > { %s4751_s15 = scalar_lea.vmem %s350_s28, 16  ;;  %s4758_s21 = scalar_lea.vmem %s350_s28, 32 }
  0xae   : > { %p4752_p5 = scmp.ne.s32.totalorder %s350_s28, %s4751_s15  ;;  %p4759_p4 = scmp.lt.s32.totalorder %s350_s28, %s350_s28 }
  0xaf   : > { %p4760_p10 = scmp.lt.s32.totalorder %s4758_s21, %s4751_s15 }
  0xb0   : > { %p4754_p7 = pnand %p4752_p5, %p5106_p8 }
  0xb1   : > { %p4761_p11 = por %p4760_p10, %p4759_p4 }
  0xb2   : > { %p4755_p9 = pneg %p4754_p7 }
  0xb4   : > { %p4762_p12 = pnand %p4761_p11, %p4755_p9 }
  0xb6   : > { %4765 = shalt.err (!%p4762_p12)
}
  0xb7   : > { %4382 = dma.hbm_to_vmem [thread:$0]  (!%p5090_p6), %s5993_s4, 16, %s350_s28, [#allocation9]  }
  0xb8   : > { %s4977_s25 = smov [#allocation13]   ;;  %s4978_s26 = smov [#allocation16]  }
  0xb9   : > { %s371_s12 = sshll.u32 %s4977_s25, 4  ;;  %s395_s22 = sshll.u32 %s4978_s26, 4  ;;  %s372_s12 = int_to_ptr.vmem [resolvable:$true] %s371_s12  ;;  %s396_s22 = int_to_ptr.vmem [resolvable:$true] %s395_s22 }
  0xba   : > { %s4766_s13 = scalar_lea.hbm %s5995_s6, 16 }
  0xbb   : > { %p4767_p1 = scmp.ne.s32.totalorder %s5995_s6, %s4766_s13  ;;  %p4773_p0 = scmp.lt.u32.totalorder %s4766_s13, %s5995_s6 }
  0xbd   : > { %p4769_p3 = pnand %p4767_p1, %p5106_p8 }
  0xbf   : > { %p4770_p13 = pneg %p4769_p3 }
  0xc1   : > { %p4775_p2 = pnand %p4773_p0, %p4770_p13 }
  0xc3   : > { %4778 = shalt.err (!%p4775_p2)
}
  0xc4   : > { %s4779_s28 = scalar_lea.vmem %s372_s12, 16  ;;  %s4786_s14 = scalar_lea.vmem %s372_s12, 32 }
  0xc5   : > { %p4780_p5 = scmp.ne.s32.totalorder %s372_s12, %s4779_s28  ;;  %p4787_p4 = scmp.lt.s32.totalorder %s372_s12, %s372_s12 }
  0xc6   : > { %p4788_p10 = scmp.lt.s32.totalorder %s4786_s14, %s4779_s28 }
  0xc7   : > { %p4782_p7 = pnand %p4780_p5, %p5106_p8 }
  0xc8   : > { %p4789_p11 = por %p4788_p10, %p4787_p4 }
  0xc9   : > { %p4783_p9 = pneg %p4782_p7 }
  0xcb   : > { %p4790_p12 = pnand %p4789_p11, %p4783_p9 }
  0xcd   : > { %4793 = shalt.err (!%p4790_p12)
}
  0xce   : > { %4388 = dma.hbm_to_vmem [thread:$0]  (!%p5090_p6), %s5995_s6, 16, %s372_s12, [#allocation12]  }
  0xcf   : > { %s4794_s13 = scalar_lea.hbm %s5997_s8, 16 }
  0xd0   : > { %p4795_p1 = scmp.ne.s32.totalorder %s5997_s8, %s4794_s13  ;;  %p4801_p0 = scmp.lt.u32.totalorder %s4794_s13, %s5997_s8 }
  0xd2   : > { %p4797_p3 = pnand %p4795_p1, %p5106_p8 }
  0xd4   : > { %p4798_p13 = pneg %p4797_p3 }
  0xd6   : > { %p4803_p2 = pnand %p4801_p0, %p4798_p13 }
  0xd8   : > { %4806 = shalt.err (!%p4803_p2)
}
  0xd9   : > { %s4807_s28 = scalar_lea.vmem %s396_s22, 16  ;;  %s4814_s12 = scalar_lea.vmem %s396_s22, 32 }
  0xda   : > { %p4808_p5 = scmp.ne.s32.totalorder %s396_s22, %s4807_s28  ;;  %p4815_p4 = scmp.lt.s32.totalorder %s396_s22, %s396_s22 }
  0xdb   : > { %p4816_p10 = scmp.lt.s32.totalorder %s4814_s12, %s4807_s28 }
  0xdc   : > { %p4810_p7 = pnand %p4808_p5, %p5106_p8 }
  0xdd   : > { %p4817_p11 = por %p4816_p10, %p4815_p4 }
  0xde   : > { %p4811_p9 = pneg %p4810_p7 }
  0xe0   : > { %p4818_p12 = pnand %p4817_p11, %p4811_p9 }
  0xe2   : > { %4821 = shalt.err (!%p4818_p12)
}
  0xe3   : > { %4394 = dma.hbm_to_vmem [thread:$0]  (!%p5090_p6), %s5997_s8, 16, %s396_s22, [#allocation15]  }
  0xe4   : > { %s4979_s26 = smov [#allocation19]   ;;  %s4822_s30 = scalar_lea.hbm %s5999_s10, 16 }
  0xe5   : > { %s417_s0 = sshll.u32 %s4979_s26, 4  ;;  %p4823_p1 = scmp.ne.s32.totalorder %s5999_s10, %s4822_s30  ;;  %s418_s0 = int_to_ptr.vmem [resolvable:$true] %s417_s0 }
  0xe6   : > { %p4829_p0 = scmp.lt.u32.totalorder %s4822_s30, %s5999_s10 }
  0xe7   : > { %p4825_p3 = pnand %p4823_p1, %p5106_p8 }
  0xe9   : > { %p4826_p13 = pneg %p4825_p3 }
  0xeb   : > { %p4831_p2 = pnand %p4829_p0, %p4826_p13 }
  0xed   : > { %4834 = shalt.err (!%p4831_p2)
}
  0xee   : > { %s4835_s22 = scalar_lea.vmem %s418_s0, 16  ;;  %s4842_s12 = scalar_lea.vmem %s418_s0, 32 }
  0xef   : > { %p4836_p5 = scmp.ne.s32.totalorder %s418_s0, %s4835_s22  ;;  %p4843_p4 = scmp.lt.s32.totalorder %s418_s0, %s418_s0 }
  0xf0   : > { %p4844_p10 = scmp.lt.s32.totalorder %s4842_s12, %s4835_s22 }
  0xf1   : > { %p4838_p7 = pnand %p4836_p5, %p5106_p8 }
  0xf2   : > { %p4845_p11 = por %p4844_p10, %p4843_p4 }
  0xf3   : > { %p4839_p9 = pneg %p4838_p7 }
  0xf5   : > { %p4846_p12 = pnand %p4845_p11, %p4839_p9 }
  0xf7   : > { %4849 = shalt.err (!%p4846_p12)
}
  0xf8   : > { %4400 = dma.hbm_to_vmem [thread:$0]  (!%p5090_p6), %s5999_s10, 16, %s418_s0, [#allocation18]  }
  0xf9   : > { %s3909_s16 = sadd.s32 4294967294, %s4966_s20   ;;  %s5311_s27 = sadd.s32 1, %s4966_s20  }
  0xfa   : > { %s36_s26 = ssub.s32 %s4966_s20, %s5311_s27  ;;  %s39_s29 = sadd.s32 1, %s4962_s19 }
  0xfb   : > { %p37_p8 = scmp.eq.s32.totalorder %s36_s26, 0  ;;  %p46_p1 = scmp.ne.s32.totalorder %s4962_s19, %s4958_s18 }
  0xfc   : > { %p47_p3 = scmp.eq.s32.totalorder %s4966_s20, 0  ;;  %p52_p13 = scmp.ne.s32.totalorder %s4958_s18, %s4954_s17 }
  0xfd   : > { %s5322_s13 = scalar_select %p37_p8, %s4962_s19, %s39_s29  }
  0xfe   : > { %p5324_p0 = por %p47_p3, %p46_p1  ;;  %p6022_p2 = scmp.eq.s32.totalorder %s5074_s23, 0 }
  0xff   : > { %p286_p5 = scmp.eq.s32.totalorder %s5074_s23, 1  ;;  %p292_p7 = scmp.eq.s32.totalorder %s3909_s16, 1 }
 0x100   : > { %p5330_p6 = por %p6022_p2, %p52_p13  ;;  %p4419_p9 = scmp.lt.s32.totalorder %s4966_s20, 2 }
 0x101   : > { %s428_s15 = sand.u32 1, %s4962_s19   ;;  %p5337_p4 = por %p286_p5, %p46_p1 }
 0x102   : > { %p5341_p10 = por %p292_p7, %p52_p13  ;;  %s3922_s28 = sshll.u32 %s428_s15, 5 }
 0x103   : > { %s6024_s21 = scalar_select %p5337_p4, 1, 0 }
 0x104   : > { %s6025_s24 = scalar_select %p5341_p10, 1, 0 }
 0x105   : > { %s4010_s22 = sshll.u32 %s4966_s20, 9  ;;  %s6026_s25 = sld [smem:[#allocation29_spill]] }
 0x106   : > { %s432_s16 = scalar_lea.vmem [#allocation2], %s3922_s28  ;;  %p5355_p11 = pnand %p4419_p9, %p5324_p0 }
 0x107   : > { %s439_s29 = sshll.u32 %s432_s16, 4  ;;  %s5359_s2 = scalar_lea.sflag [#allocation3], %s428_s15  ;;  %s5351_s29 = int_to_ptr.vmem [resolvable:$true] %s439_s29 }
 0x108   : > { %p4852_p8 = pneg %p5355_p11 }
 0x10b   : > { %s5349_s26 = scalar_lea.hbm %s6026_s25, %s4010_s22  ;;  %s4855_s30 = scalar_lea.hbm %s6026_s25, 1024 }
 0x10c   : > { %s4850_s12 = scalar_lea.hbm %s5349_s26, 512  ;;  %p4856_p13 = scmp.lt.u32.totalorder %s5349_s26, %s6026_s25 }
 0x10d   : > { %p4851_p12 = scmp.ne.s32.totalorder %s5349_s26, %s4850_s12  ;;  %p4857_p0 = scmp.lt.u32.totalorder %s4855_s30, %s4850_s12 }
 0x10e   : > { %p4859_p5 = scmp.lt.u32.totalorder %s4850_s12, %s5349_s26 }
 0x10f   : > { %p4853_p1 = pnand %p4852_p8, %p4851_p12  ;;  %p4858_p2 = por %p4857_p0, %p4856_p13 }
 0x111   : > { %p4854_p3 = pneg %p4853_p1  ;;  %p4860_p7 = por %p4859_p5, %p4858_p2 }
 0x113   : > { %p4861_p9 = pnand %p4860_p7, %p4854_p3 }
 0x115   : > { %4864 = shalt.err (!%p4861_p9)
}
 0x116   : > { %s4865_s15 = scalar_lea.vmem %s5351_s29, 512  ;;  %s4980_s28 = smov [#allocation2]  }
 0x117   : > { %p4866_p12 = scmp.ne.s32.totalorder %s5351_s29, %s4865_s15  ;;  %s4870_s22 = sshll.u32 %s4980_s28, 4  ;;  %s4871_s22 = int_to_ptr.vmem [resolvable:$false] %s4870_s22 }
 0x118   : > { %s4872_s14 = scalar_lea.vmem %s4871_s22, 1024  ;;  %p4873_p4 = scmp.lt.s32.totalorder %s5351_s29, %s4871_s22 }
 0x119   : > { %p4868_p1 = pnand %p4866_p12, %p4852_p8  ;;  %p4874_p13 = scmp.lt.s32.totalorder %s4872_s14, %s4865_s15 }
 0x11b   : > { %p4869_p10 = pneg %p4868_p1  ;;  %p4875_p0 = por %p4874_p13, %p4873_p4 }
 0x11d   : > { %p4876_p2 = pnand %p4875_p0, %p4869_p10 }
 0x11f   : > { %4879 = shalt.err (!%p4876_p2)
}
 0x120   : > { %s6028_s12 = smov 8   ;;  %s6029_s30 = sld [smem:[#allocation28_spill]] }
 0x121   : > { %4404 = dma.hbm_to_vmem [thread:$0]  (!%p5355_p11), %s5349_s26, 512, %s5351_s29, %s5359_s2, %s6019_s11, %s6019_s11, %s6028_s12  }
 0x126   : > { %p6030_p8 = scmp.ne.s32.totalorder %s6029_s30, 0 }
 0x127   : > { %s5393_s16 = sand.u32 (!%p6030_p8), 1, %s4958_s18  }
 0x128   : > { %451 = sbr.rel (%p6030_p8) target bundleno = 2782 (0xade), region = 64  ;;  %s3926_s15 = sshll.u32 (!%p6030_p8), %s5393_s16, 5 }
 0x129   : > { %s454_s28 = scalar_lea.sflag (!%p6030_p8), [#allocation3], %s5393_s16  ;;  %s5399_s1 = scalar_lea.vmem (!%p6030_p8), [#allocation2], %s3926_s15 }
 0x12f   : > { %4925 = dma.done.wait (%p5330_p6), %s454_s28, 512  }
 0x130   : > { %4927 = vsyncadd (%p5330_p6), %s454_s28, 4294966784  ;;  %p6031_p4 = scmp.eq.s32.totalorder %s5074_s23, 0 }
 0x132   : > { %4929 = dma.done.wait (%p6031_p4), [#allocation6], 528   ;;  %p6032_p10 = pmov %p6031_p4 }
 0x133   : > { %p6033_p11 = pmov %p6031_p4 }
 0x134   : > { %4931 = vsyncadd (%p6032_p10), [#allocation6], 4294966768 }
 0x135   : > { %4933 = dma.done.wait (%p6033_p11), [#allocation9], 528   ;;  %p6034_p3 = pmov %p6031_p4 }
 0x137   : > { %4935 = vsyncadd (%p6034_p3), [#allocation9], 4294966768  ;;  %p6035_p5 = pmov %p6034_p3 }
 0x138   : > { %p6036_p7 = pmov %p6034_p3 }
 0x139   : > { %4937 = dma.done.wait (%p6035_p5), [#allocation12], 32  }
 0x13a   : > { %4939 = vsyncadd (%p6036_p7), [#allocation12], 4294967264  ;;  %p6037_p6 = pmov %p6034_p3 }
 0x13b   : > { %p6038_p9 = pmov %p6034_p3 }
 0x13c   : > { %4941 = dma.done.wait (%p6037_p6), [#allocation15], 528  }
 0x13d   : > { %4943 = vsyncadd (%p6038_p9), [#allocation15], 4294966768  ;;  %p6039_p12 = pmov %p6034_p3 }
 0x13e   : > { %p6040_p1 = pmov %p6034_p3 }
 0x13f   : > { %4945 = dma.done.wait (%p6039_p12), [#allocation18], 32  }
 0x140   : > { %4947 = vsyncadd (%p6040_p1), [#allocation18], 4294967264  ;;  %vm553_vm0 = vcmask 261120   ;;  %v542_v0 = vld [vmem:[#allocation5] sm:$0xff]  ;;  %v543_v1 = vld [vmem:[#allocation5 + $0x8] sm:$0xff]  ;;  %s4981_s2 = smov 120  }
 0x141   : > { %v544_v2 = vld [vmem:[#allocation5 + $0x10] sm:$0xff]  ;;  %v4302_v3 = vpack.c.bf16 %v543_v1, %v542_v0  ;;  %v545_v4 = vld [vmem:[#allocation5 + $0x18] sm:$0xff]  ;;  %v538_v5 = vld [vmem:[%s5399_s1] sm:$0xff]  ;;  %s4982_s11 = smov 112   ;;  %v4983_v19 = vmov 0.0   ;;  %vm4984_vm1 = vmmov 0  }
 0x142   : > { %v4306_v6 = vpack.c.bf16 %v545_v4, %v544_v2  ;;  %4108 = vmatprep.mubr.msk.f32.mxu0 %vm553_vm0, %v538_v5  ;;  %v539_v7 = vld [vmem:[%s5399_s1 + $0x8] sm:$0xff]  ;;  %v540_v8 = vld [vmem:[%s5399_s1 + $0x10] sm:$0xff]  ;;  %v541_v9 = vld [vmem:[%s5399_s1 + $0x18] sm:$0xff]  ;;  %4114 = vmatprep.subr.mxu1 %v4983_v19  ;;  %s4985_s0 = smov 104   ;;  %s4986_s26 = smov 96   ;;  %vm681_vm2 = vcmask 64512  }
 0x143   : > { %4303 = vmatprep.subr.bf16.mxu0 %v4302_v3  ;;  %v3938_v10 = vld [vmem:[#allocation7] ss:$0 sm:$0xff]  ;;  %4116 = vmatprep.mubr.msk.f32.mxu1 %vm4984_vm1, %v4983_v19  ;;  %s4987_s29 = smov 64   ;;  %s4988_s22 = smov 8   ;;  %vm3340_vm3 = vcmask 130048   ;;  %vm3345_vm4 = vcmask 195584  }
 0x144   : > { %4305 = vmatpush3.bf16.msra.mxu0 %v4302_v3  ;;  %s4989_s14 = smov 16   ;;  %s4990_s12 = smov 24  }
 0x145   : > { %4307 = vmatprep.subr.bf16.mxu0 %v4306_v6  ;;  %s535_s30 = scalar_lea.vmem [#allocation20], %s3926_s15  ;;  %s4011_s28 = sshll.u32 %s5074_s23, 9 }
 0x146   : > { %s3741_s15 = sshll.u32 %s535_s30, 4  ;;  %s3728_s23 = scalar_lea.sflag [#allocation4], %s5393_s16  ;;  %s5942_s15 = int_to_ptr.vmem [resolvable:$true] %s3741_s15 }
 0x147   : > { %p6042_p0 = scmp.ne.s32.totalorder %s6024_s21, 0 }
 0x148   : > { %4309 = vmatpush3.bf16.msra.mxu0 %v4306_v6 }
 0x149   : > { %4129 = vmatprep.subr.mxu0 %v4983_v19 }
 0x14b   : > { %4109 = vmatmul.mubr.msk.f32.vlgmr.msra.gmra.mrb[0].mxu0 %vm553_vm0, %v539_v7 }
 0x14c   : > { %4111 = vmatprep.mubr.msk.f32.mxu0 %vm553_vm0, %v540_v8 }
 0x14f   : > { %4112 = vmatmul.mubr.msk.f32.gmra.mrb[2].mxu0 %vm553_vm0, %v541_v9 }
 0x150   : > { %4131 = vmatprep.mubr.msk.f32.mxu0 %vm4984_vm1, %v4983_v19 }
 0x21e   : > { %v4110_v11 = vpop.f32.mrb[0].mxu0 }
 0x21f   : > { %v632_v12 = vpop.f32.mrb[1].mxu0  ;;  %v5436_v16 = vadd.f32 %v4110_v11, %v3938_v10 }
 0x220   : > { %v5433_v13 = vadd.f32 %v3938_v10, %v632_v12 }
 0x222   : > { %v4113_v14 = vpop.f32.mrb[2].mxu0  ;;  %655 = vrot.lane.b32.xlu0 %v5433_v13, %s4981_s2 }
 0x223   : > { %v642_v15 = vpop.f32.mrb[3].mxu0  ;;  %v5442_v18 = vadd.f32 %v4113_v14, %v3938_v10 }
 0x224   : > { %v5438_v17 = vadd.f32 %v3938_v10, %v642_v15 }
 0x226   : > { %659 = vrot.lane.b32.xlu1 %v5438_v17, %s4981_s2  ;;  %657 = vrot.lane.b32.xlu0 %v5436_v16, %s4981_s2 }
 0x22a   : > { %661 = vrot.lane.b32.xlu1 %v5442_v18, %s4981_s2  ;;  %663 = vrot.lane.b32.xlu0 %v5433_v13, %s4982_s11 }
 0x22e   : > { %665 = vrot.lane.b32.xlu1 %v5436_v16, %s4982_s11  ;;  %667 = vrot.lane.b32.xlu0 %v5438_v17, %s4982_s11 }
 0x232   : > { %669 = vrot.lane.b32.xlu1 %v5442_v18, %s4982_s11  ;;  %671 = vrot.lane.b32.xlu0 %v5433_v13, %s4985_s0  ;;  %s6041_s11 = sld [smem:[#allocation32_spill]] }
 0x236   : > { %673 = vrot.lane.b32.xlu1 %v5436_v16, %s4985_s0  ;;  %675 = vrot.lane.b32.xlu0 %v5438_v17, %s4985_s0 }
 0x23a   : > { %677 = vrot.lane.b32.xlu1 %v5442_v18, %s4985_s0  ;;  %679 = vrot.lane.b32.xlu0 %v5433_v13, %s4986_s26  ;;  %s5940_s0 = scalar_lea.hbm %s6041_s11, %s4011_s28 }
 0x23e   : > { %756 = vrot.lane.b32.xlu1 %v5436_v16, %s4986_s26  ;;  %832 = vrot.lane.b32.xlu0 %v5438_v17, %s4986_s26 }
 0x242   : > { %908 = vrot.lane.b32.xlu1 %v5442_v18, %s4986_s26 }
 0x294   : > { %v656_v20 = vpop.permute.xlu0 %655 }
 0x295   : > { %984 = vrot.lane.b32.xlu0 %v656_v20, %s4986_s26 }
 0x298   : > { %v5463_v21 = vpop.permute.xlu1 %659  ;;  %v5465_v22 = vpop.permute.xlu0 %657 }
 0x299   : > { %1136 = vrot.lane.b32.xlu0 %v5463_v21, %s4986_s26  ;;  %1060 = vrot.lane.b32.xlu1 %v5465_v22, %s4986_s26 }
 0x29c   : > { %v5469_v23 = vpop.permute.xlu1 %661  ;;  %v5471_v24 = vpop.permute.xlu0 %663 }
 0x29d   : > { %1212 = vrot.lane.b32.xlu1 %v5469_v23, %s4986_s26  ;;  %1288 = vrot.lane.b32.xlu0 %v5471_v24, %s4986_s26 }
 0x2a0   : > { %v5475_v25 = vpop.permute.xlu1 %665  ;;  %v5477_v26 = vpop.permute.xlu0 %667 }
 0x2a1   : > { %1364 = vrot.lane.b32.xlu1 %v5475_v25, %s4986_s26  ;;  %1440 = vrot.lane.b32.xlu0 %v5477_v26, %s4986_s26 }
 0x2a4   : > { %v5481_v27 = vpop.permute.xlu1 %669  ;;  %v5483_v28 = vpop.permute.xlu0 %671 }
 0x2a5   : > { %1516 = vrot.lane.b32.xlu1 %v5481_v27, %s4986_s26  ;;  %1592 = vrot.lane.b32.xlu0 %v5483_v28, %s4986_s26 }
 0x2a8   : > { %v5487_v29 = vpop.permute.xlu1 %673  ;;  %v5489_v30 = vpop.permute.xlu0 %675 }
 0x2a9   : > { %1668 = vrot.lane.b32.xlu1 %v5487_v29, %s4986_s26  ;;  %1744 = vrot.lane.b32.xlu0 %v5489_v30, %s4986_s26 }
 0x2ac   : > { %v5493_v31 = vpop.permute.xlu1 %677  ;;  %v680_v32 = vpop.permute.xlu0 %679 }
 0x2ad   : > { %1820 = vrot.lane.b32.xlu1 %v5493_v31, %s4986_s26  ;;  %2148 = vrot.lane.b32.xlu0 %v5436_v16, %s4987_s29  ;;  %s4880_s26 = scalar_lea.vmem %s5942_s15, 512 }
 0x2ae   : > { %4115 = vmatpush3.xpose.msk.msra.mxu1 %vm681_vm2, %v680_v32  ;;  %p4881_p13 = scmp.ne.s32.totalorder %s5942_s15, %s4880_s26 }
 0x2af   : > { %4119 = vmatprep.subr.mxu1 %v4983_v19 }
 0x2b0   : > { %v757_v33 = vpop.permute.xlu1 %756  ;;  %v833_v35 = vpop.permute.xlu0 %832  ;;  %p4882_p2 = pnand %p4881_p13, %p6042_p0 }
 0x2b1   : > { %4117 = vmatmul.mubr.msk.f32.vlgmr.msra.gmra.mrb[0].mxu1 %vm681_vm2, %v5433_v13  ;;  %2072 = vrot.lane.b32.xlu1 %v5433_v13, %s4987_s29 }
 0x2b2   : > { %2300 = vrot.lane.b32.xlu0 %v5442_v18, %s4987_s29  ;;  %4120 = vmatpush3.xpose.msk.msra.mxu1 %vm681_vm2, %v757_v33  ;;  %p4883_p8 = pneg %p4882_p2 }
 0x2b3   : > { %4121 = vmatprep.mubr.msk.f32.mxu1 %vm4984_vm1, %v4983_v19  ;;  %4124 = vmatprep.subr.mxu1 %v4983_v19 }
 0x2b4   : > { %v909_v34 = vpop.permute.xlu1 %908 }
 0x2b5   : > { %4122 = vmatmul.mubr.msk.f32.vlgmr.msra.gmra.mrb[2].mxu1 %vm681_vm2, %v5436_v16  ;;  %4130 = vmatpush3.xpose.msk.msra.mxu0 %vm681_vm2, %v909_v34 }
 0x2b6   : > { %2224 = vrot.lane.b32.xlu1 %v5438_v17, %s4987_s29  ;;  %2680 = vrot.lane.b32.xlu0 %v5471_v24, %s4987_s29 }
 0x2b7   : > { %4125 = vmatpush3.xpose.msk.msra.mxu1 %vm681_vm2, %v833_v35  ;;  %4126 = vmatprep.mubr.msk.f32.mxu1 %vm4984_vm1, %v4983_v19 }
 0x2b8   : > { %4132 = vmatmul.mubr.msk.f32.vlgmr.msra.gmra.mrb[4].mxu0 %vm681_vm2, %v5442_v18  ;;  %4134 = vmatprep.subr.mxu1 %v4983_v19 }
 0x2b9   : > { %4139 = vmatprep.subr.mxu0 %v4983_v19  ;;  %4141 = vmatprep.mubr.msk.f32.mxu0 %vm4984_vm1, %v4983_v19 }
 0x2ba   : > { %4127 = vmatmul.mubr.msk.f32.vlgmr.msra.gmra.mrb[4].mxu1 %vm681_vm2, %v5438_v17  ;;  %2376 = vrot.lane.b32.xlu1 %v656_v20, %s4987_s29 }
 0x2bb   : > { %2528 = vrot.lane.b32.xlu0 %v5463_v21, %s4987_s29  ;;  %4136 = vmatprep.mubr.msk.f32.mxu1 %vm4984_vm1, %v4983_v19 }
 0x2be   : > { %2452 = vrot.lane.b32.xlu1 %v5465_v22, %s4987_s29 }
 0x2c2   : > { %2604 = vrot.lane.b32.xlu1 %v5469_v23, %s4987_s29 }
 0x2c6   : > { %2756 = vrot.lane.b32.xlu1 %v5475_v25, %s4987_s29 }
 0x307   : > { %v985_v36 = vpop.permute.xlu0 %984 }
 0x308   : > { %4135 = vmatpush3.xpose.msk.msra.mxu1 %vm681_vm2, %v985_v36 }
 0x309   : > { %4144 = vmatprep.subr.mxu1 %v4983_v19 }
 0x30b   : > { %v1061_v37 = vpop.permute.xlu1 %1060  ;;  %4137 = vmatmul.mubr.msk.f32.vlgmr.msra.gmra.mrb[6].mxu1 %vm681_vm2, %v656_v20  ;;  %v1137_v38 = vpop.permute.xlu0 %1136 }
 0x30c   : > { %4140 = vmatpush3.xpose.msk.msra.mxu0 %vm681_vm2, %v1061_v37  ;;  %4145 = vmatpush3.xpose.msk.msra.mxu1 %vm681_vm2, %v1137_v38 }
 0x30d   : > { %4146 = vmatprep.mubr.msk.f32.mxu1 %vm4984_vm1, %v4983_v19  ;;  %4149 = vmatprep.subr.mxu0 %v4983_v19 }
 0x30e   : > { %4154 = vmatprep.subr.mxu1 %v4983_v19 }
 0x30f   : > { %4142 = vmatmul.mubr.msk.f32.vlgmr.msra.gmra.mrb[6].mxu0 %vm681_vm2, %v5465_v22  ;;  %v1213_v39 = vpop.permute.xlu1 %1212  ;;  %4147 = vmatmul.mubr.msk.f32.vlgmr.msra.gmra.mrb[8].mxu1 %vm681_vm2, %v5463_v21  ;;  %v1289_v40 = vpop.permute.xlu0 %1288 }
 0x310   : > { %4150 = vmatpush3.xpose.msk.msra.mxu0 %vm681_vm2, %v1213_v39  ;;  %4155 = vmatpush3.xpose.msk.msra.mxu1 %vm681_vm2, %v1289_v40 }
 0x311   : > { %4151 = vmatprep.mubr.msk.f32.mxu0 %vm4984_vm1, %v4983_v19  ;;  %4156 = vmatprep.mubr.msk.f32.mxu1 %vm4984_vm1, %v4983_v19 }
 0x312   : > { %4159 = vmatprep.subr.mxu0 %v4983_v19  ;;  %4164 = vmatprep.subr.mxu1 %v4983_v19 }
 0x313   : > { %4152 = vmatmul.mubr.msk.f32.vlgmr.msra.gmra.mrb[8].mxu0 %vm681_vm2, %v5469_v23  ;;  %v1365_v41 = vpop.permute.xlu1 %1364  ;;  %4157 = vmatmul.mubr.msk.f32.vlgmr.msra.gmra.mrb[10].mxu1 %vm681_vm2, %v5471_v24  ;;  %v1441_v42 = vpop.permute.xlu0 %1440 }
 0x314   : > { %4160 = vmatpush3.xpose.msk.msra.mxu0 %vm681_vm2, %v1365_v41  ;;  %4165 = vmatpush3.xpose.msk.msra.mxu1 %vm681_vm2, %v1441_v42 }
 0x315   : > { %4161 = vmatprep.mubr.msk.f32.mxu0 %vm4984_vm1, %v4983_v19  ;;  %4166 = vmatprep.mubr.msk.f32.mxu1 %vm4984_vm1, %v4983_v19 }
 0x316   : > { %4169 = vmatprep.subr.mxu0 %v4983_v19  ;;  %4174 = vmatprep.subr.mxu1 %v4983_v19 }
 0x317   : > { %4162 = vmatmul.mubr.msk.f32.vlgmr.msra.gmra.mrb[10].mxu0 %vm681_vm2, %v5475_v25  ;;  %v1517_v43 = vpop.permute.xlu1 %1516  ;;  %4167 = vmatmul.mubr.msk.f32.vlgmr.msra.gmra.mrb[12].mxu1 %vm681_vm2, %v5477_v26  ;;  %v1593_v44 = vpop.permute.xlu0 %1592 }
 0x318   : > { %4170 = vmatpush3.xpose.msk.msra.mxu0 %vm681_vm2, %v1517_v43  ;;  %4175 = vmatpush3.xpose.msk.msra.mxu1 %vm681_vm2, %v1593_v44 }
 0x319   : > { %4171 = vmatprep.mubr.msk.f32.mxu0 %vm4984_vm1, %v4983_v19  ;;  %4176 = vmatprep.mubr.msk.f32.mxu1 %vm4984_vm1, %v4983_v19 }
 0x31a   : > { %4179 = vmatprep.subr.mxu0 %v4983_v19  ;;  %4184 = vmatprep.subr.mxu1 %v4983_v19 }
 0x31b   : > { %4172 = vmatmul.mubr.msk.f32.vlgmr.msra.gmra.mrb[12].mxu0 %vm681_vm2, %v5481_v27  ;;  %v1669_v45 = vpop.permute.xlu1 %1668  ;;  %4177 = vmatmul.mubr.msk.f32.vlgmr.msra.gmra.mrb[14].mxu1 %vm681_vm2, %v5483_v28  ;;  %v1745_v46 = vpop.permute.xlu0 %1744 }
 0x31c   : > { %4180 = vmatpush3.xpose.msk.msra.mxu0 %vm681_vm2, %v1669_v45  ;;  %4185 = vmatpush3.xpose.msk.msra.mxu1 %vm681_vm2, %v1745_v46 }
 0x31d   : > { %4181 = vmatprep.mubr.msk.f32.mxu0 %vm4984_vm1, %v4983_v19  ;;  %4186 = vmatprep.mubr.msk.f32.mxu1 %vm4984_vm1, %v4983_v19 }
 0x31e   : > { %4189 = vmatprep.subr.mxu0 %v4983_v19  ;;  %4194 = vmatprep.subr.mxu1 %v4983_v19 }
 0x31f   : > { %4182 = vmatmul.mubr.msk.f32.vlgmr.msra.gmra.mrb[14].mxu0 %vm681_vm2, %v5487_v29  ;;  %v1821_v47 = vpop.permute.xlu1 %1820  ;;  %4187 = vmatmul.mubr.msk.f32.vlgmr.msra.gmra.mrb[16].mxu1 %vm681_vm2, %v5489_v30  ;;  %v2149_v48 = vpop.permute.xlu0 %2148 }
 0x320   : > { %4190 = vmatpush3.xpose.msk.msra.mxu0 %vm681_vm2, %v1821_v47  ;;  %4191 = vmatprep.mubr.msk.f32.mxu0 %vm4984_vm1, %v4983_v19 }
 0x321   : > { %4199 = vmatprep.subr.mxu0 %v4983_v19  ;;  %4196 = vmatprep.mubr.msk.f32.mxu1 %vm4984_vm1, %v4983_v19 }
 0x323   : > { %4192 = vmatmul.mubr.msk.f32.vlgmr.msra.gmra.mrb[16].mxu0 %vm681_vm2, %v5493_v31  ;;  %v2073_v49 = vpop.permute.xlu1 %2072 }
 0x324   : > { %4195 = vmatpush3.msra.mxu1 %v2073_v49  ;;  %4200 = vmatpush3.msra.mxu0 %v2149_v48  ;;  %v5678_v41 = vpop.permute.xlu0 %2300 }
 0x325   : > { %4201 = vmatprep.mubr.msk.f32.mxu0 %vm4984_vm1, %v4983_v19  ;;  %4209 = vmatprep.subr.mxu0 %v4983_v19 }
 0x326   : > { %4204 = vmatprep.subr.mxu1 %v4983_v19 }
 0x328   : > { %v5674_v40 = vpop.permute.xlu1 %2224  ;;  %v5682_v43 = vpop.permute.xlu0 %2680 }
 0x32c   : > { %v5680_v42 = vpop.permute.xlu1 %2376 }
 0x32d   : > { %v5688_v45 = vpop.permute.xlu0 %2528 }
 0x330   : > { %v5684_v44 = vpop.permute.xlu1 %2452 }
 0x334   : > { %v5690_v46 = vpop.permute.xlu1 %2604 }
 0x384   : > { %v5612_v50 = vpop.f32.mrb[0].mxu1 }
 0x385   : > { %v4118_v51 = vpop.f32.mrb[1].mxu1  ;;  %v1896_v52 = vsel %vm681_vm2, %v5612_v50, -inf }
 0x386   : > { %1897 = vmax.xlane.f32.xlu0 %v1896_v52 }
 0x388   : > { %v5616_v53 = vpop.f32.mrb[2].mxu1 }
 0x389   : > { %v4123_v54 = vpop.f32.mrb[3].mxu1  ;;  %v1899_v55 = vsel %vm681_vm2, %v5616_v53, -inf }
 0x38a   : > { %1900 = vmax.xlane.f32.xlu1 %v1899_v55 }
 0x38b   : > { %v5620_v56 = vpop.f32.mrb[4].mxu0 }
 0x38c   : > { %v4133_v57 = vpop.f32.mrb[5].mxu0  ;;  %v1905_v58 = vsel %vm681_vm2, %v5620_v56, -inf }
 0x38d   : > { %v5624_v59 = vpop.f32.mrb[4].mxu1  ;;  %1906 = vmax.xlane.f32.xlu0 %v1905_v58 }
 0x38e   : > { %v4128_v60 = vpop.f32.mrb[5].mxu1  ;;  %v1902_v61 = vsel %vm681_vm2, %v5624_v59, -inf }
 0x391   : > { %1903 = vmax.xlane.f32.xlu0 %v1902_v61 }
 0x3de   : > { %v5628_v62 = vpop.f32.mrb[6].mxu1 }
 0x3df   : > { %v4138_v63 = vpop.f32.mrb[7].mxu1  ;;  %v1908_v0 = vsel %vm681_vm2, %v5628_v62, -inf }
 0x3e0   : > { %1909 = vmax.xlane.f32.xlu1 %v1908_v0 }
 0x3e2   : > { %v5632_v1 = vpop.f32.mrb[6].mxu0  ;;  %v5634_v2 = vpop.f32.mrb[8].mxu1 }
 0x3e3   : > { %v4143_v3 = vpop.f32.mrb[7].mxu0  ;;  %v4148_v4 = vpop.f32.mrb[9].mxu1  ;;  %v1911_v5 = vsel %vm681_vm2, %v5632_v1, -inf  ;;  %v1914_v6 = vsel %vm681_vm2, %v5634_v2, -inf }
 0x3e4   : > { %1912 = vmax.xlane.f32.xlu0 %v1911_v5  ;;  %1915 = vmax.xlane.f32.xlu1 %v1914_v6 }
 0x3e6   : > { %v5640_v7 = vpop.f32.mrb[8].mxu0  ;;  %v5642_v8 = vpop.f32.mrb[10].mxu1 }
 0x3e7   : > { %v4153_v9 = vpop.f32.mrb[9].mxu0  ;;  %v4158_v10 = vpop.f32.mrb[11].mxu1  ;;  %v1917_v11 = vsel %vm681_vm2, %v5640_v7, -inf  ;;  %v1920_v12 = vsel %vm681_vm2, %v5642_v8, -inf }
 0x3e8   : > { %1918 = vmax.xlane.f32.xlu0 %v1917_v11  ;;  %1921 = vmax.xlane.f32.xlu1 %v1920_v12 }
 0x3ea   : > { %v5648_v13 = vpop.f32.mrb[10].mxu0  ;;  %v5650_v14 = vpop.f32.mrb[12].mxu1 }
 0x3eb   : > { %v4163_v15 = vpop.f32.mrb[11].mxu0  ;;  %v4168_v16 = vpop.f32.mrb[13].mxu1  ;;  %v1923_v17 = vsel %vm681_vm2, %v5648_v13, -inf  ;;  %v1926_v18 = vsel %vm681_vm2, %v5650_v14, -inf }
 0x3ec   : > { %1924 = vmax.xlane.f32.xlu0 %v1923_v17  ;;  %1927 = vmax.xlane.f32.xlu1 %v1926_v18 }
 0x3ee   : > { %v5656_v20 = vpop.f32.mrb[12].mxu0  ;;  %v5658_v21 = vpop.f32.mrb[14].mxu1 }
 0x3ef   : > { %v4173_v22 = vpop.f32.mrb[13].mxu0  ;;  %v4178_v23 = vpop.f32.mrb[15].mxu1  ;;  %v1929_v24 = vsel %vm681_vm2, %v5656_v20, -inf  ;;  %v1932_v25 = vsel %vm681_vm2, %v5658_v21, -inf }
 0x3f0   : > { %1930 = vmax.xlane.f32.xlu0 %v1929_v24  ;;  %1933 = vmax.xlane.f32.xlu1 %v1932_v25 }
 0x3f2   : > { %v5664_v32 = vpop.f32.mrb[14].mxu0  ;;  %v5666_v33 = vpop.f32.mrb[16].mxu1 }
 0x3f3   : > { %v4183_v34 = vpop.f32.mrb[15].mxu0  ;;  %v4188_v35 = vpop.f32.mrb[17].mxu1  ;;  %v1935_v36 = vsel %vm681_vm2, %v5664_v32, -inf }
 0x3f4   : > { %1936 = vmax.xlane.f32.xlu0 %v1935_v36 }
 0x3f6   : > { %v5670_v37 = vpop.f32.mrb[16].mxu0 }
 0x3f7   : > { %v4193_v38 = vpop.f32.mrb[17].mxu0  ;;  %v1941_v39 = vsel %vm681_vm2, %v5670_v37, -inf }
 0x3f8   : > { %1942 = vmax.xlane.f32.xlu0 %v1941_v39 }
 0x401   : > { %2908 = vrot.lane.b32.xlu1 %v5481_v27, %s4987_s29  ;;  %v5694_v27 = vpop.permute.xlu1 %2756 }
 0x40e   : > { %2832 = vrot.lane.b32.xlu0 %v5477_v26, %s4987_s29  ;;  %v1938_v26 = vsel %vm681_vm2, %v5666_v33, -inf }
 0x412   : > { %2984 = vrot.lane.b32.xlu0 %v5483_v28, %s4987_s29 }
 0x413   : > { %v1898_v47 = vpop.xlane.xlu0 %1897 }
 0x417   : > { %v1901_v51 = vpop.xlane.xlu1 %1900 }
 0x418   : > { %v1945_v52 = vsub.f32 %v5616_v53, %v1901_v51  ;;  %v1944_v53 = vsub.f32 %v5612_v50, %v1898_v47 }
 0x41a   : > { %v1907_v48 = vpop.xlane.xlu0 %1906  ;;  %v1962_v55 = vmul.f32 1.442695, %v1945_v52  ;;  %v1960_v61 = vmul.f32 1.442695, %v1944_v53 }
 0x41b   : > { %v1947_v49 = vsub.f32 %v5620_v56, %v1907_v48 }
 0x41d   : > { %v1966_v54 = vmul.f32 1.442695, %v1947_v49 }
 0x41e   : > { %v1904_v60 = vpop.xlane.xlu0 %1903 }
 0x41f   : > { %4486 = vpow2.f32 %v1966_v54  ;;  %v1946_v63 = vsub.f32 %v5624_v59, %v1904_v60 }
 0x420   : > { %4488 = vpow2.f32 %v1962_v55 }
 0x421   : > { %4490 = vpow2.f32 %v1960_v61  ;;  %v1964_v0 = vmul.f32 1.442695, %v1946_v63 }
 0x423   : > { %4492 = vpow2.f32 %v1964_v0 }
 0x425   : > { %1939 = vmax.xlane.f32.xlu1 %v1938_v26 }
 0x429   : > { %v5700_v57 = vpop.eup %4486 }
 0x42a   : > { %v2001_v28 = vsel %vm681_vm2, %v5700_v57, 0.0  ;;  %v5704_v58 = vpop.eup %4488 }
 0x42b   : > { %v1995_v56 = vsel %vm681_vm2, %v5704_v58, 0.0  ;;  %v5712_v3 = vpop.eup %4490 }
 0x42c   : > { %v1992_v4 = vsel %vm681_vm2, %v5712_v3, 0.0 }
 0x42d   : > { %v5716_v5 = vpop.eup %4492 }
 0x431   : > { %2002 = vadd.xlane.f32.xlu0 %v2001_v28 }
 0x435   : > { %1996 = vadd.xlane.f32.xlu0 %v1995_v56 }
 0x436   : > { %3060 = vrot.lane.b32.xlu1 %v5487_v29, %s4987_s29  ;;  %v1998_v29 = vsel %vm681_vm2, %v5716_v5, 0.0 }
 0x45a   : > { %1993 = vadd.xlane.f32.xlu1 %v1992_v4 }
 0x45e   : > { %1999 = vadd.xlane.f32.xlu1 %v1998_v29 }
 0x46d   : > { %v1910_v50 = vpop.xlane.xlu1 %1909 }
 0x46e   : > { %v1948_v6 = vsub.f32 %v5628_v62, %v1910_v50 }
 0x470   : > { %v1968_v9 = vmul.f32 1.442695, %v1948_v6 }
 0x471   : > { %v1916_v59 = vpop.xlane.xlu1 %1915  ;;  %v1913_v10 = vpop.xlane.xlu0 %1912 }
 0x472   : > { %4494 = vpow2.f32 %v1968_v9  ;;  %v1950_v11 = vsub.f32 %v5634_v2, %v1916_v59  ;;  %v1949_v12 = vsub.f32 %v5632_v1, %v1913_v10 }
 0x474   : > { %v1972_v15 = vmul.f32 1.442695, %v1950_v11  ;;  %v1970_v16 = vmul.f32 1.442695, %v1949_v12 }
 0x475   : > { %v1922_v17 = vpop.xlane.xlu1 %1921  ;;  %v1919_v18 = vpop.xlane.xlu0 %1918 }
 0x476   : > { %4496 = vpow2.f32 %v1972_v15  ;;  %v1952_v22 = vsub.f32 %v5642_v8, %v1922_v17  ;;  %v1951_v23 = vsub.f32 %v5640_v7, %v1919_v18 }
 0x477   : > { %4498 = vpow2.f32 %v1970_v16 }
 0x478   : > { %v1976_v24 = vmul.f32 1.442695, %v1952_v22  ;;  %v1974_v62 = vmul.f32 1.442695, %v1951_v23 }
 0x479   : > { %v1928_v25 = vpop.xlane.xlu1 %1927  ;;  %v1925_v34 = vpop.xlane.xlu0 %1924 }
 0x47a   : > { %4500 = vpow2.f32 %v1976_v24  ;;  %v1954_v35 = vsub.f32 %v5650_v14, %v1928_v25  ;;  %v1953_v2 = vsub.f32 %v5648_v13, %v1925_v34 }
 0x47b   : > { %4502 = vpow2.f32 %v1974_v62 }
 0x47c   : > { %v5727_v1 = vpop.eup %4494  ;;  %v1980_v36 = vmul.f32 1.442695, %v1954_v35  ;;  %v1978_v38 = vmul.f32 1.442695, %v1953_v2 }
 0x47d   : > { %v1934_v39 = vpop.xlane.xlu1 %1933  ;;  %v1931_v47 = vpop.xlane.xlu0 %1930  ;;  %v2004_v7 = vsel %vm681_vm2, %v5727_v1, 0.0 }
 0x47e   : > { %4504 = vpow2.f32 %v1980_v36  ;;  %v1956_v8 = vsub.f32 %v5658_v21, %v1934_v39  ;;  %v1955_v48 = vsub.f32 %v5656_v20, %v1931_v47  ;;  %2005 = vadd.xlane.f32.xlu1 %v2004_v7 }
 0x47f   : > { %4506 = vpow2.f32 %v1978_v38 }
 0x480   : > { %v5733_v14 = vpop.eup %4496  ;;  %v1984_v13 = vmul.f32 1.442695, %v1956_v8  ;;  %v1982_v49 = vmul.f32 1.442695, %v1955_v48 }
 0x481   : > { %v5735_v51 = vpop.eup %4498  ;;  %v1937_v52 = vpop.xlane.xlu0 %1936  ;;  %v2010_v54 = vsel %vm681_vm2, %v5733_v14, 0.0 }
 0x482   : > { %4508 = vpow2.f32 %v1984_v13  ;;  %v1957_v55 = vsub.f32 %v5664_v32, %v1937_v52  ;;  %2011 = vadd.xlane.f32.xlu1 %v2010_v54  ;;  %v2007_v21 = vsel %vm681_vm2, %v5735_v51, 0.0  ;;  %v5777_v15 = vpop.permute.xlu1 %2908 }
 0x483   : > { %4510 = vpow2.f32 %v1982_v49  ;;  %2008 = vadd.xlane.f32.xlu0 %v2007_v21 }
 0x484   : > { %v5742_v20 = vpop.eup %4500  ;;  %v1986_v26 = vmul.f32 1.442695, %v1957_v55 }
 0x485   : > { %v5744_v28 = vpop.eup %4502  ;;  %v1943_v56 = vpop.xlane.xlu0 %1942  ;;  %v2016_v53 = vsel %vm681_vm2, %v5742_v20, 0.0 }
 0x486   : > { %4512 = vpow2.f32 %v1986_v26  ;;  %v1959_v60 = vsub.f32 %v5670_v37, %v1943_v56  ;;  %2017 = vadd.xlane.f32.xlu1 %v2016_v53  ;;  %v2013_v32 = vsel %vm681_vm2, %v5744_v28, 0.0 }
 0x487   : > { %2014 = vadd.xlane.f32.xlu0 %v2013_v32 }
 0x488   : > { %v5751_v61 = vpop.eup %4504  ;;  %v1990_v63 = vmul.f32 1.442695, %v1959_v60 }
 0x489   : > { %v5753_v0 = vpop.eup %4506  ;;  %v2022_v4 = vsel %vm681_vm2, %v5751_v61, 0.0  ;;  %v5780_v18 = vpop.permute.xlu0 %2832 }
 0x48a   : > { %4514 = vpow2.f32 %v1990_v63  ;;  %2023 = vadd.xlane.f32.xlu1 %v2022_v4  ;;  %v2019_v29 = vsel %vm681_vm2, %v5753_v0, 0.0 }
 0x48b   : > { %2020 = vadd.xlane.f32.xlu0 %v2019_v29 }
 0x48c   : > { %v5759_v37 = vpop.eup %4508 }
 0x48d   : > { %v5761_v50 = vpop.eup %4510  ;;  %v2028_v6 = vsel %vm681_vm2, %v5759_v37, 0.0  ;;  %v5782_v23 = vpop.permute.xlu0 %2984 }
 0x48e   : > { %2029 = vadd.xlane.f32.xlu1 %v2028_v6  ;;  %v2025_v9 = vsel %vm681_vm2, %v5761_v50, 0.0 }
 0x48f   : > { %2026 = vadd.xlane.f32.xlu0 %v2025_v9 }
 0x490   : > { %v5767_v59 = vpop.eup %4512 }
 0x491   : > { %v2031_v10 = vsel %vm681_vm2, %v5767_v59, 0.0 }
 0x493   : > { %2032 = vadd.xlane.f32.xlu0 %v2031_v10 }
 0x494   : > { %v5771_v11 = vpop.eup %4514 }
 0x495   : > { %v2037_v12 = vsel %vm681_vm2, %v5771_v11, 0.0 }
 0x497   : > { %2038 = vadd.xlane.f32.xlu0 %v2037_v12 }
 0x4ad   : > { %3136 = vrot.lane.b32.xlu0 %v5489_v30, %s4987_s29 }
 0x4b2   : > { %v1940_v16 = vpop.xlane.xlu1 %1939 }
 0x4b3   : > { %v1958_v17 = vsub.f32 %v5666_v33, %v1940_v16 }
 0x4b5   : > { %v1988_v22 = vmul.f32 1.442695, %v1958_v17 }
 0x4b7   : > { %4516 = vpow2.f32 %v1988_v22  ;;  %v3350_v22 = vld [vmem:[#allocation8] sm:$0xff] }
 0x4be   : > { %v2003_v24 = vpop.xlane.xlu0 %2002 }
 0x4c1   : > { %v5784_v62 = vpop.eup %4516 }
 0x4c2   : > { %v1997_v25 = vpop.xlane.xlu0 %1996  ;;  %v2034_v34 = vsel %vm681_vm2, %v5784_v62, 0.0 }
 0x4c3   : > { %4518 = vrcp.f32 %v1997_v25  ;;  %2035 = vadd.xlane.f32.xlu1 %v2034_v34  ;;  %v3352_v34 = vld [vmem:[#allocation8 + $0x10] sm:$0xff] }
 0x4c4   : > { %4520 = vrcp.f32 %v2003_v24 }
 0x4cd   : > { %v4519_v30 = vpop.eup %4518 }
 0x4ce   : > { %v2057_v35 = vmul.f32 %v4519_v30, %v5704_v58  ;;  %v4521_v33 = vpop.eup %4520  ;;  %v3353_v30 = vld [vmem:[#allocation8 + $0x18] sm:$0xff] }
 0x4cf   : > { %v2059_v2 = vmul.f32 %v4521_v33, %v5700_v57 }
 0x4d0   : > { %4202 = vmatmul.mubr.msk.f32.vlgmr.msra.gmra.mrb[18].mxu0 %vm681_vm2, %v2057_v35 }
 0x4d1   : > { %4210 = vmatpush3.msra.mxu0 %v5678_v41  ;;  %4211 = vmatprep.mubr.msk.f32.mxu0 %vm4984_vm1, %v4983_v19  ;;  %v5802_v41 = vpop.permute.xlu1 %3060 }
 0x4d2   : > { %4219 = vmatprep.subr.mxu0 %v4983_v19 }
 0x4d4   : > { %3212 = vrot.lane.b32.xlu1 %v5493_v31, %s4987_s29  ;;  %4212 = vmatmul.mubr.msk.f32.vlgmr.msra.gmra.mrb[20].mxu0 %vm681_vm2, %v2059_v2  ;;  %v4314_v2 = vpack.c.bf16 %v3353_v30, %v3352_v34  ;;  %s4991_s29 = smov [#allocation20]  }
 0x4d5   : > { %4220 = vmatpush3.msra.mxu0 %v5684_v44  ;;  %4221 = vmatprep.mubr.msk.f32.mxu0 %vm4984_vm1, %v4983_v19 }
 0x4d6   : > { %4229 = vmatprep.subr.mxu0 %v4983_v19 }
 0x4e7   : > { %v1994_v58 = vpop.xlane.xlu1 %1993 }
 0x4e8   : > { %4522 = vrcp.f32 %v1994_v58 }
 0x4eb   : > { %v2000_v36 = vpop.xlane.xlu1 %1999 }
 0x4ec   : > { %4524 = vrcp.f32 %v2000_v36 }
 0x4f2   : > { %v4523_v57 = vpop.eup %4522 }
 0x4f3   : > { %v2056_v38 = vmul.f32 %v4523_v57, %v5712_v3 }
 0x4f5   : > { %4197 = vmatmul.mubr.msk.f32.vlgmr.msra.gmra.mrb[18].mxu1 %vm681_vm2, %v2056_v38 }
 0x4f6   : > { %v4525_v31 = vpop.eup %4524  ;;  %4205 = vmatpush3.msra.mxu1 %v5674_v40  ;;  %4206 = vmatprep.mubr.msk.f32.mxu1 %vm4984_vm1, %v4983_v19 }
 0x4f7   : > { %v2058_v44 = vmul.f32 %v4525_v31, %v5716_v5  ;;  %4214 = vmatprep.subr.mxu1 %v4983_v19 }
 0x4f9   : > { %4207 = vmatmul.mubr.msk.f32.vlgmr.msra.gmra.mrb[20].mxu1 %vm681_vm2, %v2058_v44 }
 0x4fa   : > { %4215 = vmatpush3.msra.mxu1 %v5680_v42  ;;  %4216 = vmatprep.mubr.msk.f32.mxu1 %vm4984_vm1, %v4983_v19 }
 0x4fb   : > { %4224 = vmatprep.subr.mxu1 %v4983_v19 }
 0x50b   : > { %v2006_v3 = vpop.xlane.xlu1 %2005 }
 0x50c   : > { %4526 = vrcp.f32 %v2006_v3 }
 0x50f   : > { %v2012_v39 = vpop.xlane.xlu1 %2011 }
 0x510   : > { %4528 = vrcp.f32 %v2012_v39  ;;  %v2009_v40 = vpop.xlane.xlu0 %2008 }
 0x511   : > { %4530 = vrcp.f32 %v2009_v40 }
 0x513   : > { %v2018_v47 = vpop.xlane.xlu1 %2017 }
 0x514   : > { %4532 = vrcp.f32 %v2018_v47  ;;  %v2015_v5 = vpop.xlane.xlu0 %2014 }
 0x515   : > { %4534 = vrcp.f32 %v2015_v5 }
 0x516   : > { %v4527_v7 = vpop.eup %4526 }
 0x517   : > { %v2060_v8 = vmul.f32 %v4527_v7, %v5727_v1  ;;  %v2024_v48 = vpop.xlane.xlu1 %2023 }
 0x518   : > { %4536 = vrcp.f32 %v2024_v48  ;;  %v2021_v42 = vpop.xlane.xlu0 %2020 }
 0x519   : > { %4538 = vrcp.f32 %v2021_v42  ;;  %4217 = vmatmul.mubr.msk.f32.vlgmr.msra.gmra.mrb[22].mxu1 %vm681_vm2, %v2060_v8 }
 0x51a   : > { %v4529_v13 = vpop.eup %4528  ;;  %4225 = vmatpush3.msra.mxu1 %v5688_v45  ;;  %4226 = vmatprep.mubr.msk.f32.mxu1 %vm4984_vm1, %v4983_v19 }
 0x51b   : > { %v4531_v49 = vpop.eup %4530  ;;  %v2062_v52 = vmul.f32 %v4529_v13, %v5733_v14  ;;  %v2030_v54 = vpop.xlane.xlu1 %2029  ;;  %4234 = vmatprep.subr.mxu1 %v4983_v19 }
 0x51c   : > { %v2061_v1 = vmul.f32 %v4531_v49, %v5735_v51  ;;  %4540 = vrcp.f32 %v2030_v54  ;;  %v2027_v55 = vpop.xlane.xlu0 %2026 }
 0x51d   : > { %4542 = vrcp.f32 %v2027_v55  ;;  %4227 = vmatmul.mubr.msk.f32.vlgmr.msra.gmra.mrb[24].mxu1 %vm681_vm2, %v2062_v52 }
 0x51e   : > { %v4533_v21 = vpop.eup %4532  ;;  %4222 = vmatmul.mubr.msk.f32.vlgmr.msra.gmra.mrb[22].mxu0 %vm681_vm2, %v2061_v1  ;;  %4235 = vmatpush3.msra.mxu1 %v5682_v43 }
 0x51f   : > { %v4535_v45 = vpop.eup %4534  ;;  %v2064_v26 = vmul.f32 %v4533_v21, %v5742_v20  ;;  %4230 = vmatpush3.msra.mxu0 %v5690_v46  ;;  %4231 = vmatprep.mubr.msk.f32.mxu0 %vm4984_vm1, %v4983_v19 }
 0x520   : > { %v2063_v14 = vmul.f32 %v4535_v45, %v5744_v28  ;;  %v2033_v51 = vpop.xlane.xlu0 %2032  ;;  %4236 = vmatprep.mubr.msk.f32.mxu1 %vm4984_vm1, %v4983_v19  ;;  %4239 = vmatprep.subr.mxu0 %v4983_v19 }
 0x521   : > { %4544 = vrcp.f32 %v2033_v51  ;;  %4244 = vmatprep.subr.mxu1 %v4983_v19  ;;  %4237 = vmatmul.mubr.msk.f32.vlgmr.msra.gmra.mrb[26].mxu1 %vm681_vm2, %v2064_v26 }
 0x522   : > { %v4537_v43 = vpop.eup %4536  ;;  %4232 = vmatmul.mubr.msk.f32.vlgmr.msra.gmra.mrb[24].mxu0 %vm681_vm2, %v2063_v14  ;;  %4245 = vmatpush3.msra.mxu1 %v5780_v18 }
 0x523   : > { %v4539_v46 = vpop.eup %4538  ;;  %v2066_v20 = vmul.f32 %v4537_v43, %v5751_v61  ;;  %4240 = vmatpush3.msra.mxu0 %v5694_v27  ;;  %4241 = vmatprep.mubr.msk.f32.mxu0 %vm4984_vm1, %v4983_v19 }
 0x524   : > { %v2065_v28 = vmul.f32 %v4539_v46, %v5753_v0  ;;  %v2039_v56 = vpop.xlane.xlu0 %2038  ;;  %4246 = vmatprep.mubr.msk.f32.mxu1 %vm4984_vm1, %v4983_v19  ;;  %4249 = vmatprep.subr.mxu0 %v4983_v19 }
 0x525   : > { %4254 = vmatprep.subr.mxu1 %v4983_v19  ;;  %4247 = vmatmul.mubr.msk.f32.vlgmr.msra.gmra.mrb[28].mxu1 %vm681_vm2, %v2066_v20  ;;  %4546 = vrcp.f32 %v2039_v56 }
 0x526   : > { %v4541_v53 = vpop.eup %4540  ;;  %4242 = vmatmul.mubr.msk.f32.vlgmr.msra.gmra.mrb[26].mxu0 %vm681_vm2, %v2065_v28  ;;  %4255 = vmatpush3.msra.mxu1 %v5782_v23  ;;  %v3351_v23 = vld [vmem:[#allocation8 + $0x8] sm:$0xff] }
 0x527   : > { %v4543_v27 = vpop.eup %4542  ;;  %v2068_v60 = vmul.f32 %v4541_v53, %v5759_v37  ;;  %4250 = vmatpush3.msra.mxu0 %v5777_v15  ;;  %4251 = vmatprep.mubr.msk.f32.mxu0 %vm4984_vm1, %v4983_v19 }
 0x528   : > { %v2067_v32 = vmul.f32 %v4543_v27, %v5761_v50  ;;  %v3137_v61 = vpop.permute.xlu0 %3136  ;;  %4256 = vmatprep.mubr.msk.f32.mxu1 %vm4984_vm1, %v4983_v19  ;;  %4259 = vmatprep.subr.mxu0 %v4983_v19 }
 0x529   : > { %4264 = vmatprep.subr.mxu1 %v4983_v19  ;;  %4257 = vmatmul.mubr.msk.f32.vlgmr.msra.gmra.mrb[30].mxu1 %vm681_vm2, %v2068_v60 }
 0x52a   : > { %4252 = vmatmul.mubr.msk.f32.vlgmr.msra.gmra.mrb[28].mxu0 %vm681_vm2, %v2067_v32  ;;  %4265 = vmatpush3.msra.mxu1 %v3137_v61 }
 0x52b   : > { %v4545_v63 = vpop.eup %4544  ;;  %4260 = vmatpush3.msra.mxu0 %v5802_v41  ;;  %4261 = vmatprep.mubr.msk.f32.mxu0 %vm4984_vm1, %v4983_v19 }
 0x52c   : > { %v2069_v0 = vmul.f32 %v4545_v63, %v5767_v59  ;;  %4269 = vmatprep.subr.mxu0 %v4983_v19  ;;  %4266 = vmatprep.mubr.msk.f32.mxu1 %vm4984_vm1, %v4983_v19 }
 0x52e   : > { %4262 = vmatmul.mubr.msk.f32.vlgmr.msra.gmra.mrb[30].mxu0 %vm681_vm2, %v2069_v0 }
 0x52f   : > { %4271 = vmatprep.mubr.msk.f32.mxu0 %vm4984_vm1, %v4983_v19  ;;  %v4547_v29 = vpop.eup %4546 }
 0x530   : > { %v2071_v37 = vmul.f32 %v4547_v29, %v5771_v11 }
 0x550   : > { %v2036_v4 = vpop.xlane.xlu1 %2035 }
 0x551   : > { %4548 = vrcp.f32 %v2036_v4 }
 0x554   : > { %v3213_v50 = vpop.permute.xlu1 %3212 }
 0x555   : > { %4270 = vmatpush3.msra.mxu0 %v3213_v50 }
 0x556   : > { %4272 = vmatmul.mubr.msk.f32.vlgmr.msra.gmra.mrb[32].mxu0 %vm681_vm2, %v2071_v37 }
 0x55b   : > { %v4549_v6 = vpop.eup %4548 }
 0x55c   : > { %v2070_v9 = vmul.f32 %v4549_v6, %v5784_v62  ;;  %v4310_v62 = vpack.c.bf16 %v3351_v23, %v3350_v22  ;;  %v3991_v6 = vld [vmem:[#allocation10] ss:$0 sm:$0xff] }
 0x55e   : > { %4267 = vmatmul.mubr.msk.f32.vlgmr.msra.gmra.mrb[32].mxu1 %vm681_vm2, %v2070_v9  ;;  %4311 = vmatprep.subr.bf16.mxu1 %v4310_v62 }
 0x55f   : > { %4313 = vmatpush3.bf16.msra.mxu1 %v4310_v62 }
 0x560   : > { %4315 = vmatprep.subr.bf16.mxu1 %v4314_v2 }
 0x563   : > { %4317 = vmatpush3.bf16.msra.mxu1 %v4314_v2 }
 0x5a3   : > { %v5876_v59 = vpop.f32.mrb[18].mxu0 }
 0x5a4   : > { %v4203_v10 = vpop.f32.mrb[19].mxu0 }
 0x5a7   : > { %v5878_v12 = vpop.f32.mrb[20].mxu0 }
 0x5a8   : > { %v4213_v19 = vpop.f32.mrb[21].mxu0 }
 0x5c8   : > { %v5880_v15 = vpop.f32.mrb[18].mxu1 }
 0x5c9   : > { %v4198_v16 = vpop.f32.mrb[19].mxu1 }
 0x5ca   : > { %v4567_v16 = vld [vmem:[%s5399_s1] sm:$0xff] }
 0x5cc   : > { %v5882_v17 = vpop.f32.mrb[20].mxu1 }
 0x5cd   : > { %v4208_v11 = vpop.f32.mrb[21].mxu1 }
 0x5ec   : > { %v2448_v18 = vpop.f32.mrb[22].mxu1 }
 0x5ed   : > { %v4218_v24 = vpop.f32.mrb[23].mxu1  ;;  %3292 = vrot.lane.b32.xlu0 %v2448_v18, %s4988_s22 }
 0x5f0   : > { %v2600_v25 = vpop.f32.mrb[24].mxu1 }
 0x5f1   : > { %v2524_v35 = vpop.f32.mrb[22].mxu0  ;;  %v4228_v33 = vpop.f32.mrb[25].mxu1  ;;  %3296 = vrot.lane.b32.xlu0 %v2600_v25, %s4988_s22  ;;  %v4568_v25 = vld [vmem:[%s5399_s1 + $0x10] sm:$0xff] }
 0x5f2   : > { %3294 = vrot.lane.b32.xlu1 %v2524_v35, %s4988_s22  ;;  %v4223_v41 = vpop.f32.mrb[23].mxu0  ;;  %v4569_v35 = vld [vmem:[%s5399_s1 + $0x18] sm:$0xff] }
 0x5f4   : > { %v2752_v58 = vpop.f32.mrb[26].mxu1 }
 0x5f5   : > { %v2676_v36 = vpop.f32.mrb[24].mxu0  ;;  %v4238_v57 = vpop.f32.mrb[27].mxu1  ;;  %3308 = vrot.lane.b32.xlu0 %v2752_v58, %s4989_s14 }
 0x5f6   : > { %3298 = vrot.lane.b32.xlu1 %v2676_v36, %s4988_s22  ;;  %v4233_v38 = vpop.f32.mrb[25].mxu0 }
 0x5f8   : > { %v2904_v31 = vpop.f32.mrb[28].mxu1 }
 0x5f9   : > { %v2828_v44 = vpop.f32.mrb[26].mxu0  ;;  %3312 = vrot.lane.b32.xlu0 %v2904_v31, %s4989_s14  ;;  %v4248_v3 = vpop.f32.mrb[29].mxu1 }
 0x5fa   : > { %3310 = vrot.lane.b32.xlu1 %v2828_v44, %s4989_s14  ;;  %v4243_v39 = vpop.f32.mrb[27].mxu0 }
 0x5fc   : > { %v3056_v40 = vpop.f32.mrb[30].mxu1 }
 0x5fd   : > { %v2980_v47 = vpop.f32.mrb[28].mxu0  ;;  %3324 = vrot.lane.b32.xlu0 %v3056_v40, %s4990_s12  ;;  %v4258_v5 = vpop.f32.mrb[31].mxu1 }
 0x5fe   : > { %3314 = vrot.lane.b32.xlu1 %v2980_v47, %s4989_s14  ;;  %v4253_v7 = vpop.f32.mrb[29].mxu0  ;;  %v3537_v47 = vld [vmem:[#allocation14] sm:$0xff]  ;;  %v3538_v5 = vld [vmem:[#allocation14 + $0x8] sm:$0xff]  ;;  %s4884_s14 = sshll.u32 %s4991_s29, 4  ;;  %s4885_s14 = int_to_ptr.vmem [resolvable:$false] %s4884_s14 }
 0x5ff   : > { %v4318_v7 = vpack.c.bf16 %v3538_v5, %v3537_v47  ;;  %p4887_p4 = scmp.lt.s32.totalorder %s5942_s15, %s4885_s14 }
 0x601   : > { %v3132_v8 = vpop.f32.mrb[30].mxu0  ;;  %4319 = vmatprep.subr.bf16.mxu0 %v4318_v7 }
 0x602   : > { %3326 = vrot.lane.b32.xlu1 %v3132_v8, %s4990_s12  ;;  %v4263_v48 = vpop.f32.mrb[31].mxu0  ;;  %v3539_v8 = vld [vmem:[#allocation14 + $0x10] sm:$0xff]  ;;  %4321 = vmatpush3.bf16.msra.mxu0 %v4318_v7 }
 0x603   : > { %v3540_v48 = vld [vmem:[#allocation14 + $0x18] sm:$0xff] }
 0x629   : > { %v3284_v42 = vpop.f32.mrb[32].mxu0 }
 0x62a   : > { %3330 = vrot.lane.b32.xlu1 %v3284_v42, %s4990_s12  ;;  %v4273_v13 = vpop.f32.mrb[33].mxu0  ;;  %v4322_v42 = vpack.c.bf16 %v3540_v48, %v3539_v8 }
 0x62c   : > { %4323 = vmatprep.subr.bf16.mxu0 %v4322_v42 }
 0x62d   : > { %4325 = vmatpush3.bf16.msra.mxu0 %v4322_v42 }
 0x631   : > { %v3208_v49 = vpop.f32.mrb[32].mxu1 }
 0x632   : > { %3328 = vrot.lane.b32.xlu0 %v3208_v49, %s4990_s12  ;;  %v4268_v52 = vpop.f32.mrb[33].mxu1  ;;  %s4886_s12 = scalar_lea.vmem %s4885_s14, 1024 }
 0x633   : > { %p4888_p10 = scmp.lt.s32.totalorder %s4886_s12, %s4880_s26 }
 0x635   : > { %p4889_p11 = por %p4888_p10, %p4887_p4 }
 0x637   : > { %p4890_p3 = pnand %p4889_p11, %p4883_p8 }
 0x65f   : > { %v3293_v54 = vpop.permute.xlu0 %3292 }
 0x660   : > { %v3336_v51 = vsel %vm681_vm2, %v5880_v15, %v3293_v54 }
 0x663   : > { %v3297_v1 = vpop.permute.xlu0 %3296 }
 0x664   : > { %v3295_v55 = vpop.permute.xlu1 %3294  ;;  %v3338_v32 = vsel %vm681_vm2, %v5882_v17, %v3297_v1 }
 0x665   : > { %v3337_v56 = vsel %vm681_vm2, %v5876_v59, %v3295_v55 }
 0x667   : > { %v3309_v21 = vpop.permute.xlu0 %3308 }
 0x668   : > { %v3299_v45 = vpop.permute.xlu1 %3298  ;;  %v3341_v43 = vsel %vm3340_vm3, %v3336_v51, %v3309_v21 }
 0x669   : > { %v3339_v63 = vsel %vm681_vm2, %v5878_v12, %v3299_v45  ;;  %v4566_v12 = vld [vmem:[%s5399_s1 + $0x8] sm:$0xff] }
 0x66b   : > { %v3313_v26 = vpop.permute.xlu0 %3312 }
 0x66c   : > { %v3311_v14 = vpop.permute.xlu1 %3310  ;;  %v3343_v0 = vsel %vm3340_vm3, %v3338_v32, %v3313_v26 }
 0x66d   : > { %v3342_v53 = vsel %vm3340_vm3, %v3337_v56, %v3311_v14 }
 0x66f   : > { %v3325_v46 = vpop.permute.xlu0 %3324 }
 0x670   : > { %v3315_v20 = vpop.permute.xlu1 %3314  ;;  %v3346_v28 = vsel %vm3345_vm4, %v3341_v43, %v3325_v46 }
 0x671   : > { %4282 = vmatprep.mubr.msk.f32.mxu1 %vm553_vm0, %v3346_v28  ;;  %v3344_v29 = vsel %vm3340_vm3, %v3339_v63, %v3315_v20  ;;  %v3997_v63 = vld [vmem:[#allocation13] ss:$0 sm:$0xff] }
 0x674   : > { %v3327_v27 = vpop.permute.xlu1 %3326 }
 0x675   : > { %v3347_v60 = vsel %vm3345_vm4, %v3342_v53, %v3327_v27  ;;  %v3996_v27 = vld [vmem:[#allocation11] ss:$0 sm:$0xff] }
 0x676   : > { %4283 = vmatmul.mubr.msk.f32.vlgmr.msra.gmra.mrb[34].mxu1 %vm553_vm0, %v3347_v60 }
 0x69c   : > { %v3331_v61 = vpop.permute.xlu1 %3330 }
 0x69d   : > { %v3349_v50 = vsel %vm3345_vm4, %v3344_v29, %v3331_v61 }
 0x6a4   : > { %v3329_v4 = vpop.permute.xlu0 %3328 }
 0x6a5   : > { %v3348_v37 = vsel %vm3345_vm4, %v3343_v0, %v3329_v4 }
 0x6a6   : > { %4285 = vmatprep.mubr.msk.f32.mxu1 %vm553_vm0, %v3348_v37 }
 0x6a7   : > { %4286 = vmatmul.mubr.msk.f32.gmra.mrb[36].mxu1 %vm553_vm0, %v3349_v50 }
 0x749   : > { %v4284_v9 = vpop.f32.mrb[34].mxu1 }
 0x74a   : > { %v3445_v59 = vadd.f32 %v4284_v9, %v3991_v6  ;;  %v3439_v10 = vpop.f32.mrb[35].mxu1 }
 0x74b   : > { %v3440_v19 = vadd.f32 %v3991_v6, %v3439_v10 }
 0x74c   : > { %v3459_v15 = vadd.f32 %v4566_v12, %v3445_v59 }
 0x74d   : > { %v3458_v17 = vadd.f32 %v4567_v16, %v3440_v19 }
 0x74e   : > { %v3467_v11 = vsel %vm553_vm0, %v3459_v15, 0.0 }
 0x74f   : > { %3468 = vadd.xlane.f32.xlu1 %v3467_v11  ;;  %v3464_v18 = vsel %vm553_vm0, %v3458_v17, 0.0 }
 0x750   : > { %3465 = vadd.xlane.f32.xlu0 %v3464_v18 }
 0x77a   : > { %v4287_v22 = vpop.f32.mrb[36].mxu1 }
 0x77b   : > { %v3449_v23 = vpop.f32.mrb[37].mxu1  ;;  %v3455_v24 = vadd.f32 %v4287_v22, %v3991_v6 }
 0x77c   : > { %v3450_v62 = vadd.f32 %v3991_v6, %v3449_v23 }
 0x77d   : > { %v3461_v33 = vadd.f32 %v4569_v35, %v3455_v24  ;;  %v3998_v24 = vld [vmem:[#allocation16] ss:$0 sm:$0xff] }
 0x77e   : > { %v3460_v34 = vadd.f32 %v4568_v25, %v3450_v62 }
 0x77f   : > { %v3473_v2 = vsel %vm553_vm0, %v3461_v33, 0.0 }
 0x780   : > { %v3470_v30 = vsel %vm553_vm0, %v3460_v34, 0.0 }
 0x781   : > { %3471 = vadd.xlane.f32.xlu0 %v3470_v30 }
 0x785   : > { %3474 = vadd.xlane.f32.xlu0 %v3473_v2 }
 0x7dc   : > { %v3469_v41 = vpop.xlane.xlu1 %3468 }
 0x7dd   : > { %v3478_v58 = vmul.f32 0.03125, %v3469_v41  ;;  %v3466_v36 = vpop.xlane.xlu0 %3465 }
 0x7de   : > { %v3477_v57 = vmul.f32 0.03125, %v3466_v36 }
 0x7df   : > { %v3482_v38 = vsub.f32 %v3459_v15, %v3478_v58 }
 0x7e0   : > { %v3481_v31 = vsub.f32 %v3458_v17, %v3477_v57 }
 0x7e1   : > { %v3486_v44 = vmul.f32 %v3482_v38, %v3482_v38 }
 0x7e2   : > { %v3485_v3 = vmul.f32 %v3481_v31, %v3481_v31 }
 0x7e3   : > { %v3492_v39 = vsel %vm553_vm0, %v3486_v44, 0.0 }
 0x7e4   : > { %3493 = vadd.xlane.f32.xlu0 %v3492_v39  ;;  %v3489_v40 = vsel %vm553_vm0, %v3485_v3, 0.0 }
 0x7e5   : > { %3490 = vadd.xlane.f32.xlu1 %v3489_v40 }
 0x80e   : > { %v3472_v13 = vpop.xlane.xlu0 %3471 }
 0x80f   : > { %v3479_v49 = vmul.f32 0.03125, %v3472_v13 }
 0x811   : > { %v3483_v52 = vsub.f32 %v3460_v34, %v3479_v49 }
 0x812   : > { %v3475_v54 = vpop.xlane.xlu0 %3474 }
 0x813   : > { %v3480_v1 = vmul.f32 0.03125, %v3475_v54  ;;  %v3487_v55 = vmul.f32 %v3483_v52, %v3483_v52 }
 0x815   : > { %v3484_v21 = vsub.f32 %v3461_v33, %v3480_v1  ;;  %v3495_v45 = vsel %vm553_vm0, %v3487_v55, 0.0 }
 0x816   : > { %3496 = vadd.xlane.f32.xlu1 %v3495_v45 }
 0x817   : > { %v3488_v26 = vmul.f32 %v3484_v21, %v3484_v21 }
 0x819   : > { %v3498_v14 = vsel %vm553_vm0, %v3488_v26, 0.0 }
 0x81a   : > { %3499 = vadd.xlane.f32.xlu0 %v3498_v14 }
 0x871   : > { %v3494_v51 = vpop.xlane.xlu0 %3493 }
 0x872   : > { %v3502_v43 = vmul.f32 0.03125, %v3494_v51  ;;  %v3491_v46 = vpop.xlane.xlu1 %3490 }
 0x873   : > { %v3501_v20 = vmul.f32 0.03125, %v3491_v46 }
 0x874   : > { %v3506_v28 = vadd.f32 1e-05, %v3502_v43 }
 0x875   : > { %v3505_v56 = vadd.f32 1e-05, %v3501_v20 }
 0x876   : > { %4550 = vrsqrt.f32 %v3506_v28 }
 0x877   : > { %4552 = vrsqrt.f32 %v3505_v56 }
 0x880   : > { %v4551_v53 = vpop.eup %4550 }
 0x881   : > { %v4553_v60 = vpop.eup %4552  ;;  %v3514_v32 = vmul.f32 %v4551_v53, %v3482_v38 }
 0x882   : > { %v3513_v61 = vmul.f32 %v4553_v60, %v3481_v31 }
 0x883   : > { %v3524_v0 = vmul.f32 %v3996_v27, %v3514_v32 }
 0x884   : > { %v3523_v4 = vmul.f32 %v3996_v27, %v3513_v61  ;;  %v4003_v61 = vld [vmem:[#allocation17] ss:$0 sm:$0xff] }
 0x885   : > { %v3534_v37 = vadd.f32 %v3997_v63, %v3524_v0 }
 0x886   : > { %v3533_v29 = vadd.f32 %v3997_v63, %v3523_v4  ;;  %v4004_v4 = vld [vmem:[#allocation19] ss:$0 sm:$0xff] }
 0x888   : > { %4296 = vmatprep.mubr.msk.f32.mxu0 %vm553_vm0, %v3533_v29 }
 0x889   : > { %4297 = vmatmul.mubr.msk.f32.vlgmr.msra.gmra.mrb[34].mxu0 %vm553_vm0, %v3534_v37 }
 0x8a3   : > { %v3497_v50 = vpop.xlane.xlu1 %3496 }
 0x8a4   : > { %v3503_v6 = vmul.f32 0.03125, %v3497_v50 }
 0x8a6   : > { %v3507_v9 = vadd.f32 1e-05, %v3503_v6 }
 0x8a7   : > { %v3500_v59 = vpop.xlane.xlu0 %3499 }
 0x8a8   : > { %4554 = vrsqrt.f32 %v3507_v9  ;;  %v3504_v10 = vmul.f32 0.03125, %v3500_v59 }
 0x8aa   : > { %v3508_v19 = vadd.f32 1e-05, %v3504_v10 }
 0x8ac   : > { %4556 = vrsqrt.f32 %v3508_v19 }
 0x8b2   : > { %v4555_v12 = vpop.eup %4554 }
 0x8b3   : > { %v3515_v15 = vmul.f32 %v4555_v12, %v3483_v52 }
 0x8b5   : > { %v3525_v16 = vmul.f32 %v3996_v27, %v3515_v15 }
 0x8b6   : > { %v4557_v17 = vpop.eup %4556 }
 0x8b7   : > { %v3535_v11 = vadd.f32 %v3997_v63, %v3525_v16  ;;  %v3516_v18 = vmul.f32 %v4557_v17, %v3484_v21 }
 0x8b9   : > { %4299 = vmatprep.mubr.msk.f32.mxu0 %vm553_vm0, %v3535_v11  ;;  %v3526_v22 = vmul.f32 %v3996_v27, %v3516_v18 }
 0x8bb   : > { %v3536_v23 = vadd.f32 %v3997_v63, %v3526_v22 }
 0x8bd   : > { %4300 = vmatmul.mubr.msk.f32.gmra.mrb[36].mxu0 %vm553_vm0, %v3536_v23 }
 0x95c   : > { %v4298_v62 = vpop.f32.mrb[34].mxu0 }
 0x95d   : > { %v3632_v25 = vadd.f32 %v4298_v62, %v3998_v24  ;;  %v3626_v34 = vpop.f32.mrb[35].mxu0 }
 0x95e   : > { %v3627_v30 = vadd.f32 %v3998_v24, %v3626_v34 }
 0x95f   : > { %v3646_v35 = vadd.f32 %v3632_v25, %v3534_v37 }
 0x960   : > { %v3645_v33 = vadd.f32 %v3627_v30, %v3533_v29 }
 0x961   : > { %v3654_v2 = vsel %vm553_vm0, %v3646_v35, 0.0 }
 0x962   : > { %3655 = vadd.xlane.f32.xlu0 %v3654_v2  ;;  %v3651_v41 = vsel %vm553_vm0, %v3645_v33, 0.0 }
 0x963   : > { %3652 = vadd.xlane.f32.xlu1 %v3651_v41 }
 0x990   : > { %v4301_v58 = vpop.f32.mrb[36].mxu0 }
 0x991   : > { %v3642_v36 = vadd.f32 %v4301_v58, %v3998_v24  ;;  %v3636_v57 = vpop.f32.mrb[37].mxu0 }
 0x992   : > { %v3637_v38 = vadd.f32 %v3998_v24, %v3636_v57 }
 0x993   : > { %v3648_v31 = vadd.f32 %v3642_v36, %v3536_v23 }
 0x994   : > { %v3647_v44 = vadd.f32 %v3637_v38, %v3535_v11 }
 0x995   : > { %v3660_v3 = vsel %vm553_vm0, %v3648_v31, 0.0 }
 0x996   : > { %3661 = vadd.xlane.f32.xlu0 %v3660_v3  ;;  %v3657_v39 = vsel %vm553_vm0, %v3647_v44, 0.0 }
 0x997   : > { %3658 = vadd.xlane.f32.xlu1 %v3657_v39 }
 0x9ef   : > { %v3656_v40 = vpop.xlane.xlu0 %3655 }
 0x9f0   : > { %v3664_v47 = vmul.f32 0.03125, %v3656_v40  ;;  %v3653_v5 = vpop.xlane.xlu1 %3652 }
 0x9f1   : > { %v3663_v7 = vmul.f32 0.03125, %v3653_v5 }
 0x9f2   : > { %v3668_v8 = vsub.f32 %v3646_v35, %v3664_v47 }
 0x9f3   : > { %v3667_v48 = vsub.f32 %v3645_v33, %v3663_v7 }
 0x9f4   : > { %v3672_v42 = vmul.f32 %v3668_v8, %v3668_v8 }
 0x9f5   : > { %v3671_v13 = vmul.f32 %v3667_v48, %v3667_v48 }
 0x9f6   : > { %v3678_v49 = vsel %vm553_vm0, %v3672_v42, 0.0 }
 0x9f7   : > { %3679 = vadd.xlane.f32.xlu0 %v3678_v49  ;;  %v3675_v52 = vsel %vm553_vm0, %v3671_v13, 0.0 }
 0x9f8   : > { %3676 = vadd.xlane.f32.xlu1 %v3675_v52 }
 0xa23   : > { %v3662_v54 = vpop.xlane.xlu0 %3661 }
 0xa24   : > { %v3666_v1 = vmul.f32 0.03125, %v3662_v54  ;;  %v3659_v55 = vpop.xlane.xlu1 %3658 }
 0xa25   : > { %v3665_v21 = vmul.f32 0.03125, %v3659_v55 }
 0xa26   : > { %v3670_v45 = vsub.f32 %v3648_v31, %v3666_v1 }
 0xa27   : > { %v3669_v26 = vsub.f32 %v3647_v44, %v3665_v21 }
 0xa28   : > { %v3674_v14 = vmul.f32 %v3670_v45, %v3670_v45 }
 0xa29   : > { %v3673_v51 = vmul.f32 %v3669_v26, %v3669_v26 }
 0xa2a   : > { %v3684_v43 = vsel %vm553_vm0, %v3674_v14, 0.0 }
 0xa2b   : > { %3685 = vadd.xlane.f32.xlu0 %v3684_v43  ;;  %v3681_v46 = vsel %vm553_vm0, %v3673_v51, 0.0 }
 0xa2c   : > { %3682 = vadd.xlane.f32.xlu1 %v3681_v46 }
 0xa84   : > { %v3680_v20 = vpop.xlane.xlu0 %3679 }
 0xa85   : > { %v3688_v28 = vmul.f32 0.03125, %v3680_v20  ;;  %v3677_v56 = vpop.xlane.xlu1 %3676 }
 0xa86   : > { %v3687_v53 = vmul.f32 0.03125, %v3677_v56 }
 0xa87   : > { %v3692_v27 = vadd.f32 1e-05, %v3688_v28 }
 0xa88   : > { %v3691_v60 = vadd.f32 1e-05, %v3687_v53 }
 0xa89   : > { %4558 = vrsqrt.f32 %v3692_v27 }
 0xa8a   : > { %4560 = vrsqrt.f32 %v3691_v60 }
 0xa93   : > { %v4559_v32 = vpop.eup %4558 }
 0xa94   : > { %v4561_v63 = vpop.eup %4560  ;;  %v3700_v0 = vmul.f32 %v4559_v32, %v3668_v8 }
 0xa95   : > { %v3699_v29 = vmul.f32 %v4561_v63, %v3667_v48 }
 0xa96   : > { %v3710_v37 = vmul.f32 %v4003_v61, %v3700_v0 }
 0xa97   : > { %v3709_v50 = vmul.f32 %v4003_v61, %v3699_v29 }
 0xa98   : > { %v3720_v6 = vadd.f32 %v4004_v4, %v3710_v37 }
 0xa99   : > { %v3719_v9 = vadd.f32 %v4004_v4, %v3709_v50 }
 0xa9a   : > { %3724 = vst.msk [vmem:[%s535_s30 + $0x8] sm:$0xff] %vm553_vm0, %v3720_v6 }
 0xa9b   : > { %3723 = vst.msk [vmem:[%s535_s30] sm:$0xff] %vm553_vm0, %v3719_v9 }
 0xab8   : > { %v3686_v59 = vpop.xlane.xlu0 %3685 }
 0xab9   : > { %v3690_v10 = vmul.f32 0.03125, %v3686_v59  ;;  %v3683_v19 = vpop.xlane.xlu1 %3682 }
 0xaba   : > { %v3689_v12 = vmul.f32 0.03125, %v3683_v19 }
 0xabb   : > { %v3694_v15 = vadd.f32 1e-05, %v3690_v10 }
 0xabc   : > { %v3693_v16 = vadd.f32 1e-05, %v3689_v12 }
 0xabd   : > { %4562 = vrsqrt.f32 %v3694_v15 }
 0xabe   : > { %4564 = vrsqrt.f32 %v3693_v16 }
 0xac7   : > { %v4563_v17 = vpop.eup %4562 }
 0xac8   : > { %v4565_v11 = vpop.eup %4564  ;;  %v3702_v18 = vmul.f32 %v4563_v17, %v3670_v45 }
 0xac9   : > { %v3701_v22 = vmul.f32 %v4565_v11, %v3669_v26 }
 0xaca   : > { %v3712_v23 = vmul.f32 %v4003_v61, %v3702_v18 }
 0xacb   : > { %v3711_v24 = vmul.f32 %v4003_v61, %v3701_v22 }
 0xacc   : > { %v3722_v62 = vadd.f32 %v4004_v4, %v3712_v23 }
 0xacd   : > { %v3721_v25 = vadd.f32 %v4004_v4, %v3711_v24 }
 0xace   : > { %3726 = vst.msk [vmem:[%s535_s30 + $0x18] sm:$0xff] %vm553_vm0, %v3722_v62 }
 0xacf   : > { %3725 = vst.msk [vmem:[%s535_s30 + $0x10] sm:$0xff] %vm553_vm0, %v3721_v25 }
 0xad0   : > { %4893 = shalt.err (!%p4890_p3)
}
 0xad1   : > { %s4894_s30 = scalar_lea.hbm %s5940_s0, 512  ;;  %s4898_s2 = scalar_lea.hbm %s6041_s11, 1024 }
 0xad2   : > { %p4895_p5 = scmp.ne.s32.totalorder %s5940_s0, %s4894_s30  ;;  %p4899_p9 = scmp.lt.u32.totalorder %s5940_s0, %s6041_s11 }
 0xad3   : > { %p4900_p12 = scmp.lt.u32.totalorder %s4898_s2, %s4894_s30  ;;  %p4902_p13 = scmp.lt.u32.totalorder %s4894_s30, %s5940_s0 }
 0xad4   : > { %p4896_p7 = pnand %p4895_p5, %p6042_p0 }
 0xad5   : > { %p4901_p1 = por %p4900_p12, %p4899_p9 }
 0xad6   : > { %p4897_p6 = pneg %p4896_p7 }
 0xad7   : > { %p4903_p2 = por %p4902_p13, %p4901_p1 }
 0xad9   : > { %p4904_p8 = pnand %p4903_p2, %p4897_p6 }
 0xadb   : > { %4907 = shalt.err (!%p4904_p8)
}
 0xadc   : > { %s4992_s26 = smov 128  }
 0xadd   : > { %4368 = dma.vmem_to_hbm [thread:$0]  (%p6042_p0), %s5942_s15, 512, %s5940_s0, %s3728_s23, %s4992_s26, %s4992_s26, %s4988_s22  }
 0xade PF: > { %s3756_s12 = sand.u32 1, %s4954_s17   ;;  %p6043_p4 = scmp.ne.s32.totalorder %s6025_s24, 0 }
 0xadf   : > { %p6044_p10 = scmp.ge.s32.totalorder %s4966_s20, 2  ;;  %s3757_s30 = scalar_lea.sflag [#allocation4], %s3756_s12 }
 0xae1   : > { %p4406_p11 = pnand %p6044_p10, %p6043_p4 }
 0xae3   : > { %4949 = dma.done.wait (!%p4406_p11), %s3757_s30, 512  }
 0xae4   : > { %4951 = vsyncadd (!%p4406_p11), %s3757_s30, 4294966784  ;;  %p29_p3 = scmp.ge.s32.totalorder %s5311_s27, 4   ;;  %s6045_s17 = smov %s4958_s18 }
 0xae5   : > { %s6046_s18 = smov %s4962_s19  ;;  %s6047_s19 = smov %s5322_s13 }
 0xae6   : > { %s6048_s20 = smov %s5311_s27  ;;  %31 = sbr.rel (!%p29_p3) target bundleno = 15 (0xf), region = 149 }
 0xaed   :  { %3762 = vsyncpa [#allocation3], 1 }
 0xaee   :  { %3764 = vsyncpa [#allocation3 + $0x1], 1 }
 0xaef   :  { %3765 = vsyncpa [#allocation6], 1 }
 0xaf0   :  { %3766 = vsyncpa [#allocation9], 1 }
 0xaf1   :  { %3767 = vsyncpa [#allocation12], 1 }
 0xaf2   :  { %3768 = vsyncpa [#allocation15], 1 }
 0xaf3   :  { %3769 = vsyncpa [#allocation18], 1 }
 0xaf4   :  { %3770 = vsyncpa [#allocation4], 1 }
 0xaf5   :  { %3772 = vsyncpa [#allocation4 + $0x1], 1 }

// kernel: tpu_custom_call.1
= control target key start
LH: loop header
LB: loop body
LE: loop exit
PB: predicated region body
PF: predicated region fallthrough
CT: control target
= control target key end

     0   :  { %s5989_s0 = inlined_call_operand.hbm [shape: f32[8,8,32], index: 0, kind: input, shape index: {}]   ;;  %s5990_s1 = inlined_call_operand.hbm [shape: f32[32,96], index: 1, kind: input, shape index: {}]   ;;  %s5991_s2 = inlined_call_operand.hbm [shape: f32[1,96], index: 2, kind: input, shape index: {}]   ;;  %s5992_s3 = inlined_call_operand.hbm [shape: f32[32,32], index: 3, kind: input, shape index: {}]   ;;  %s5993_s4 = inlined_call_operand.hbm [shape: f32[1,32], index: 4, kind: input, shape index: {}]   ;;  %s5994_s5 = inlined_call_operand.hbm [shape: f32[1,32], index: 5, kind: input, shape index: {}]   ;;  %s5995_s6 = inlined_call_operand.hbm [shape: f32[1,32], index: 6, kind: input, shape index: {}]   ;;  %s5996_s7 = inlined_call_operand.hbm [shape: f32[32,32], index: 7, kind: input, shape index: {}]   ;;  %s5997_s8 = inlined_call_operand.hbm [shape: f32[1,32], index: 8, kind: input, shape index: {}]   ;;  %s5998_s9 = inlined_call_operand.hbm [shape: f32[1,32], index: 9, kind: input, shape index: {}]   ;;  %s5999_s10 = inlined_call_operand.hbm [shape: f32[1,32], index: 10, kind: input, shape index: {}]   ;;  %s6000_s11 = inlined_call_operand.hbm [shape: f32[8,8,32], index: 11, kind: output, shape index: {}]  }
   0x1   :  { %6010 = sst [smem:[#allocation29_spill]] %s5989_s0 }
   0x2   :  { %6011 = sst [smem:[#allocation30_spill]] %s5990_s1 }
   0x3   :  { %6012 = sst [smem:[#allocation31_spill]] %s5991_s2 }
   0x4   :  { %6013 = sst [smem:[#allocation32_spill]] %s6000_s11 }
   0x5   :  { %16 = vsyncpa [#allocation3], 0 }
   0x6   :  { %18 = vsyncpa [#allocation3 + $0x1], 0 }
   0x7   :  { %19 = vsyncpa [#allocation6], 0 }
   0x8   :  { %20 = vsyncpa [#allocation9], 0 }
   0x9   :  { %21 = vsyncpa [#allocation12], 0 }
   0xa   :  { %22 = vsyncpa [#allocation15], 0 }
   0xb   :  { %23 = vsyncpa [#allocation18], 0 }
   0xc   :  { %24 = vsyncpa [#allocation4], 0 }
   0xd   :  { %26 = vsyncpa [#allocation4 + $0x1], 0  ;;  %s5053_s17 = smov 0   ;;  %s5055_s18 = smov 0  }
   0xe   :  { %s5057_s19 = smov 0   ;;  %s5059_s20 = smov 0  }
   0xf LB: > { %s4968_s21 = smov [#allocation5]   ;;  %s5074_s23 = sadd.s32 4294967295, %s4966_s20   ;;  %s4966_s20 = sphi %s5059_s20, %s6048_s20   ;;  %s4962_s19 = sphi %s5057_s19, %s6047_s19   ;;  %s4958_s18 = sphi %s5055_s18, %s6046_s18   ;;  %s4954_s17 = sphi %s5053_s17, %s6045_s17  }
  0x10   : > { %s311_s22 = sshll.u32 %s4968_s21, 4  ;;  %p3910_p0 = scmp.ge.s32.totalorder %s4966_s20, 1  ;;  %s5079_s22 = int_to_ptr.vmem [resolvable:$true] %s311_s22 }
  0x11   : > { %p6006_p1 = scmp.eq.s32.totalorder %s5074_s23, 0  ;;  %p299_p2 = scmp.lt.s32.totalorder %s4966_s20, 3 }
  0x12   : > { %s4969_s25 = smov [#allocation8]   ;;  %s4970_s28 = smov [#allocation11]  }
  0x13   : > { %p5081_p3 = pnand %p3910_p0, %p299_p2  ;;  %s335_s26 = sshll.u32 %s4969_s25, 4  ;;  %s5094_s26 = int_to_ptr.vmem [resolvable:$true] %s335_s26 }
  0x14   : > { %s360_s29 = sshll.u32 %s4970_s28, 4  ;;  %s6017_s1 = sld [smem:[#allocation30_spill]]  ;;  %s5096_s29 = int_to_ptr.vmem [resolvable:$true] %s360_s29 }
  0x15   : > { %s6014_s24 = scalar_select %p5081_p3, 1, 0 }
  0x16   : > { %p4370_p5 = pneg %p5081_p3 }
  0x17   : > { %6015 = sst [smem:[#allocation28_spill]] %s6014_s24 }
  0x18   : > { %p5090_p6 = pnand %p4370_p5, %p6006_p1 }
  0x1a   : > { %s4570_s13 = scalar_lea.hbm %s6017_s1, 512  ;;  %p5106_p8 = pneg %p5090_p6 }
  0x1b   : > { %p4571_p7 = scmp.ne.s32.totalorder %s6017_s1, %s4570_s13  ;;  %p4577_p11 = scmp.lt.u32.totalorder %s4570_s13, %s6017_s1 }
  0x1d   : > { %p4573_p9 = pnand %p5106_p8, %p4571_p7 }
  0x1f   : > { %p4574_p10 = pneg %p4573_p9 }
  0x21   : > { %p4579_p12 = pnand %p4577_p11, %p4574_p10 }
  0x23   : > { %4582 = shalt.err (!%p4579_p12)
}
  0x24   : > { %s4583_s28 = scalar_lea.vmem %s5079_s22, 512  ;;  %p4591_p5 = scmp.lt.s32.totalorder %s5079_s22, %s5079_s22 }
  0x25   : > { %p4584_p13 = scmp.ne.s32.totalorder %s5079_s22, %s4583_s28  ;;  %p4592_p4 = scmp.lt.s32.totalorder %s4583_s28, %s4583_s28 }
  0x27   : > { %p4586_p0 = pnand %p4584_p13, %p5106_p8  ;;  %p4593_p7 = por %p4592_p4, %p4591_p5 }
  0x29   : > { %p4587_p2 = pneg %p4586_p0 }
  0x2b   : > { %p4594_p9 = pnand %p4593_p7, %p4587_p2 }
  0x2d   : > { %4597 = shalt.err (!%p4594_p9)
}
  0x2e   : > { %s6004_s30 = smov 128   ;;  %s6008_s12 = smov 8  }
  0x2f   : > { %4373 = dma.hbm_to_vmem [thread:$0]  (!%p5090_p6), %s6017_s1, 512, %s5079_s22, [#allocation6], %s6004_s30, %s6004_s30, %s6008_s12  }
  0x30   : > { %s4598_s25 = scalar_lea.hbm %s5992_s3, 512 }
  0x31   : > { %p4599_p4 = scmp.ne.s32.totalorder %s5992_s3, %s4598_s25  ;;  %p4605_p12 = scmp.lt.u32.totalorder %s4598_s25, %s5992_s3 }
  0x33   : > { %p4601_p10 = pnand %p4599_p4, %p5106_p8 }
  0x35   : > { %p4602_p11 = pneg %p4601_p10 }
  0x37   : > { %p4607_p13 = pnand %p4605_p12, %p4602_p11 }
  0x39   : > { %4610 = shalt.err (!%p4607_p13)
}
  0x3a   : > { %s4611_s22 = scalar_lea.vmem %s5094_s26, 512  ;;  %p4619_p7 = scmp.lt.s32.totalorder %s5094_s26, %s5094_s26 }
  0x3b   : > { %p4612_p0 = scmp.ne.s32.totalorder %s5094_s26, %s4611_s22  ;;  %p4620_p9 = scmp.lt.s32.totalorder %s4611_s22, %s4611_s22 }
  0x3d   : > { %p4614_p2 = pnand %p4612_p0, %p5106_p8  ;;  %p4621_p4 = por %p4620_p9, %p4619_p7 }
  0x3f   : > { %p4615_p5 = pneg %p4614_p2 }
  0x41   : > { %p4622_p10 = pnand %p4621_p4, %p4615_p5 }
  0x43   : > { %4625 = shalt.err (!%p4622_p10)
}
  0x44   : > { %4379 = dma.hbm_to_vmem [thread:$0]  (!%p5090_p6), %s5992_s3, 512, %s5094_s26, [#allocation9], %s6004_s30, %s6004_s30, %s6008_s12  }
  0x45   : > { %s4626_s14 = scalar_lea.hbm %s5994_s5, 16 }
  0x46   : > { %p4627_p11 = scmp.ne.s32.totalorder %s5994_s5, %s4626_s14  ;;  %p4633_p0 = scmp.lt.u32.totalorder %s4626_s14, %s5994_s5 }
  0x48   : > { %p4629_p12 = pnand %p4627_p11, %p5106_p8 }
  0x4a   : > { %p4630_p13 = pneg %p4629_p12 }
  0x4c   : > { %p4635_p2 = pnand %p4633_p0, %p4630_p13 }
  0x4e   : > { %4638 = shalt.err (!%p4635_p2)
}
  0x4f   : > { %s4639_s26 = scalar_lea.vmem %s5096_s29, 16  ;;  %s4646_s22 = scalar_lea.vmem %s5096_s29, 32 }
  0x50   : > { %p4640_p5 = scmp.ne.s32.totalorder %s5096_s29, %s4639_s26  ;;  %p4647_p4 = scmp.lt.s32.totalorder %s5096_s29, %s5096_s29 }
  0x51   : > { %p4648_p10 = scmp.lt.s32.totalorder %s4646_s22, %s4639_s26 }
  0x52   : > { %p4642_p7 = pnand %p4640_p5, %p5106_p8 }
  0x53   : > { %p4649_p11 = por %p4648_p10, %p4647_p4 }
  0x54   : > { %p4643_p9 = pneg %p4642_p7 }
  0x56   : > { %p4650_p12 = pnand %p4649_p11, %p4643_p9 }
  0x58   : > { %4653 = shalt.err (!%p4650_p12)
}
  0x59   : > { %4385 = dma.hbm_to_vmem [thread:$0]  (!%p5090_p6), %s5994_s5, 16, %s5096_s29, [#allocation12]  }
  0x5a   : > { %s4973_s24 = smov [#allocation14]   ;;  %s4974_s14 = smov [#allocation17]  }
  0x5b   : > { %s381_s13 = sshll.u32 %s4973_s24, 4  ;;  %s406_s15 = sshll.u32 %s4974_s14, 4  ;;  %s382_s13 = int_to_ptr.vmem [resolvable:$true] %s381_s13  ;;  %s407_s15 = int_to_ptr.vmem [resolvable:$true] %s406_s15 }
  0x5c   : > { %s4654_s28 = scalar_lea.hbm %s5996_s7, 512 }
  0x5d   : > { %p4655_p13 = scmp.ne.s32.totalorder %s5996_s7, %s4654_s28  ;;  %p4661_p5 = scmp.lt.u32.totalorder %s4654_s28, %s5996_s7 }
  0x5f   : > { %p4657_p0 = pnand %p4655_p13, %p5106_p8 }
  0x61   : > { %p4658_p2 = pneg %p4657_p0 }
  0x63   : > { %p4663_p7 = pnand %p4661_p5, %p4658_p2 }
  0x65   : > { %4666 = shalt.err (!%p4663_p7)
}
  0x66   : > { %s4667_s29 = scalar_lea.vmem %s382_s13, 512  ;;  %p4675_p11 = scmp.lt.s32.totalorder %s382_s13, %s382_s13 }
  0x67   : > { %p4668_p9 = scmp.ne.s32.totalorder %s382_s13, %s4667_s29  ;;  %p4676_p12 = scmp.lt.s32.totalorder %s4667_s29, %s4667_s29 }
  0x69   : > { %p4670_p4 = pnand %p4668_p9, %p5106_p8  ;;  %p4677_p1 = por %p4676_p12, %p4675_p11 }
  0x6b   : > { %p4671_p10 = pneg %p4670_p4 }
  0x6d   : > { %p4678_p3 = pnand %p4677_p1, %p4671_p10 }
  0x6f   : > { %4681 = shalt.err (!%p4678_p3)
}
  0x70   : > { %s6019_s11 = smov 128   ;;  %s4682_s25 = scalar_lea.hbm %s5998_s9, 16 }
  0x71   : > { %4391 = dma.hbm_to_vmem [thread:$0]  (!%p5090_p6), %s5996_s7, 512, %s382_s13, [#allocation15], %s6019_s11, %s6019_s11, %s6008_s12  }
  0x72   : > { %p4683_p1 = scmp.ne.s32.totalorder %s5998_s9, %s4682_s25  ;;  %p4689_p0 = scmp.lt.u32.totalorder %s4682_s25, %s5998_s9 }
  0x74   : > { %p4685_p3 = pnand %p4683_p1, %p5106_p8 }
  0x76   : > { %p4686_p13 = pneg %p4685_p3 }
  0x78   : > { %p4691_p2 = pnand %p4689_p0, %p4686_p13 }
  0x7a   : > { %4694 = shalt.err (!%p4691_p2)
}
  0x7b   : > { %s4695_s29 = scalar_lea.vmem %s407_s15, 16  ;;  %s4702_s13 = scalar_lea.vmem %s407_s15, 32 }
  0x7c   : > { %p4696_p5 = scmp.ne.s32.totalorder %s407_s15, %s4695_s29  ;;  %p4703_p4 = scmp.lt.s32.totalorder %s407_s15, %s407_s15 }
  0x7d   : > { %p4704_p10 = scmp.lt.s32.totalorder %s4702_s13, %s4695_s29 }
  0x7e   : > { %p4698_p7 = pnand %p4696_p5, %p5106_p8 }
  0x7f   : > { %p4705_p11 = por %p4704_p10, %p4703_p4 }
  0x80   : > { %p4699_p9 = pneg %p4698_p7 }
  0x82   : > { %p4706_p12 = pnand %p4705_p11, %p4699_p9 }
  0x84   : > { %4709 = shalt.err (!%p4706_p12)
}
  0x85   : > { %4397 = dma.hbm_to_vmem [thread:$0]  (!%p5090_p6), %s5998_s9, 16, %s407_s15, [#allocation18]  }
  0x86   : > { %s4975_s14 = smov [#allocation7]   ;;  %s4976_s25 = smov [#allocation10]  }
  0x87   : > { %s325_s21 = sshll.u32 %s4975_s14, 4  ;;  %s349_s28 = sshll.u32 %s4976_s25, 4  ;;  %s326_s21 = int_to_ptr.vmem [resolvable:$true] %s325_s21  ;;  %s350_s28 = int_to_ptr.vmem [resolvable:$true] %s349_s28 }
  0x88   : > { %s6020_s2 = sld [smem:[#allocation31_spill]] }
  0x8e   : > { %s4710_s0 = scalar_lea.hbm %s6020_s2, 16 }
  0x8f   : > { %p4711_p1 = scmp.ne.s32.totalorder %s6020_s2, %s4710_s0  ;;  %p4717_p0 = scmp.lt.u32.totalorder %s4710_s0, %s6020_s2 }
  0x91   : > { %p4713_p3 = pnand %p4711_p1, %p5106_p8 }
  0x93   : > { %p4714_p13 = pneg %p4713_p3 }
  0x95   : > { %p4719_p2 = pnand %p4717_p0, %p4714_p13 }
  0x97   : > { %4722 = shalt.err (!%p4719_p2)
}
  0x98   : > { %s4723_s15 = scalar_lea.vmem %s326_s21, 16  ;;  %s4730_s24 = scalar_lea.vmem %s326_s21, 32 }
  0x99   : > { %p4724_p5 = scmp.ne.s32.totalorder %s326_s21, %s4723_s15  ;;  %p4731_p4 = scmp.lt.s32.totalorder %s326_s21, %s326_s21 }
  0x9a   : > { %p4732_p10 = scmp.lt.s32.totalorder %s4730_s24, %s4723_s15 }
  0x9b   : > { %p4726_p7 = pnand %p4724_p5, %p5106_p8 }
  0x9c   : > { %p4733_p11 = por %p4732_p10, %p4731_p4 }
  0x9d   : > { %p4727_p9 = pneg %p4726_p7 }
  0x9f   : > { %p4734_p12 = pnand %p4733_p11, %p4727_p9 }
  0xa1   : > { %4737 = shalt.err (!%p4734_p12)
}
  0xa2   : > { %4376 = dma.hbm_to_vmem [thread:$0]  (!%p5090_p6), %s6020_s2, 16, %s326_s21, [#allocation6]  }
  0xa3   : > { %s4738_s22 = scalar_lea.hbm %s5993_s4, 16 }
  0xa4   : > { %p4739_p1 = scmp.ne.s32.totalorder %s5993_s4, %s4738_s22  ;;  %p4745_p0 = scmp.lt.u32.totalorder %s4738_s22, %s5993_s4 }
  0xa6   : > { %p4741_p3 = pnand %p4739_p1, %p5106_p8 }
  0xa8   : > { %p4742_p13 = pneg %p4741_p3 }
  0xaa   : > { %p4747_p2 = pnand %p4745_p0, %p4742_p13 }
  0xac   : > { %4750 = shalt.err (!%p4747_p2)
}
  0xad   : > { %s4751_s15 = scalar_lea.vmem %s350_s28, 16  ;;  %s4758_s21 = scalar_lea.vmem %s350_s28, 32 }
  0xae   : > { %p4752_p5 = scmp.ne.s32.totalorder %s350_s28, %s4751_s15  ;;  %p4759_p4 = scmp.lt.s32.totalorder %s350_s28, %s350_s28 }
  0xaf   : > { %p4760_p10 = scmp.lt.s32.totalorder %s4758_s21, %s4751_s15 }
  0xb0   : > { %p4754_p7 = pnand %p4752_p5, %p5106_p8 }
  0xb1   : > { %p4761_p11 = por %p4760_p10, %p4759_p4 }
  0xb2   : > { %p4755_p9 = pneg %p4754_p7 }
  0xb4   : > { %p4762_p12 = pnand %p4761_p11, %p4755_p9 }
  0xb6   : > { %4765 = shalt.err (!%p4762_p12)
}
  0xb7   : > { %4382 = dma.hbm_to_vmem [thread:$0]  (!%p5090_p6), %s5993_s4, 16, %s350_s28, [#allocation9]  }
  0xb8   : > { %s4977_s25 = smov [#allocation13]   ;;  %s4978_s26 = smov [#allocation16]  }
  0xb9   : > { %s371_s12 = sshll.u32 %s4977_s25, 4  ;;  %s395_s22 = sshll.u32 %s4978_s26, 4  ;;  %s372_s12 = int_to_ptr.vmem [resolvable:$true] %s371_s12  ;;  %s396_s22 = int_to_ptr.vmem [resolvable:$true] %s395_s22 }
  0xba   : > { %s4766_s13 = scalar_lea.hbm %s5995_s6, 16 }
  0xbb   : > { %p4767_p1 = scmp.ne.s32.totalorder %s5995_s6, %s4766_s13  ;;  %p4773_p0 = scmp.lt.u32.totalorder %s4766_s13, %s5995_s6 }
  0xbd   : > { %p4769_p3 = pnand %p4767_p1, %p5106_p8 }
  0xbf   : > { %p4770_p13 = pneg %p4769_p3 }
  0xc1   : > { %p4775_p2 = pnand %p4773_p0, %p4770_p13 }
  0xc3   : > { %4778 = shalt.err (!%p4775_p2)
}
  0xc4   : > { %s4779_s28 = scalar_lea.vmem %s372_s12, 16  ;;  %s4786_s14 = scalar_lea.vmem %s372_s12, 32 }
  0xc5   : > { %p4780_p5 = scmp.ne.s32.totalorder %s372_s12, %s4779_s28  ;;  %p4787_p4 = scmp.lt.s32.totalorder %s372_s12, %s372_s12 }
  0xc6   : > { %p4788_p10 = scmp.lt.s32.totalorder %s4786_s14, %s4779_s28 }
  0xc7   : > { %p4782_p7 = pnand %p4780_p5, %p5106_p8 }
  0xc8   : > { %p4789_p11 = por %p4788_p10, %p4787_p4 }
  0xc9   : > { %p4783_p9 = pneg %p4782_p7 }
  0xcb   : > { %p4790_p12 = pnand %p4789_p11, %p4783_p9 }
  0xcd   : > { %4793 = shalt.err (!%p4790_p12)
}
  0xce   : > { %4388 = dma.hbm_to_vmem [thread:$0]  (!%p5090_p6), %s5995_s6, 16, %s372_s12, [#allocation12]  }
  0xcf   : > { %s4794_s13 = scalar_lea.hbm %s5997_s8, 16 }
  0xd0   : > { %p4795_p1 = scmp.ne.s32.totalorder %s5997_s8, %s4794_s13  ;;  %p4801_p0 = scmp.lt.u32.totalorder %s4794_s13, %s5997_s8 }
  0xd2   : > { %p4797_p3 = pnand %p4795_p1, %p5106_p8 }
  0xd4   : > { %p4798_p13 = pneg %p4797_p3 }
  0xd6   : > { %p4803_p2 = pnand %p4801_p0, %p4798_p13 }
  0xd8   : > { %4806 = shalt.err (!%p4803_p2)
}
  0xd9   : > { %s4807_s28 = scalar_lea.vmem %s396_s22, 16  ;;  %s4814_s12 = scalar_lea.vmem %s396_s22, 32 }
  0xda   : > { %p4808_p5 = scmp.ne.s32.totalorder %s396_s22, %s4807_s28  ;;  %p4815_p4 = scmp.lt.s32.totalorder %s396_s22, %s396_s22 }
  0xdb   : > { %p4816_p10 = scmp.lt.s32.totalorder %s4814_s12, %s4807_s28 }
  0xdc   : > { %p4810_p7 = pnand %p4808_p5, %p5106_p8 }
  0xdd   : > { %p4817_p11 = por %p4816_p10, %p4815_p4 }
  0xde   : > { %p4811_p9 = pneg %p4810_p7 }
  0xe0   : > { %p4818_p12 = pnand %p4817_p11, %p4811_p9 }
  0xe2   : > { %4821 = shalt.err (!%p4818_p12)
}
  0xe3   : > { %4394 = dma.hbm_to_vmem [thread:$0]  (!%p5090_p6), %s5997_s8, 16, %s396_s22, [#allocation15]  }
  0xe4   : > { %s4979_s26 = smov [#allocation19]   ;;  %s4822_s30 = scalar_lea.hbm %s5999_s10, 16 }
  0xe5   : > { %s417_s0 = sshll.u32 %s4979_s26, 4  ;;  %p4823_p1 = scmp.ne.s32.totalorder %s5999_s10, %s4822_s30  ;;  %s418_s0 = int_to_ptr.vmem [resolvable:$true] %s417_s0 }
  0xe6   : > { %p4829_p0 = scmp.lt.u32.totalorder %s4822_s30, %s5999_s10 }
  0xe7   : > { %p4825_p3 = pnand %p4823_p1, %p5106_p8 }
  0xe9   : > { %p4826_p13 = pneg %p4825_p3 }
  0xeb   : > { %p4831_p2 = pnand %p4829_p0, %p4826_p13 }
  0xed   : > { %4834 = shalt.err (!%p4831_p2)
}
  0xee   : > { %s4835_s22 = scalar_lea.vmem %s418_s0, 16  ;;  %s4842_s12 = scalar_lea.vmem %s418_s0, 32 }
  0xef   : > { %p4836_p5 = scmp.ne.s32.totalorder %s418_s0, %s4835_s22  ;;  %p4843_p4 = scmp.lt.s32.totalorder %s418_s0, %s418_s0 }
  0xf0   : > { %p4844_p10 = scmp.lt.s32.totalorder %s4842_s12, %s4835_s22 }
  0xf1   : > { %p4838_p7 = pnand %p4836_p5, %p5106_p8 }
  0xf2   : > { %p4845_p11 = por %p4844_p10, %p4843_p4 }
  0xf3   : > { %p4839_p9 = pneg %p4838_p7 }
  0xf5   : > { %p4846_p12 = pnand %p4845_p11, %p4839_p9 }
  0xf7   : > { %4849 = shalt.err (!%p4846_p12)
}
  0xf8   : > { %4400 = dma.hbm_to_vmem [thread:$0]  (!%p5090_p6), %s5999_s10, 16, %s418_s0, [#allocation18]  }
  0xf9   : > { %s3909_s16 = sadd.s32 4294967294, %s4966_s20   ;;  %s5311_s27 = sadd.s32 1, %s4966_s20  }
  0xfa   : > { %s36_s26 = ssub.s32 %s4966_s20, %s5311_s27  ;;  %s39_s29 = sadd.s32 1, %s4962_s19 }
  0xfb   : > { %p37_p8 = scmp.eq.s32.totalorder %s36_s26, 0  ;;  %p46_p1 = scmp.ne.s32.totalorder %s4962_s19, %s4958_s18 }
  0xfc   : > { %p47_p3 = scmp.eq.s32.totalorder %s4966_s20, 0  ;;  %p52_p13 = scmp.ne.s32.totalorder %s4958_s18, %s4954_s17 }
  0xfd   : > { %s5322_s13 = scalar_select %p37_p8, %s4962_s19, %s39_s29  }
  0xfe   : > { %p5324_p0 = por %p47_p3, %p46_p1  ;;  %p6022_p2 = scmp.eq.s32.totalorder %s5074_s23, 0 }
  0xff   : > { %p286_p5 = scmp.eq.s32.totalorder %s5074_s23, 1  ;;  %p292_p7 = scmp.eq.s32.totalorder %s3909_s16, 1 }
 0x100   : > { %p5330_p6 = por %p6022_p2, %p52_p13  ;;  %p4419_p9 = scmp.lt.s32.totalorder %s4966_s20, 2 }
 0x101   : > { %s428_s15 = sand.u32 1, %s4962_s19   ;;  %p5337_p4 = por %p286_p5, %p46_p1 }
 0x102   : > { %p5341_p10 = por %p292_p7, %p52_p13  ;;  %s3922_s28 = sshll.u32 %s428_s15, 5 }
 0x103   : > { %s6024_s21 = scalar_select %p5337_p4, 1, 0 }
 0x104   : > { %s6025_s24 = scalar_select %p5341_p10, 1, 0 }
 0x105   : > { %s4010_s22 = sshll.u32 %s4966_s20, 9  ;;  %s6026_s25 = sld [smem:[#allocation29_spill]] }
 0x106   : > { %s432_s16 = scalar_lea.vmem [#allocation2], %s3922_s28  ;;  %p5355_p11 = pnand %p4419_p9, %p5324_p0 }
 0x107   : > { %s439_s29 = sshll.u32 %s432_s16, 4  ;;  %s5359_s2 = scalar_lea.sflag [#allocation3], %s428_s15  ;;  %s5351_s29 = int_to_ptr.vmem [resolvable:$true] %s439_s29 }
 0x108   : > { %p4852_p8 = pneg %p5355_p11 }
 0x10b   : > { %s5349_s26 = scalar_lea.hbm %s6026_s25, %s4010_s22  ;;  %s4855_s30 = scalar_lea.hbm %s6026_s25, 1024 }
 0x10c   : > { %s4850_s12 = scalar_lea.hbm %s5349_s26, 512  ;;  %p4856_p13 = scmp.lt.u32.totalorder %s5349_s26, %s6026_s25 }
 0x10d   : > { %p4851_p12 = scmp.ne.s32.totalorder %s5349_s26, %s4850_s12  ;;  %p4857_p0 = scmp.lt.u32.totalorder %s4855_s30, %s4850_s12 }
 0x10e   : > { %p4859_p5 = scmp.lt.u32.totalorder %s4850_s12, %s5349_s26 }
 0x10f   : > { %p4853_p1 = pnand %p4852_p8, %p4851_p12  ;;  %p4858_p2 = por %p4857_p0, %p4856_p13 }
 0x111   : > { %p4854_p3 = pneg %p4853_p1  ;;  %p4860_p7 = por %p4859_p5, %p4858_p2 }
 0x113   : > { %p4861_p9 = pnand %p4860_p7, %p4854_p3 }
 0x115   : > { %4864 = shalt.err (!%p4861_p9)
}
 0x116   : > { %s4865_s15 = scalar_lea.vmem %s5351_s29, 512  ;;  %s4980_s28 = smov [#allocation2]  }
 0x117   : > { %p4866_p12 = scmp.ne.s32.totalorder %s5351_s29, %s4865_s15  ;;  %s4870_s22 = sshll.u32 %s4980_s28, 4  ;;  %s4871_s22 = int_to_ptr.vmem [resolvable:$false] %s4870_s22 }
 0x118   : > { %s4872_s14 = scalar_lea.vmem %s4871_s22, 1024  ;;  %p4873_p4 = scmp.lt.s32.totalorder %s5351_s29, %s4871_s22 }
 0x119   : > { %p4868_p1 = pnand %p4866_p12, %p4852_p8  ;;  %p4874_p13 = scmp.lt.s32.totalorder %s4872_s14, %s4865_s15 }
 0x11b   : > { %p4869_p10 = pneg %p4868_p1  ;;  %p4875_p0 = por %p4874_p13, %p4873_p4 }
 0x11d   : > { %p4876_p2 = pnand %p4875_p0, %p4869_p10 }
 0x11f   : > { %4879 = shalt.err (!%p4876_p2)
}
 0x120   : > { %s6028_s12 = smov 8   ;;  %s6029_s30 = sld [smem:[#allocation28_spill]] }
 0x121   : > { %4404 = dma.hbm_to_vmem [thread:$0]  (!%p5355_p11), %s5349_s26, 512, %s5351_s29, %s5359_s2, %s6019_s11, %s6019_s11, %s6028_s12  }
 0x126   : > { %p6030_p8 = scmp.ne.s32.totalorder %s6029_s30, 0 }
 0x127   : > { %s5393_s16 = sand.u32 (!%p6030_p8), 1, %s4958_s18  }
 0x128   : > { %451 = sbr.rel (%p6030_p8) target bundleno = 2782 (0xade), region = 64  ;;  %s3926_s15 = sshll.u32 (!%p6030_p8), %s5393_s16, 5 }
 0x129   : > { %s454_s28 = scalar_lea.sflag (!%p6030_p8), [#allocation3], %s5393_s16  ;;  %s5399_s1 = scalar_lea.vmem (!%p6030_p8), [#allocation2], %s3926_s15 }
 0x12f   : > { %4925 = dma.done.wait (%p5330_p6), %s454_s28, 512  }
 0x130   : > { %4927 = vsyncadd (%p5330_p6), %s454_s28, 4294966784  ;;  %p6031_p4 = scmp.eq.s32.totalorder %s5074_s23, 0 }
 0x132   : > { %4929 = dma.done.wait (%p6031_p4), [#allocation6], 528   ;;  %p6032_p10 = pmov %p6031_p4 }
 0x133   : > { %p6033_p11 = pmov %p6031_p4 }
 0x134   : > { %4931 = vsyncadd (%p6032_p10), [#allocation6], 4294966768 }
 0x135   : > { %4933 = dma.done.wait (%p6033_p11), [#allocation9], 528   ;;  %p6034_p3 = pmov %p6031_p4 }
 0x137   : > { %4935 = vsyncadd (%p6034_p3), [#allocation9], 4294966768  ;;  %p6035_p5 = pmov %p6034_p3 }
 0x138   : > { %p6036_p7 = pmov %p6034_p3 }
 0x139   : > { %4937 = dma.done.wait (%p6035_p5), [#allocation12], 32  }
 0x13a   : > { %4939 = vsyncadd (%p6036_p7), [#allocation12], 4294967264  ;;  %p6037_p6 = pmov %p6034_p3 }
 0x13b   : > { %p6038_p9 = pmov %p6034_p3 }
 0x13c   : > { %4941 = dma.done.wait (%p6037_p6), [#allocation15], 528  }
 0x13d   : > { %4943 = vsyncadd (%p6038_p9), [#allocation15], 4294966768  ;;  %p6039_p12 = pmov %p6034_p3 }
 0x13e   : > { %p6040_p1 = pmov %p6034_p3 }
 0x13f   : > { %4945 = dma.done.wait (%p6039_p12), [#allocation18], 32  }
 0x140   : > { %4947 = vsyncadd (%p6040_p1), [#allocation18], 4294967264  ;;  %vm553_vm0 = vcmask 261120   ;;  %v542_v0 = vld [vmem:[#allocation5] sm:$0xff]  ;;  %v543_v1 = vld [vmem:[#allocation5 + $0x8] sm:$0xff]  ;;  %s4981_s2 = smov 120  }
 0x141   : > { %v544_v2 = vld [vmem:[#allocation5 + $0x10] sm:$0xff]  ;;  %v4302_v3 = vpack.c.bf16 %v543_v1, %v542_v0  ;;  %v545_v4 = vld [vmem:[#allocation5 + $0x18] sm:$0xff]  ;;  %v538_v5 = vld [vmem:[%s5399_s1] sm:$0xff]  ;;  %s4982_s11 = smov 112   ;;  %v4983_v19 = vmov 0.0   ;;  %vm4984_vm1 = vmmov 0  }
 0x142   : > { %v4306_v6 = vpack.c.bf16 %v545_v4, %v544_v2  ;;  %4108 = vmatprep.mubr.msk.f32.mxu0 %vm553_vm0, %v538_v5  ;;  %v539_v7 = vld [vmem:[%s5399_s1 + $0x8] sm:$0xff]  ;;  %v540_v8 = vld [vmem:[%s5399_s1 + $0x10] sm:$0xff]  ;;  %v541_v9 = vld [vmem:[%s5399_s1 + $0x18] sm:$0xff]  ;;  %4114 = vmatprep.subr.mxu1 %v4983_v19  ;;  %s4985_s0 = smov 104   ;;  %s4986_s26 = smov 96   ;;  %vm681_vm2 = vcmask 64512  }
 0x143   : > { %4303 = vmatprep.subr.bf16.mxu0 %v4302_v3  ;;  %v3938_v10 = vld [vmem:[#allocation7] ss:$0 sm:$0xff]  ;;  %4116 = vmatprep.mubr.msk.f32.mxu1 %vm4984_vm1, %v4983_v19  ;;  %s4987_s29 = smov 64   ;;  %s4988_s22 = smov 8   ;;  %vm3340_vm3 = vcmask 130048   ;;  %vm3345_vm4 = vcmask 195584  }
 0x144   : > { %4305 = vmatpush3.bf16.msra.mxu0 %v4302_v3  ;;  %s4989_s14 = smov 16   ;;  %s4990_s12 = smov 24  }
 0x145   : > { %4307 = vmatprep.subr.bf16.mxu0 %v4306_v6  ;;  %s535_s30 = scalar_lea.vmem [#allocation20], %s3926_s15  ;;  %s4011_s28 = sshll.u32 %s5074_s23, 9 }
 0x146   : > { %s3741_s15 = sshll.u32 %s535_s30, 4  ;;  %s3728_s23 = scalar_lea.sflag [#allocation4], %s5393_s16  ;;  %s5942_s15 = int_to_ptr.vmem [resolvable:$true] %s3741_s15 }
 0x147   : > { %p6042_p0 = scmp.ne.s32.totalorder %s6024_s21, 0 }
 0x148   : > { %4309 = vmatpush3.bf16.msra.mxu0 %v4306_v6 }
 0x149   : > { %4129 = vmatprep.subr.mxu0 %v4983_v19 }
 0x14b   : > { %4109 = vmatmul.mubr.msk.f32.vlgmr.msra.gmra.mrb[0].mxu0 %vm553_vm0, %v539_v7 }
 0x14c   : > { %4111 = vmatprep.mubr.msk.f32.mxu0 %vm553_vm0, %v540_v8 }
 0x14f   : > { %4112 = vmatmul.mubr.msk.f32.gmra.mrb[2].mxu0 %vm553_vm0, %v541_v9 }
 0x150   : > { %4131 = vmatprep.mubr.msk.f32.mxu0 %vm4984_vm1, %v4983_v19 }
 0x21e   : > { %v4110_v11 = vpop.f32.mrb[0].mxu0 }
 0x21f   : > { %v632_v12 = vpop.f32.mrb[1].mxu0  ;;  %v5436_v16 = vadd.f32 %v4110_v11, %v3938_v10 }
 0x220   : > { %v5433_v13 = vadd.f32 %v3938_v10, %v632_v12 }
 0x222   : > { %v4113_v14 = vpop.f32.mrb[2].mxu0  ;;  %655 = vrot.lane.b32.xlu0 %v5433_v13, %s4981_s2 }
 0x223   : > { %v642_v15 = vpop.f32.mrb[3].mxu0  ;;  %v5442_v18 = vadd.f32 %v4113_v14, %v3938_v10 }
 0x224   : > { %v5438_v17 = vadd.f32 %v3938_v10, %v642_v15 }
 0x226   : > { %659 = vrot.lane.b32.xlu1 %v5438_v17, %s4981_s2  ;;  %657 = vrot.lane.b32.xlu0 %v5436_v16, %s4981_s2 }
 0x22a   : > { %661 = vrot.lane.b32.xlu1 %v5442_v18, %s4981_s2  ;;  %663 = vrot.lane.b32.xlu0 %v5433_v13, %s4982_s11 }
 0x22e   : > { %665 = vrot.lane.b32.xlu1 %v5436_v16, %s4982_s11  ;;  %667 = vrot.lane.b32.xlu0 %v5438_v17, %s4982_s11 }
 0x232   : > { %669 = vrot.lane.b32.xlu1 %v5442_v18, %s4982_s11  ;;  %671 = vrot.lane.b32.xlu0 %v5433_v13, %s4985_s0  ;;  %s6041_s11 = sld [smem:[#allocation32_spill]] }
 0x236   : > { %673 = vrot.lane.b32.xlu1 %v5436_v16, %s4985_s0  ;;  %675 = vrot.lane.b32.xlu0 %v5438_v17, %s4985_s0 }
 0x23a   : > { %677 = vrot.lane.b32.xlu1 %v5442_v18, %s4985_s0  ;;  %679 = vrot.lane.b32.xlu0 %v5433_v13, %s4986_s26  ;;  %s5940_s0 = scalar_lea.hbm %s6041_s11, %s4011_s28 }
 0x23e   : > { %756 = vrot.lane.b32.xlu1 %v5436_v16, %s4986_s26  ;;  %832 = vrot.lane.b32.xlu0 %v5438_v17, %s4986_s26 }
 0x242   : > { %908 = vrot.lane.b32.xlu1 %v5442_v18, %s4986_s26 }
 0x294   : > { %v656_v20 = vpop.permute.xlu0 %655 }
 0x295   : > { %984 = vrot.lane.b32.xlu0 %v656_v20, %s4986_s26 }
 0x298   : > { %v5463_v21 = vpop.permute.xlu1 %659  ;;  %v5465_v22 = vpop.permute.xlu0 %657 }
 0x299   : > { %1136 = vrot.lane.b32.xlu0 %v5463_v21, %s4986_s26  ;;  %1060 = vrot.lane.b32.xlu1 %v5465_v22, %s4986_s26 }
 0x29c   : > { %v5469_v23 = vpop.permute.xlu1 %661  ;;  %v5471_v24 = vpop.permute.xlu0 %663 }
 0x29d   : > { %1212 = vrot.lane.b32.xlu1 %v5469_v23, %s4986_s26  ;;  %1288 = vrot.lane.b32.xlu0 %v5471_v24, %s4986_s26 }
 0x2a0   : > { %v5475_v25 = vpop.permute.xlu1 %665  ;;  %v5477_v26 = vpop.permute.xlu0 %667 }
 0x2a1   : > { %1364 = vrot.lane.b32.xlu1 %v5475_v25, %s4986_s26  ;;  %1440 = vrot.lane.b32.xlu0 %v5477_v26, %s4986_s26 }
 0x2a4   : > { %v5481_v27 = vpop.permute.xlu1 %669  ;;  %v5483_v28 = vpop.permute.xlu0 %671 }
 0x2a5   : > { %1516 = vrot.lane.b32.xlu1 %v5481_v27, %s4986_s26  ;;  %1592 = vrot.lane.b32.xlu0 %v5483_v28, %s4986_s26 }
 0x2a8   : > { %v5487_v29 = vpop.permute.xlu1 %673  ;;  %v5489_v30 = vpop.permute.xlu0 %675 }
 0x2a9   : > { %1668 = vrot.lane.b32.xlu1 %v5487_v29, %s4986_s26  ;;  %1744 = vrot.lane.b32.xlu0 %v5489_v30, %s4986_s26 }
 0x2ac   : > { %v5493_v31 = vpop.permute.xlu1 %677  ;;  %v680_v32 = vpop.permute.xlu0 %679 }
 0x2ad   : > { %1820 = vrot.lane.b32.xlu1 %v5493_v31, %s4986_s26  ;;  %2148 = vrot.lane.b32.xlu0 %v5436_v16, %s4987_s29  ;;  %s4880_s26 = scalar_lea.vmem %s5942_s15, 512 }
 0x2ae   : > { %4115 = vmatpush3.xpose.msk.msra.mxu1 %vm681_vm2, %v680_v32  ;;  %p4881_p13 = scmp.ne.s32.totalorder %s5942_s15, %s4880_s26 }
 0x2af   : > { %4119 = vmatprep.subr.mxu1 %v4983_v19 }
 0x2b0   : > { %v757_v33 = vpop.permute.xlu1 %756  ;;  %v833_v35 = vpop.permute.xlu0 %832  ;;  %p4882_p2 = pnand %p4881_p13, %p6042_p0 }
 0x2b1   : > { %4117 = vmatmul.mubr.msk.f32.vlgmr.msra.gmra.mrb[0].mxu1 %vm681_vm2, %v5433_v13  ;;  %2072 = vrot.lane.b32.xlu1 %v5433_v13, %s4987_s29 }
 0x2b2   : > { %2300 = vrot.lane.b32.xlu0 %v5442_v18, %s4987_s29  ;;  %4120 = vmatpush3.xpose.msk.msra.mxu1 %vm681_vm2, %v757_v33  ;;  %p4883_p8 = pneg %p4882_p2 }
 0x2b3   : > { %4121 = vmatprep.mubr.msk.f32.mxu1 %vm4984_vm1, %v4983_v19  ;;  %4124 = vmatprep.subr.mxu1 %v4983_v19 }
 0x2b4   : > { %v909_v34 = vpop.permute.xlu1 %908 }
 0x2b5   : > { %4122 = vmatmul.mubr.msk.f32.vlgmr.msra.gmra.mrb[2].mxu1 %vm681_vm2, %v5436_v16  ;;  %4130 = vmatpush3.xpose.msk.msra.mxu0 %vm681_vm2, %v909_v34 }
 0x2b6   : > { %2224 = vrot.lane.b32.xlu1 %v5438_v17, %s4987_s29  ;;  %2680 = vrot.lane.b32.xlu0 %v5471_v24, %s4987_s29 }
 0x2b7   : > { %4125 = vmatpush3.xpose.msk.msra.mxu1 %vm681_vm2, %v833_v35  ;;  %4126 = vmatprep.mubr.msk.f32.mxu1 %vm4984_vm1, %v4983_v19 }
 0x2b8   : > { %4132 = vmatmul.mubr.msk.f32.vlgmr.msra.gmra.mrb[4].mxu0 %vm681_vm2, %v5442_v18  ;;  %4134 = vmatprep.subr.mxu1 %v4983_v19 }
 0x2b9   : > { %4139 = vmatprep.subr.mxu0 %v4983_v19  ;;  %4141 = vmatprep.mubr.msk.f32.mxu0 %vm4984_vm1, %v4983_v19 }
 0x2ba   : > { %4127 = vmatmul.mubr.msk.f32.vlgmr.msra.gmra.mrb[4].mxu1 %vm681_vm2, %v5438_v17  ;;  %2376 = vrot.lane.b32.xlu1 %v656_v20, %s4987_s29 }
 0x2bb   : > { %2528 = vrot.lane.b32.xlu0 %v5463_v21, %s4987_s29  ;;  %4136 = vmatprep.mubr.msk.f32.mxu1 %vm4984_vm1, %v4983_v19 }
 0x2be   : > { %2452 = vrot.lane.b32.xlu1 %v5465_v22, %s4987_s29 }
 0x2c2   : > { %2604 = vrot.lane.b32.xlu1 %v5469_v23, %s4987_s29 }
 0x2c6   : > { %2756 = vrot.lane.b32.xlu1 %v5475_v25, %s4987_s29 }
 0x307   : > { %v985_v36 = vpop.permute.xlu0 %984 }
 0x308   : > { %4135 = vmatpush3.xpose.msk.msra.mxu1 %vm681_vm2, %v985_v36 }
 0x309   : > { %4144 = vmatprep.subr.mxu1 %v4983_v19 }
 0x30b   : > { %v1061_v37 = vpop.permute.xlu1 %1060  ;;  %4137 = vmatmul.mubr.msk.f32.vlgmr.msra.gmra.mrb[6].mxu1 %vm681_vm2, %v656_v20  ;;  %v1137_v38 = vpop.permute.xlu0 %1136 }
 0x30c   : > { %4140 = vmatpush3.xpose.msk.msra.mxu0 %vm681_vm2, %v1061_v37  ;;  %4145 = vmatpush3.xpose.msk.msra.mxu1 %vm681_vm2, %v1137_v38 }
 0x30d   : > { %4146 = vmatprep.mubr.msk.f32.mxu1 %vm4984_vm1, %v4983_v19  ;;  %4149 = vmatprep.subr.mxu0 %v4983_v19 }
 0x30e   : > { %4154 = vmatprep.subr.mxu1 %v4983_v19 }
 0x30f   : > { %4142 = vmatmul.mubr.msk.f32.vlgmr.msra.gmra.mrb[6].mxu0 %vm681_vm2, %v5465_v22  ;;  %v1213_v39 = vpop.permute.xlu1 %1212  ;;  %4147 = vmatmul.mubr.msk.f32.vlgmr.msra.gmra.mrb[8].mxu1 %vm681_vm2, %v5463_v21  ;;  %v1289_v40 = vpop.permute.xlu0 %1288 }
 0x310   : > { %4150 = vmatpush3.xpose.msk.msra.mxu0 %vm681_vm2, %v1213_v39  ;;  %4155 = vmatpush3.xpose.msk.msra.mxu1 %vm681_vm2, %v1289_v40 }
 0x311   : > { %4151 = vmatprep.mubr.msk.f32.mxu0 %vm4984_vm1, %v4983_v19  ;;  %4156 = vmatprep.mubr.msk.f32.mxu1 %vm4984_vm1, %v4983_v19 }
 0x312   : > { %4159 = vmatprep.subr.mxu0 %v4983_v19  ;;  %4164 = vmatprep.subr.mxu1 %v4983_v19 }
 0x313   : > { %4152 = vmatmul.mubr.msk.f32.vlgmr.msra.gmra.mrb[8].mxu0 %vm681_vm2, %v5469_v23  ;;  %v1365_v41 = vpop.permute.xlu1 %1364  ;;  %4157 = vmatmul.mubr.msk.f32.vlgmr.msra.gmra.mrb[10].mxu1 %vm681_vm2, %v5471_v24  ;;  %v1441_v42 = vpop.permute.xlu0 %1440 }
 0x314   : > { %4160 = vmatpush3.xpose.msk.msra.mxu0 %vm681_vm2, %v1365_v41  ;;  %4165 = vmatpush3.xpose.msk.msra.mxu1 %vm681_vm2, %v1441_v42 }
 0x315   : > { %4161 = vmatprep.mubr.msk.f32.mxu0 %vm4984_vm1, %v4983_v19  ;;  %4166 = vmatprep.mubr.msk.f32.mxu1 %vm4984_vm1, %v4983_v19 }
 0x316   : > { %4169 = vmatprep.subr.mxu0 %v4983_v19  ;;  %4174 = vmatprep.subr.mxu1 %v4983_v19 }
 0x317   : > { %4162 = vmatmul.mubr.msk.f32.vlgmr.msra.gmra.mrb[10].mxu0 %vm681_vm2, %v5475_v25  ;;  %v1517_v43 = vpop.permute.xlu1 %1516  ;;  %4167 = vmatmul.mubr.msk.f32.vlgmr.msra.gmra.mrb[12].mxu1 %vm681_vm2, %v5477_v26  ;;  %v1593_v44 = vpop.permute.xlu0 %1592 }
 0x318   : > { %4170 = vmatpush3.xpose.msk.msra.mxu0 %vm681_vm2, %v1517_v43  ;;  %4175 = vmatpush3.xpose.msk.msra.mxu1 %vm681_vm2, %v1593_v44 }
 0x319   : > { %4171 = vmatprep.mubr.msk.f32.mxu0 %vm4984_vm1, %v4983_v19  ;;  %4176 = vmatprep.mubr.msk.f32.mxu1 %vm4984_vm1, %v4983_v19 }
 0x31a   : > { %4179 = vmatprep.subr.mxu0 %v4983_v19  ;;  %4184 = vmatprep.subr.mxu1 %v4983_v19 }
 0x31b   : > { %4172 = vmatmul.mubr.msk.f32.vlgmr.msra.gmra.mrb[12].mxu0 %vm681_vm2, %v5481_v27  ;;  %v1669_v45 = vpop.permute.xlu1 %1668  ;;  %4177 = vmatmul.mubr.msk.f32.vlgmr.msra.gmra.mrb[14].mxu1 %vm681_vm2, %v5483_v28  ;;  %v1745_v46 = vpop.permute.xlu0 %1744 }
 0x31c   : > { %4180 = vmatpush3.xpose.msk.msra.mxu0 %vm681_vm2, %v1669_v45  ;;  %4185 = vmatpush3.xpose.msk.msra.mxu1 %vm681_vm2, %v1745_v46 }
 0x31d   : > { %4181 = vmatprep.mubr.msk.f32.mxu0 %vm4984_vm1, %v4983_v19  ;;  %4186 = vmatprep.mubr.msk.f32.mxu1 %vm4984_vm1, %v4983_v19 }
 0x31e   : > { %4189 = vmatprep.subr.mxu0 %v4983_v19  ;;  %4194 = vmatprep.subr.mxu1 %v4983_v19 }
 0x31f   : > { %4182 = vmatmul.mubr.msk.f32.vlgmr.msra.gmra.mrb[14].mxu0 %vm681_vm2, %v5487_v29  ;;  %v1821_v47 = vpop.permute.xlu1 %1820  ;;  %4187 = vmatmul.mubr.msk.f32.vlgmr.msra.gmra.mrb[16].mxu1 %vm681_vm2, %v5489_v30  ;;  %v2149_v48 = vpop.permute.xlu0 %2148 }
 0x320   : > { %4190 = vmatpush3.xpose.msk.msra.mxu0 %vm681_vm2, %v1821_v47  ;;  %4191 = vmatprep.mubr.msk.f32.mxu0 %vm4984_vm1, %v4983_v19 }
 0x321   : > { %4199 = vmatprep.subr.mxu0 %v4983_v19  ;;  %4196 = vmatprep.mubr.msk.f32.mxu1 %vm4984_vm1, %v4983_v19 }
 0x323   : > { %4192 = vmatmul.mubr.msk.f32.vlgmr.msra.gmra.mrb[16].mxu0 %vm681_vm2, %v5493_v31  ;;  %v2073_v49 = vpop.permute.xlu1 %2072 }
 0x324   : > { %4195 = vmatpush3.msra.mxu1 %v2073_v49  ;;  %4200 = vmatpush3.msra.mxu0 %v2149_v48  ;;  %v5678_v41 = vpop.permute.xlu0 %2300 }
 0x325   : > { %4201 = vmatprep.mubr.msk.f32.mxu0 %vm4984_vm1, %v4983_v19  ;;  %4209 = vmatprep.subr.mxu0 %v4983_v19 }
 0x326   : > { %4204 = vmatprep.subr.mxu1 %v4983_v19 }
 0x328   : > { %v5674_v40 = vpop.permute.xlu1 %2224  ;;  %v5682_v43 = vpop.permute.xlu0 %2680 }
 0x32c   : > { %v5680_v42 = vpop.permute.xlu1 %2376 }
 0x32d   : > { %v5688_v45 = vpop.permute.xlu0 %2528 }
 0x330   : > { %v5684_v44 = vpop.permute.xlu1 %2452 }
 0x334   : > { %v5690_v46 = vpop.permute.xlu1 %2604 }
 0x384   : > { %v5612_v50 = vpop.f32.mrb[0].mxu1 }
 0x385   : > { %v4118_v51 = vpop.f32.mrb[1].mxu1  ;;  %v1896_v52 = vsel %vm681_vm2, %v5612_v50, -inf }
 0x386   : > { %1897 = vmax.xlane.f32.xlu0 %v1896_v52 }
 0x388   : > { %v5616_v53 = vpop.f32.mrb[2].mxu1 }
 0x389   : > { %v4123_v54 = vpop.f32.mrb[3].mxu1  ;;  %v1899_v55 = vsel %vm681_vm2, %v5616_v53, -inf }
 0x38a   : > { %1900 = vmax.xlane.f32.xlu1 %v1899_v55 }
 0x38b   : > { %v5620_v56 = vpop.f32.mrb[4].mxu0 }
 0x38c   : > { %v4133_v57 = vpop.f32.mrb[5].mxu0  ;;  %v1905_v58 = vsel %vm681_vm2, %v5620_v56, -inf }
 0x38d   : > { %v5624_v59 = vpop.f32.mrb[4].mxu1  ;;  %1906 = vmax.xlane.f32.xlu0 %v1905_v58 }
 0x38e   : > { %v4128_v60 = vpop.f32.mrb[5].mxu1  ;;  %v1902_v61 = vsel %vm681_vm2, %v5624_v59, -inf }
 0x391   : > { %1903 = vmax.xlane.f32.xlu0 %v1902_v61 }
 0x3de   : > { %v5628_v62 = vpop.f32.mrb[6].mxu1 }
 0x3df   : > { %v4138_v63 = vpop.f32.mrb[7].mxu1  ;;  %v1908_v0 = vsel %vm681_vm2, %v5628_v62, -inf }
 0x3e0   : > { %1909 = vmax.xlane.f32.xlu1 %v1908_v0 }
 0x3e2   : > { %v5632_v1 = vpop.f32.mrb[6].mxu0  ;;  %v5634_v2 = vpop.f32.mrb[8].mxu1 }
 0x3e3   : > { %v4143_v3 = vpop.f32.mrb[7].mxu0  ;;  %v4148_v4 = vpop.f32.mrb[9].mxu1  ;;  %v1911_v5 = vsel %vm681_vm2, %v5632_v1, -inf  ;;  %v1914_v6 = vsel %vm681_vm2, %v5634_v2, -inf }
 0x3e4   : > { %1912 = vmax.xlane.f32.xlu0 %v1911_v5  ;;  %1915 = vmax.xlane.f32.xlu1 %v1914_v6 }
 0x3e6   : > { %v5640_v7 = vpop.f32.mrb[8].mxu0  ;;  %v5642_v8 = vpop.f32.mrb[10].mxu1 }
 0x3e7   : > { %v4153_v9 = vpop.f32.mrb[9].mxu0  ;;  %v4158_v10 = vpop.f32.mrb[11].mxu1  ;;  %v1917_v11 = vsel %vm681_vm2, %v5640_v7, -inf  ;;  %v1920_v12 = vsel %vm681_vm2, %v5642_v8, -inf }
 0x3e8   : > { %1918 = vmax.xlane.f32.xlu0 %v1917_v11  ;;  %1921 = vmax.xlane.f32.xlu1 %v1920_v12 }
 0x3ea   : > { %v5648_v13 = vpop.f32.mrb[10].mxu0  ;;  %v5650_v14 = vpop.f32.mrb[12].mxu1 }
 0x3eb   : > { %v4163_v15 = vpop.f32.mrb[11].mxu0  ;;  %v4168_v16 = vpop.f32.mrb[13].mxu1  ;;  %v1923_v17 = vsel %vm681_vm2, %v5648_v13, -inf  ;;  %v1926_v18 = vsel %vm681_vm2, %v5650_v14, -inf }
 0x3ec   : > { %1924 = vmax.xlane.f32.xlu0 %v1923_v17  ;;  %1927 = vmax.xlane.f32.xlu1 %v1926_v18 }
 0x3ee   : > { %v5656_v20 = vpop.f32.mrb[12].mxu0  ;;  %v5658_v21 = vpop.f32.mrb[14].mxu1 }
 0x3ef   : > { %v4173_v22 = vpop.f32.mrb[13].mxu0  ;;  %v4178_v23 = vpop.f32.mrb[15].mxu1  ;;  %v1929_v24 = vsel %vm681_vm2, %v5656_v20, -inf  ;;  %v1932_v25 = vsel %vm681_vm2, %v5658_v21, -inf }
 0x3f0   : > { %1930 = vmax.xlane.f32.xlu0 %v1929_v24  ;;  %1933 = vmax.xlane.f32.xlu1 %v1932_v25 }
 0x3f2   : > { %v5664_v32 = vpop.f32.mrb[14].mxu0  ;;  %v5666_v33 = vpop.f32.mrb[16].mxu1 }
 0x3f3   : > { %v4183_v34 = vpop.f32.mrb[15].mxu0  ;;  %v4188_v35 = vpop.f32.mrb[17].mxu1  ;;  %v1935_v36 = vsel %vm681_vm2, %v5664_v32, -inf }
 0x3f4   : > { %1936 = vmax.xlane.f32.xlu0 %v1935_v36 }
 0x3f6   : > { %v5670_v37 = vpop.f32.mrb[16].mxu0 }
 0x3f7   : > { %v4193_v38 = vpop.f32.mrb[17].mxu0  ;;  %v1941_v39 = vsel %vm681_vm2, %v5670_v37, -inf }
 0x3f8   : > { %1942 = vmax.xlane.f32.xlu0 %v1941_v39 }
 0x401   : > { %2908 = vrot.lane.b32.xlu1 %v5481_v27, %s4987_s29  ;;  %v5694_v27 = vpop.permute.xlu1 %2756 }
 0x40e   : > { %2832 = vrot.lane.b32.xlu0 %v5477_v26, %s4987_s29  ;;  %v1938_v26 = vsel %vm681_vm2, %v5666_v33, -inf }
 0x412   : > { %2984 = vrot.lane.b32.xlu0 %v5483_v28, %s4987_s29 }
 0x413   : > { %v1898_v47 = vpop.xlane.xlu0 %1897 }
 0x417   : > { %v1901_v51 = vpop.xlane.xlu1 %1900 }
 0x418   : > { %v1945_v52 = vsub.f32 %v5616_v53, %v1901_v51  ;;  %v1944_v53 = vsub.f32 %v5612_v50, %v1898_v47 }
 0x41a   : > { %v1907_v48 = vpop.xlane.xlu0 %1906  ;;  %v1962_v55 = vmul.f32 1.442695, %v1945_v52  ;;  %v1960_v61 = vmul.f32 1.442695, %v1944_v53 }
 0x41b   : > { %v1947_v49 = vsub.f32 %v5620_v56, %v1907_v48 }
 0x41d   : > { %v1966_v54 = vmul.f32 1.442695, %v1947_v49 }
 0x41e   : > { %v1904_v60 = vpop.xlane.xlu0 %1903 }
 0x41f   : > { %4486 = vpow2.f32 %v1966_v54  ;;  %v1946_v63 = vsub.f32 %v5624_v59, %v1904_v60 }
 0x420   : > { %4488 = vpow2.f32 %v1962_v55 }
 0x421   : > { %4490 = vpow2.f32 %v1960_v61  ;;  %v1964_v0 = vmul.f32 1.442695, %v1946_v63 }
 0x423   : > { %4492 = vpow2.f32 %v1964_v0 }
 0x425   : > { %1939 = vmax.xlane.f32.xlu1 %v1938_v26 }
 0x429   : > { %v5700_v57 = vpop.eup %4486 }
 0x42a   : > { %v2001_v28 = vsel %vm681_vm2, %v5700_v57, 0.0  ;;  %v5704_v58 = vpop.eup %4488 }
 0x42b   : > { %v1995_v56 = vsel %vm681_vm2, %v5704_v58, 0.0  ;;  %v5712_v3 = vpop.eup %4490 }
 0x42c   : > { %v1992_v4 = vsel %vm681_vm2, %v5712_v3, 0.0 }
 0x42d   : > { %v5716_v5 = vpop.eup %4492 }
 0x431   : > { %2002 = vadd.xlane.f32.xlu0 %v2001_v28 }
 0x435   : > { %1996 = vadd.xlane.f32.xlu0 %v1995_v56 }
 0x436   : > { %3060 = vrot.lane.b32.xlu1 %v5487_v29, %s4987_s29  ;;  %v1998_v29 = vsel %vm681_vm2, %v5716_v5, 0.0 }
 0x45a   : > { %1993 = vadd.xlane.f32.xlu1 %v1992_v4 }
 0x45e   : > { %1999 = vadd.xlane.f32.xlu1 %v1998_v29 }
 0x46d   : > { %v1910_v50 = vpop.xlane.xlu1 %1909 }
 0x46e   : > { %v1948_v6 = vsub.f32 %v5628_v62, %v1910_v50 }
 0x470   : > { %v1968_v9 = vmul.f32 1.442695, %v1948_v6 }
 0x471   : > { %v1916_v59 = vpop.xlane.xlu1 %1915  ;;  %v1913_v10 = vpop.xlane.xlu0 %1912 }
 0x472   : > { %4494 = vpow2.f32 %v1968_v9  ;;  %v1950_v11 = vsub.f32 %v5634_v2, %v1916_v59  ;;  %v1949_v12 = vsub.f32 %v5632_v1, %v1913_v10 }
 0x474   : > { %v1972_v15 = vmul.f32 1.442695, %v1950_v11  ;;  %v1970_v16 = vmul.f32 1.442695, %v1949_v12 }
 0x475   : > { %v1922_v17 = vpop.xlane.xlu1 %1921  ;;  %v1919_v18 = vpop.xlane.xlu0 %1918 }
 0x476   : > { %4496 = vpow2.f32 %v1972_v15  ;;  %v1952_v22 = vsub.f32 %v5642_v8, %v1922_v17  ;;  %v1951_v23 = vsub.f32 %v5640_v7, %v1919_v18 }
 0x477   : > { %4498 = vpow2.f32 %v1970_v16 }
 0x478   : > { %v1976_v24 = vmul.f32 1.442695, %v1952_v22  ;;  %v1974_v62 = vmul.f32 1.442695, %v1951_v23 }
 0x479   : > { %v1928_v25 = vpop.xlane.xlu1 %1927  ;;  %v1925_v34 = vpop.xlane.xlu0 %1924 }
 0x47a   : > { %4500 = vpow2.f32 %v1976_v24  ;;  %v1954_v35 = vsub.f32 %v5650_v14, %v1928_v25  ;;  %v1953_v2 = vsub.f32 %v5648_v13, %v1925_v34 }
 0x47b   : > { %4502 = vpow2.f32 %v1974_v62 }
 0x47c   : > { %v5727_v1 = vpop.eup %4494  ;;  %v1980_v36 = vmul.f32 1.442695, %v1954_v35  ;;  %v1978_v38 = vmul.f32 1.442695, %v1953_v2 }
 0x47d   : > { %v1934_v39 = vpop.xlane.xlu1 %1933  ;;  %v1931_v47 = vpop.xlane.xlu0 %1930  ;;  %v2004_v7 = vsel %vm681_vm2, %v5727_v1, 0.0 }
 0x47e   : > { %4504 = vpow2.f32 %v1980_v36  ;;  %v1956_v8 = vsub.f32 %v5658_v21, %v1934_v39  ;;  %v1955_v48 = vsub.f32 %v5656_v20, %v1931_v47  ;;  %2005 = vadd.xlane.f32.xlu1 %v2004_v7 }
 0x47f   : > { %4506 = vpow2.f32 %v1978_v38 }
 0x480   : > { %v5733_v14 = vpop.eup %4496  ;;  %v1984_v13 = vmul.f32 1.442695, %v1956_v8  ;;  %v1982_v49 = vmul.f32 1.442695, %v1955_v48 }
 0x481   : > { %v5735_v51 = vpop.eup %4498  ;;  %v1937_v52 = vpop.xlane.xlu0 %1936  ;;  %v2010_v54 = vsel %vm681_vm2, %v5733_v14, 0.0 }
 0x482   : > { %4508 = vpow2.f32 %v1984_v13  ;;  %v1957_v55 = vsub.f32 %v5664_v32, %v1937_v52  ;;  %2011 = vadd.xlane.f32.xlu1 %v2010_v54  ;;  %v2007_v21 = vsel %vm681_vm2, %v5735_v51, 0.0  ;;  %v5777_v15 = vpop.permute.xlu1 %2908 }
 0x483   : > { %4510 = vpow2.f32 %v1982_v49  ;;  %2008 = vadd.xlane.f32.xlu0 %v2007_v21 }
 0x484   : > { %v5742_v20 = vpop.eup %4500  ;;  %v1986_v26 = vmul.f32 1.442695, %v1957_v55 }
 0x485   : > { %v5744_v28 = vpop.eup %4502  ;;  %v1943_v56 = vpop.xlane.xlu0 %1942  ;;  %v2016_v53 = vsel %vm681_vm2, %v5742_v20, 0.0 }
 0x486   : > { %4512 = vpow2.f32 %v1986_v26  ;;  %v1959_v60 = vsub.f32 %v5670_v37, %v1943_v56  ;;  %2017 = vadd.xlane.f32.xlu1 %v2016_v53  ;;  %v2013_v32 = vsel %vm681_vm2, %v5744_v28, 0.0 }
 0x487   : > { %2014 = vadd.xlane.f32.xlu0 %v2013_v32 }
 0x488   : > { %v5751_v61 = vpop.eup %4504  ;;  %v1990_v63 = vmul.f32 1.442695, %v1959_v60 }
 0x489   : > { %v5753_v0 = vpop.eup %4506  ;;  %v2022_v4 = vsel %vm681_vm2, %v5751_v61, 0.0  ;;  %v5780_v18 = vpop.permute.xlu0 %2832 }
 0x48a   : > { %4514 = vpow2.f32 %v1990_v63  ;;  %2023 = vadd.xlane.f32.xlu1 %v2022_v4  ;;  %v2019_v29 = vsel %vm681_vm2, %v5753_v0, 0.0 }
 0x48b   : > { %2020 = vadd.xlane.f32.xlu0 %v2019_v29 }
 0x48c   : > { %v5759_v37 = vpop.eup %4508 }
 0x48d   : > { %v5761_v50 = vpop.eup %4510  ;;  %v2028_v6 = vsel %vm681_vm2, %v5759_v37, 0.0  ;;  %v5782_v23 = vpop.permute.xlu0 %2984 }
 0x48e   : > { %2029 = vadd.xlane.f32.xlu1 %v2028_v6  ;;  %v2025_v9 = vsel %vm681_vm2, %v5761_v50, 0.0 }
 0x48f   : > { %2026 = vadd.xlane.f32.xlu0 %v2025_v9 }
 0x490   : > { %v5767_v59 = vpop.eup %4512 }
 0x491   : > { %v2031_v10 = vsel %vm681_vm2, %v5767_v59, 0.0 }
 0x493   : > { %2032 = vadd.xlane.f32.xlu0 %v2031_v10 }
 0x494   : > { %v5771_v11 = vpop.eup %4514 }
 0x495   : > { %v2037_v12 = vsel %vm681_vm2, %v5771_v11, 0.0 }
 0x497   : > { %2038 = vadd.xlane.f32.xlu0 %v2037_v12 }
 0x4ad   : > { %3136 = vrot.lane.b32.xlu0 %v5489_v30, %s4987_s29 }
 0x4b2   : > { %v1940_v16 = vpop.xlane.xlu1 %1939 }
 0x4b3   : > { %v1958_v17 = vsub.f32 %v5666_v33, %v1940_v16 }
 0x4b5   : > { %v1988_v22 = vmul.f32 1.442695, %v1958_v17 }
 0x4b7   : > { %4516 = vpow2.f32 %v1988_v22  ;;  %v3350_v22 = vld [vmem:[#allocation8] sm:$0xff] }
 0x4be   : > { %v2003_v24 = vpop.xlane.xlu0 %2002 }
 0x4c1   : > { %v5784_v62 = vpop.eup %4516 }
 0x4c2   : > { %v1997_v25 = vpop.xlane.xlu0 %1996  ;;  %v2034_v34 = vsel %vm681_vm2, %v5784_v62, 0.0 }
 0x4c3   : > { %4518 = vrcp.f32 %v1997_v25  ;;  %2035 = vadd.xlane.f32.xlu1 %v2034_v34  ;;  %v3352_v34 = vld [vmem:[#allocation8 + $0x10] sm:$0xff] }
 0x4c4   : > { %4520 = vrcp.f32 %v2003_v24 }
 0x4cd   : > { %v4519_v30 = vpop.eup %4518 }
 0x4ce   : > { %v2057_v35 = vmul.f32 %v4519_v30, %v5704_v58  ;;  %v4521_v33 = vpop.eup %4520  ;;  %v3353_v30 = vld [vmem:[#allocation8 + $0x18] sm:$0xff] }
 0x4cf   : > { %v2059_v2 = vmul.f32 %v4521_v33, %v5700_v57 }
 0x4d0   : > { %4202 = vmatmul.mubr.msk.f32.vlgmr.msra.gmra.mrb[18].mxu0 %vm681_vm2, %v2057_v35 }
 0x4d1   : > { %4210 = vmatpush3.msra.mxu0 %v5678_v41  ;;  %4211 = vmatprep.mubr.msk.f32.mxu0 %vm4984_vm1, %v4983_v19  ;;  %v5802_v41 = vpop.permute.xlu1 %3060 }
 0x4d2   : > { %4219 = vmatprep.subr.mxu0 %v4983_v19 }
 0x4d4   : > { %3212 = vrot.lane.b32.xlu1 %v5493_v31, %s4987_s29  ;;  %4212 = vmatmul.mubr.msk.f32.vlgmr.msra.gmra.mrb[20].mxu0 %vm681_vm2, %v2059_v2  ;;  %v4314_v2 = vpack.c.bf16 %v3353_v30, %v3352_v34  ;;  %s4991_s29 = smov [#allocation20]  }
 0x4d5   : > { %4220 = vmatpush3.msra.mxu0 %v5684_v44  ;;  %4221 = vmatprep.mubr.msk.f32.mxu0 %vm4984_vm1, %v4983_v19 }
 0x4d6   : > { %4229 = vmatprep.subr.mxu0 %v4983_v19 }
 0x4e7   : > { %v1994_v58 = vpop.xlane.xlu1 %1993 }
 0x4e8   : > { %4522 = vrcp.f32 %v1994_v58 }
 0x4eb   : > { %v2000_v36 = vpop.xlane.xlu1 %1999 }
 0x4ec   : > { %4524 = vrcp.f32 %v2000_v36 }
 0x4f2   : > { %v4523_v57 = vpop.eup %4522 }
 0x4f3   : > { %v2056_v38 = vmul.f32 %v4523_v57, %v5712_v3 }
 0x4f5   : > { %4197 = vmatmul.mubr.msk.f32.vlgmr.msra.gmra.mrb[18].mxu1 %vm681_vm2, %v2056_v38 }
 0x4f6   : > { %v4525_v31 = vpop.eup %4524  ;;  %4205 = vmatpush3.msra.mxu1 %v5674_v40  ;;  %4206 = vmatprep.mubr.msk.f32.mxu1 %vm4984_vm1, %v4983_v19 }
 0x4f7   : > { %v2058_v44 = vmul.f32 %v4525_v31, %v5716_v5  ;;  %4214 = vmatprep.subr.mxu1 %v4983_v19 }
 0x4f9   : > { %4207 = vmatmul.mubr.msk.f32.vlgmr.msra.gmra.mrb[20].mxu1 %vm681_vm2, %v2058_v44 }
 0x4fa   : > { %4215 = vmatpush3.msra.mxu1 %v5680_v42  ;;  %4216 = vmatprep.mubr.msk.f32.mxu1 %vm4984_vm1, %v4983_v19 }
 0x4fb   : > { %4224 = vmatprep.subr.mxu1 %v4983_v19 }
 0x50b   : > { %v2006_v3 = vpop.xlane.xlu1 %2005 }
 0x50c   : > { %4526 = vrcp.f32 %v2006_v3 }
 0x50f   : > { %v2012_v39 = vpop.xlane.xlu1 %2011 }
 0x510   : > { %4528 = vrcp.f32 %v2012_v39  ;;  %v2009_v40 = vpop.xlane.xlu0 %2008 }
 0x511   : > { %4530 = vrcp.f32 %v2009_v40 }
 0x513   : > { %v2018_v47 = vpop.xlane.xlu1 %2017 }
 0x514   : > { %4532 = vrcp.f32 %v2018_v47  ;;  %v2015_v5 = vpop.xlane.xlu0 %2014 }
 0x515   : > { %4534 = vrcp.f32 %v2015_v5 }
 0x516   : > { %v4527_v7 = vpop.eup %4526 }
 0x517   : > { %v2060_v8 = vmul.f32 %v4527_v7, %v5727_v1  ;;  %v2024_v48 = vpop.xlane.xlu1 %2023 }
 0x518   : > { %4536 = vrcp.f32 %v2024_v48  ;;  %v2021_v42 = vpop.xlane.xlu0 %2020 }
 0x519   : > { %4538 = vrcp.f32 %v2021_v42  ;;  %4217 = vmatmul.mubr.msk.f32.vlgmr.msra.gmra.mrb[22].mxu1 %vm681_vm2, %v2060_v8 }
 0x51a   : > { %v4529_v13 = vpop.eup %4528  ;;  %4225 = vmatpush3.msra.mxu1 %v5688_v45  ;;  %4226 = vmatprep.mubr.msk.f32.mxu1 %vm4984_vm1, %v4983_v19 }
 0x51b   : > { %v4531_v49 = vpop.eup %4530  ;;  %v2062_v52 = vmul.f32 %v4529_v13, %v5733_v14  ;;  %v2030_v54 = vpop.xlane.xlu1 %2029  ;;  %4234 = vmatprep.subr.mxu1 %v4983_v19 }
 0x51c   : > { %v2061_v1 = vmul.f32 %v4531_v49, %v5735_v51  ;;  %4540 = vrcp.f32 %v2030_v54  ;;  %v2027_v55 = vpop.xlane.xlu0 %2026 }
 0x51d   : > { %4542 = vrcp.f32 %v2027_v55  ;;  %4227 = vmatmul.mubr.msk.f32.vlgmr.msra.gmra.mrb[24].mxu1 %vm681_vm2, %v2062_v52 }
 0x51e   : > { %v4533_v21 = vpop.eup %4532  ;;  %4222 = vmatmul.mubr.msk.f32.vlgmr.msra.gmra.mrb[22].mxu0 %vm681_vm2, %v2061_v1  ;;  %4235 = vmatpush3.msra.mxu1 %v5682_v43 }
 0x51f   : > { %v4535_v45 = vpop.eup %4534  ;;  %v2064_v26 = vmul.f32 %v4533_v21, %v5742_v20  ;;  %4230 = vmatpush3.msra.mxu0 %v5690_v46  ;;  %4231 = vmatprep.mubr.msk.f32.mxu0 %vm4984_vm1, %v4983_v19 }
 0x520   : > { %v2063_v14 = vmul.f32 %v4535_v45, %v5744_v28  ;;  %v2033_v51 = vpop.xlane.xlu0 %2032  ;;  %4236 = vmatprep.mubr.msk.f32.mxu1 %vm4984_vm1, %v4983_v19  ;;  %4239 = vmatprep.subr.mxu0 %v4983_v19 }
 0x521   : > { %4544 = vrcp.f32 %v2033_v51  ;;  %4244 = vmatprep.subr.mxu1 %v4983_v19  ;;  %4237 = vmatmul.mubr.msk.f32.vlgmr.msra.gmra.mrb[26].mxu1 %vm681_vm2, %v2064_v26 }
 0x522   : > { %v4537_v43 = vpop.eup %4536  ;;  %4232 = vmatmul.mubr.msk.f32.vlgmr.msra.gmra.mrb[24].mxu0 %vm681_vm2, %v2063_v14  ;;  %4245 = vmatpush3.msra.mxu1 %v5780_v18 }
 0x523   : > { %v4539_v46 = vpop.eup %4538  ;;  %v2066_v20 = vmul.f32 %v4537_v43, %v5751_v61  ;;  %4240 = vmatpush3.msra.mxu0 %v5694_v27  ;;  %4241 = vmatprep.mubr.msk.f32.mxu0 %vm4984_vm1, %v4983_v19 }
 0x524   : > { %v2065_v28 = vmul.f32 %v4539_v46, %v5753_v0  ;;  %v2039_v56 = vpop.xlane.xlu0 %2038  ;;  %4246 = vmatprep.mubr.msk.f32.mxu1 %vm4984_vm1, %v4983_v19  ;;  %4249 = vmatprep.subr.mxu0 %v4983_v19 }
 0x525   : > { %4254 = vmatprep.subr.mxu1 %v4983_v19  ;;  %4247 = vmatmul.mubr.msk.f32.vlgmr.msra.gmra.mrb[28].mxu1 %vm681_vm2, %v2066_v20  ;;  %4546 = vrcp.f32 %v2039_v56 }
 0x526   : > { %v4541_v53 = vpop.eup %4540  ;;  %4242 = vmatmul.mubr.msk.f32.vlgmr.msra.gmra.mrb[26].mxu0 %vm681_vm2, %v2065_v28  ;;  %4255 = vmatpush3.msra.mxu1 %v5782_v23  ;;  %v3351_v23 = vld [vmem:[#allocation8 + $0x8] sm:$0xff] }
 0x527   : > { %v4543_v27 = vpop.eup %4542  ;;  %v2068_v60 = vmul.f32 %v4541_v53, %v5759_v37  ;;  %4250 = vmatpush3.msra.mxu0 %v5777_v15  ;;  %4251 = vmatprep.mubr.msk.f32.mxu0 %vm4984_vm1, %v4983_v19 }
 0x528   : > { %v2067_v32 = vmul.f32 %v4543_v27, %v5761_v50  ;;  %v3137_v61 = vpop.permute.xlu0 %3136  ;;  %4256 = vmatprep.mubr.msk.f32.mxu1 %vm4984_vm1, %v4983_v19  ;;  %4259 = vmatprep.subr.mxu0 %v4983_v19 }
 0x529   : > { %4264 = vmatprep.subr.mxu1 %v4983_v19  ;;  %4257 = vmatmul.mubr.msk.f32.vlgmr.msra.gmra.mrb[30].mxu1 %vm681_vm2, %v2068_v60 }
 0x52a   : > { %4252 = vmatmul.mubr.msk.f32.vlgmr.msra.gmra.mrb[28].mxu0 %vm681_vm2, %v2067_v32  ;;  %4265 = vmatpush3.msra.mxu1 %v3137_v61 }
 0x52b   : > { %v4545_v63 = vpop.eup %4544  ;;  %4260 = vmatpush3.msra.mxu0 %v5802_v41  ;;  %4261 = vmatprep.mubr.msk.f32.mxu0 %vm4984_vm1, %v4983_v19 }
 0x52c   : > { %v2069_v0 = vmul.f32 %v4545_v63, %v5767_v59  ;;  %4269 = vmatprep.subr.mxu0 %v4983_v19  ;;  %4266 = vmatprep.mubr.msk.f32.mxu1 %vm4984_vm1, %v4983_v19 }
 0x52e   : > { %4262 = vmatmul.mubr.msk.f32.vlgmr.msra.gmra.mrb[30].mxu0 %vm681_vm2, %v2069_v0 }
 0x52f   : > { %4271 = vmatprep.mubr.msk.f32.mxu0 %vm4984_vm1, %v4983_v19  ;;  %v4547_v29 = vpop.eup %4546 }
 0x530   : > { %v2071_v37 = vmul.f32 %v4547_v29, %v5771_v11 }
 0x550   : > { %v2036_v4 = vpop.xlane.xlu1 %2035 }
 0x551   : > { %4548 = vrcp.f32 %v2036_v4 }
 0x554   : > { %v3213_v50 = vpop.permute.xlu1 %3212 }
 0x555   : > { %4270 = vmatpush3.msra.mxu0 %v3213_v50 }
 0x556   : > { %4272 = vmatmul.mubr.msk.f32.vlgmr.msra.gmra.mrb[32].mxu0 %vm681_vm2, %v2071_v37 }
 0x55b   : > { %v4549_v6 = vpop.eup %4548 }
 0x55c   : > { %v2070_v9 = vmul.f32 %v4549_v6, %v5784_v62  ;;  %v4310_v62 = vpack.c.bf16 %v3351_v23, %v3350_v22  ;;  %v3991_v6 = vld [vmem:[#allocation10] ss:$0 sm:$0xff] }
 0x55e   : > { %4267 = vmatmul.mubr.msk.f32.vlgmr.msra.gmra.mrb[32].mxu1 %vm681_vm2, %v2070_v9  ;;  %4311 = vmatprep.subr.bf16.mxu1 %v4310_v62 }
 0x55f   : > { %4313 = vmatpush3.bf16.msra.mxu1 %v4310_v62 }
 0x560   : > { %4315 = vmatprep.subr.bf16.mxu1 %v4314_v2 }
 0x563   : > { %4317 = vmatpush3.bf16.msra.mxu1 %v4314_v2 }
 0x5a3   : > { %v5876_v59 = vpop.f32.mrb[18].mxu0 }
 0x5a4   : > { %v4203_v10 = vpop.f32.mrb[19].mxu0 }
 0x5a7   : > { %v5878_v12 = vpop.f32.mrb[20].mxu0 }
 0x5a8   : > { %v4213_v19 = vpop.f32.mrb[21].mxu0 }
 0x5c8   : > { %v5880_v15 = vpop.f32.mrb[18].mxu1 }
 0x5c9   : > { %v4198_v16 = vpop.f32.mrb[19].mxu1 }
 0x5ca   : > { %v4567_v16 = vld [vmem:[%s5399_s1] sm:$0xff] }
 0x5cc   : > { %v5882_v17 = vpop.f32.mrb[20].mxu1 }
 0x5cd   : > { %v4208_v11 = vpop.f32.mrb[21].mxu1 }
 0x5ec   : > { %v2448_v18 = vpop.f32.mrb[22].mxu1 }
 0x5ed   : > { %v4218_v24 = vpop.f32.mrb[23].mxu1  ;;  %3292 = vrot.lane.b32.xlu0 %v2448_v18, %s4988_s22 }
 0x5f0   : > { %v2600_v25 = vpop.f32.mrb[24].mxu1 }
 0x5f1   : > { %v2524_v35 = vpop.f32.mrb[22].mxu0  ;;  %v4228_v33 = vpop.f32.mrb[25].mxu1  ;;  %3296 = vrot.lane.b32.xlu0 %v2600_v25, %s4988_s22  ;;  %v4568_v25 = vld [vmem:[%s5399_s1 + $0x10] sm:$0xff] }
 0x5f2   : > { %3294 = vrot.lane.b32.xlu1 %v2524_v35, %s4988_s22  ;;  %v4223_v41 = vpop.f32.mrb[23].mxu0  ;;  %v4569_v35 = vld [vmem:[%s5399_s1 + $0x18] sm:$0xff] }
 0x5f4   : > { %v2752_v58 = vpop.f32.mrb[26].mxu1 }
 0x5f5   : > { %v2676_v36 = vpop.f32.mrb[24].mxu0  ;;  %v4238_v57 = vpop.f32.mrb[27].mxu1  ;;  %3308 = vrot.lane.b32.xlu0 %v2752_v58, %s4989_s14 }
 0x5f6   : > { %3298 = vrot.lane.b32.xlu1 %v2676_v36, %s4988_s22  ;;  %v4233_v38 = vpop.f32.mrb[25].mxu0 }
 0x5f8   : > { %v2904_v31 = vpop.f32.mrb[28].mxu1 }
 0x5f9   : > { %v2828_v44 = vpop.f32.mrb[26].mxu0  ;;  %3312 = vrot.lane.b32.xlu0 %v2904_v31, %s4989_s14  ;;  %v4248_v3 = vpop.f32.mrb[29].mxu1 }
 0x5fa   : > { %3310 = vrot.lane.b32.xlu1 %v2828_v44, %s4989_s14  ;;  %v4243_v39 = vpop.f32.mrb[27].mxu0 }
 0x5fc   : > { %v3056_v40 = vpop.f32.mrb[30].mxu1 }
 0x5fd   : > { %v2980_v47 = vpop.f32.mrb[28].mxu0  ;;  %3324 = vrot.lane.b32.xlu0 %v3056_v40, %s4990_s12  ;;  %v4258_v5 = vpop.f32.mrb[31].mxu1 }
 0x5fe   : > { %3314 = vrot.lane.b32.xlu1 %v2980_v47, %s4989_s14  ;;  %v4253_v7 = vpop.f32.mrb[29].mxu0  ;;  %v3537_v47 = vld [vmem:[#allocation14] sm:$0xff]  ;;  %v3538_v5 = vld [vmem:[#allocation14 + $0x8] sm:$0xff]  ;;  %s4884_s14 = sshll.u32 %s4991_s29, 4  ;;  %s4885_s14 = int_to_ptr.vmem [resolvable:$false] %s4884_s14 }
 0x5ff   : > { %v4318_v7 = vpack.c.bf16 %v3538_v5, %v3537_v47  ;;  %p4887_p4 = scmp.lt.s32.totalorder %s5942_s15, %s4885_s14 }
 0x601   : > { %v3132_v8 = vpop.f32.mrb[30].mxu0  ;;  %4319 = vmatprep.subr.bf16.mxu0 %v4318_v7 }
 0x602   : > { %3326 = vrot.lane.b32.xlu1 %v3132_v8, %s4990_s12  ;;  %v4263_v48 = vpop.f32.mrb[31].mxu0  ;;  %v3539_v8 = vld [vmem:[#allocation14 + $0x10] sm:$0xff]  ;;  %4321 = vmatpush3.bf16.msra.mxu0 %v4318_v7 }
 0x603   : > { %v3540_v48 = vld [vmem:[#allocation14 + $0x18] sm:$0xff] }
 0x629   : > { %v3284_v42 = vpop.f32.mrb[32].mxu0 }
 0x62a   : > { %3330 = vrot.lane.b32.xlu1 %v3284_v42, %s4990_s12  ;;  %v4273_v13 = vpop.f32.mrb[33].mxu0  ;;  %v4322_v42 = vpack.c.bf16 %v3540_v48, %v3539_v8 }
 0x62c   : > { %4323 = vmatprep.subr.bf16.mxu0 %v4322_v42 }
 0x62d   : > { %4325 = vmatpush3.bf16.msra.mxu0 %v4322_v42 }
 0x631   : > { %v3208_v49 = vpop.f32.mrb[32].mxu1 }
 0x632   : > { %3328 = vrot.lane.b32.xlu0 %v3208_v49, %s4990_s12  ;;  %v4268_v52 = vpop.f32.mrb[33].mxu1  ;;  %s4886_s12 = scalar_lea.vmem %s4885_s14, 1024 }
 0x633   : > { %p4888_p10 = scmp.lt.s32.totalorder %s4886_s12, %s4880_s26 }
 0x635   : > { %p4889_p11 = por %p4888_p10, %p4887_p4 }
 0x637   : > { %p4890_p3 = pnand %p4889_p11, %p4883_p8 }
 0x65f   : > { %v3293_v54 = vpop.permute.xlu0 %3292 }
 0x660   : > { %v3336_v51 = vsel %vm681_vm2, %v5880_v15, %v3293_v54 }
 0x663   : > { %v3297_v1 = vpop.permute.xlu0 %3296 }
 0x664   : > { %v3295_v55 = vpop.permute.xlu1 %3294  ;;  %v3338_v32 = vsel %vm681_vm2, %v5882_v17, %v3297_v1 }
 0x665   : > { %v3337_v56 = vsel %vm681_vm2, %v5876_v59, %v3295_v55 }
 0x667   : > { %v3309_v21 = vpop.permute.xlu0 %3308 }
 0x668   : > { %v3299_v45 = vpop.permute.xlu1 %3298  ;;  %v3341_v43 = vsel %vm3340_vm3, %v3336_v51, %v3309_v21 }
 0x669   : > { %v3339_v63 = vsel %vm681_vm2, %v5878_v12, %v3299_v45  ;;  %v4566_v12 = vld [vmem:[%s5399_s1 + $0x8] sm:$0xff] }
 0x66b   : > { %v3313_v26 = vpop.permute.xlu0 %3312 }
 0x66c   : > { %v3311_v14 = vpop.permute.xlu1 %3310  ;;  %v3343_v0 = vsel %vm3340_vm3, %v3338_v32, %v3313_v26 }
 0x66d   : > { %v3342_v53 = vsel %vm3340_vm3, %v3337_v56, %v3311_v14 }
 0x66f   : > { %v3325_v46 = vpop.permute.xlu0 %3324 }
 0x670   : > { %v3315_v20 = vpop.permute.xlu1 %3314  ;;  %v3346_v28 = vsel %vm3345_vm4, %v3341_v43, %v3325_v46 }
 0x671   : > { %4282 = vmatprep.mubr.msk.f32.mxu1 %vm553_vm0, %v3346_v28  ;;  %v3344_v29 = vsel %vm3340_vm3, %v3339_v63, %v3315_v20  ;;  %v3997_v63 = vld [vmem:[#allocation13] ss:$0 sm:$0xff] }
 0x674   : > { %v3327_v27 = vpop.permute.xlu1 %3326 }
 0x675   : > { %v3347_v60 = vsel %vm3345_vm4, %v3342_v53, %v3327_v27  ;;  %v3996_v27 = vld [vmem:[#allocation11] ss:$0 sm:$0xff] }
 0x676   : > { %4283 = vmatmul.mubr.msk.f32.vlgmr.msra.gmra.mrb[34].mxu1 %vm553_vm0, %v3347_v60 }
 0x69c   : > { %v3331_v61 = vpop.permute.xlu1 %3330 }
 0x69d   : > { %v3349_v50 = vsel %vm3345_vm4, %v3344_v29, %v3331_v61 }
 0x6a4   : > { %v3329_v4 = vpop.permute.xlu0 %3328 }
 0x6a5   : > { %v3348_v37 = vsel %vm3345_vm4, %v3343_v0, %v3329_v4 }
 0x6a6   : > { %4285 = vmatprep.mubr.msk.f32.mxu1 %vm553_vm0, %v3348_v37 }
 0x6a7   : > { %4286 = vmatmul.mubr.msk.f32.gmra.mrb[36].mxu1 %vm553_vm0, %v3349_v50 }
 0x749   : > { %v4284_v9 = vpop.f32.mrb[34].mxu1 }
 0x74a   : > { %v3445_v59 = vadd.f32 %v4284_v9, %v3991_v6  ;;  %v3439_v10 = vpop.f32.mrb[35].mxu1 }
 0x74b   : > { %v3440_v19 = vadd.f32 %v3991_v6, %v3439_v10 }
 0x74c   : > { %v3459_v15 = vadd.f32 %v4566_v12, %v3445_v59 }
 0x74d   : > { %v3458_v17 = vadd.f32 %v4567_v16, %v3440_v19 }
 0x74e   : > { %v3467_v11 = vsel %vm553_vm0, %v3459_v15, 0.0 }
 0x74f   : > { %3468 = vadd.xlane.f32.xlu1 %v3467_v11  ;;  %v3464_v18 = vsel %vm553_vm0, %v3458_v17, 0.0 }
 0x750   : > { %3465 = vadd.xlane.f32.xlu0 %v3464_v18 }
 0x77a   : > { %v4287_v22 = vpop.f32.mrb[36].mxu1 }
 0x77b   : > { %v3449_v23 = vpop.f32.mrb[37].mxu1  ;;  %v3455_v24 = vadd.f32 %v4287_v22, %v3991_v6 }
 0x77c   : > { %v3450_v62 = vadd.f32 %v3991_v6, %v3449_v23 }
 0x77d   : > { %v3461_v33 = vadd.f32 %v4569_v35, %v3455_v24  ;;  %v3998_v24 = vld [vmem:[#allocation16] ss:$0 sm:$0xff] }
 0x77e   : > { %v3460_v34 = vadd.f32 %v4568_v25, %v3450_v62 }
 0x77f   : > { %v3473_v2 = vsel %vm553_vm0, %v3461_v33, 0.0 }
 0x780   : > { %v3470_v30 = vsel %vm553_vm0, %v3460_v34, 0.0 }
 0x781   : > { %3471 = vadd.xlane.f32.xlu0 %v3470_v30 }
 0x785   : > { %3474 = vadd.xlane.f32.xlu0 %v3473_v2 }
 0x7dc   : > { %v3469_v41 = vpop.xlane.xlu1 %3468 }
 0x7dd   : > { %v3478_v58 = vmul.f32 0.03125, %v3469_v41  ;;  %v3466_v36 = vpop.xlane.xlu0 %3465 }
 0x7de   : > { %v3477_v57 = vmul.f32 0.03125, %v3466_v36 }
 0x7df   : > { %v3482_v38 = vsub.f32 %v3459_v15, %v3478_v58 }
 0x7e0   : > { %v3481_v31 = vsub.f32 %v3458_v17, %v3477_v57 }
 0x7e1   : > { %v3486_v44 = vmul.f32 %v3482_v38, %v3482_v38 }
 0x7e2   : > { %v3485_v3 = vmul.f32 %v3481_v31, %v3481_v31 }
 0x7e3   : > { %v3492_v39 = vsel %vm553_vm0, %v3486_v44, 0.0 }
 0x7e4   : > { %3493 = vadd.xlane.f32.xlu0 %v3492_v39  ;;  %v3489_v40 = vsel %vm553_vm0, %v3485_v3, 0.0 }
 0x7e5   : > { %3490 = vadd.xlane.f32.xlu1 %v3489_v40 }
 0x80e   : > { %v3472_v13 = vpop.xlane.xlu0 %3471 }
 0x80f   : > { %v3479_v49 = vmul.f32 0.03125, %v3472_v13 }
 0x811   : > { %v3483_v52 = vsub.f32 %v3460_v34, %v3479_v49 }
 0x812   : > { %v3475_v54 = vpop.xlane.xlu0 %3474 }
 0x813   : > { %v3480_v1 = vmul.f32 0.03125, %v3475_v54  ;;  %v3487_v55 = vmul.f32 %v3483_v52, %v3483_v52 }
 0x815   : > { %v3484_v21 = vsub.f32 %v3461_v33, %v3480_v1  ;;  %v3495_v45 = vsel %vm553_vm0, %v3487_v55, 0.0 }
 0x816   : > { %3496 = vadd.xlane.f32.xlu1 %v3495_v45 }
 0x817   : > { %v3488_v26 = vmul.f32 %v3484_v21, %v3484_v21 }
 0x819   : > { %v3498_v14 = vsel %vm553_vm0, %v3488_v26, 0.0 }
 0x81a   : > { %3499 = vadd.xlane.f32.xlu0 %v3498_v14 }
 0x871   : > { %v3494_v51 = vpop.xlane.xlu0 %3493 }
 0x872   : > { %v3502_v43 = vmul.f32 0.03125, %v3494_v51  ;;  %v3491_v46 = vpop.xlane.xlu1 %3490 }
 0x873   : > { %v3501_v20 = vmul.f32 0.03125, %v3491_v46 }
 0x874   : > { %v3506_v28 = vadd.f32 1e-05, %v3502_v43 }
 0x875   : > { %v3505_v56 = vadd.f32 1e-05, %v3501_v20 }
 0x876   : > { %4550 = vrsqrt.f32 %v3506_v28 }
 0x877   : > { %4552 = vrsqrt.f32 %v3505_v56 }
 0x880   : > { %v4551_v53 = vpop.eup %4550 }
 0x881   : > { %v4553_v60 = vpop.eup %4552  ;;  %v3514_v32 = vmul.f32 %v4551_v53, %v3482_v38 }
 0x882   : > { %v3513_v61 = vmul.f32 %v4553_v60, %v3481_v31 }
 0x883   : > { %v3524_v0 = vmul.f32 %v3996_v27, %v3514_v32 }
 0x884   : > { %v3523_v4 = vmul.f32 %v3996_v27, %v3513_v61  ;;  %v4003_v61 = vld [vmem:[#allocation17] ss:$0 sm:$0xff] }
 0x885   : > { %v3534_v37 = vadd.f32 %v3997_v63, %v3524_v0 }
 0x886   : > { %v3533_v29 = vadd.f32 %v3997_v63, %v3523_v4  ;;  %v4004_v4 = vld [vmem:[#allocation19] ss:$0 sm:$0xff] }
 0x888   : > { %4296 = vmatprep.mubr.msk.f32.mxu0 %vm553_vm0, %v3533_v29 }
 0x889   : > { %4297 = vmatmul.mubr.msk.f32.vlgmr.msra.gmra.mrb[34].mxu0 %vm553_vm0, %v3534_v37 }
 0x8a3   : > { %v3497_v50 = vpop.xlane.xlu1 %3496 }
 0x8a4   : > { %v3503_v6 = vmul.f32 0.03125, %v3497_v50 }
 0x8a6   : > { %v3507_v9 = vadd.f32 1e-05, %v3503_v6 }
 0x8a7   : > { %v3500_v59 = vpop.xlane.xlu0 %3499 }
 0x8a8   : > { %4554 = vrsqrt.f32 %v3507_v9  ;;  %v3504_v10 = vmul.f32 0.03125, %v3500_v59 }
 0x8aa   : > { %v3508_v19 = vadd.f32 1e-05, %v3504_v10 }
 0x8ac   : > { %4556 = vrsqrt.f32 %v3508_v19 }
 0x8b2   : > { %v4555_v12 = vpop.eup %4554 }
 0x8b3   : > { %v3515_v15 = vmul.f32 %v4555_v12, %v3483_v52 }
 0x8b5   : > { %v3525_v16 = vmul.f32 %v3996_v27, %v3515_v15 }
 0x8b6   : > { %v4557_v17 = vpop.eup %4556 }
 0x8b7   : > { %v3535_v11 = vadd.f32 %v3997_v63, %v3525_v16  ;;  %v3516_v18 = vmul.f32 %v4557_v17, %v3484_v21 }
 0x8b9   : > { %4299 = vmatprep.mubr.msk.f32.mxu0 %vm553_vm0, %v3535_v11  ;;  %v3526_v22 = vmul.f32 %v3996_v27, %v3516_v18 }
 0x8bb   : > { %v3536_v23 = vadd.f32 %v3997_v63, %v3526_v22 }
 0x8bd   : > { %4300 = vmatmul.mubr.msk.f32.gmra.mrb[36].mxu0 %vm553_vm0, %v3536_v23 }
 0x95c   : > { %v4298_v62 = vpop.f32.mrb[34].mxu0 }
 0x95d   : > { %v3632_v25 = vadd.f32 %v4298_v62, %v3998_v24  ;;  %v3626_v34 = vpop.f32.mrb[35].mxu0 }
 0x95e   : > { %v3627_v30 = vadd.f32 %v3998_v24, %v3626_v34 }
 0x95f   : > { %v3646_v35 = vadd.f32 %v3632_v25, %v3534_v37 }
 0x960   : > { %v3645_v33 = vadd.f32 %v3627_v30, %v3533_v29 }
 0x961   : > { %v3654_v2 = vsel %vm553_vm0, %v3646_v35, 0.0 }
 0x962   : > { %3655 = vadd.xlane.f32.xlu0 %v3654_v2  ;;  %v3651_v41 = vsel %vm553_vm0, %v3645_v33, 0.0 }
 0x963   : > { %3652 = vadd.xlane.f32.xlu1 %v3651_v41 }
 0x990   : > { %v4301_v58 = vpop.f32.mrb[36].mxu0 }
 0x991   : > { %v3642_v36 = vadd.f32 %v4301_v58, %v3998_v24  ;;  %v3636_v57 = vpop.f32.mrb[37].mxu0 }
 0x992   : > { %v3637_v38 = vadd.f32 %v3998_v24, %v3636_v57 }
 0x993   : > { %v3648_v31 = vadd.f32 %v3642_v36, %v3536_v23 }
 0x994   : > { %v3647_v44 = vadd.f32 %v3637_v38, %v3535_v11 }
 0x995   : > { %v3660_v3 = vsel %vm553_vm0, %v3648_v31, 0.0 }
 0x996   : > { %3661 = vadd.xlane.f32.xlu0 %v3660_v3  ;;  %v3657_v39 = vsel %vm553_vm0, %v3647_v44, 0.0 }
 0x997   : > { %3658 = vadd.xlane.f32.xlu1 %v3657_v39 }
 0x9ef   : > { %v3656_v40 = vpop.xlane.xlu0 %3655 }
 0x9f0   : > { %v3664_v47 = vmul.f32 0.03125, %v3656_v40  ;;  %v3653_v5 = vpop.xlane.xlu1 %3652 }
 0x9f1   : > { %v3663_v7 = vmul.f32 0.03125, %v3653_v5 }
 0x9f2   : > { %v3668_v8 = vsub.f32 %v3646_v35, %v3664_v47 }
 0x9f3   : > { %v3667_v48 = vsub.f32 %v3645_v33, %v3663_v7 }
 0x9f4   : > { %v3672_v42 = vmul.f32 %v3668_v8, %v3668_v8 }
 0x9f5   : > { %v3671_v13 = vmul.f32 %v3667_v48, %v3667_v48 }
 0x9f6   : > { %v3678_v49 = vsel %vm553_vm0, %v3672_v42, 0.0 }
 0x9f7   : > { %3679 = vadd.xlane.f32.xlu0 %v3678_v49  ;;  %v3675_v52 = vsel %vm553_vm0, %v3671_v13, 0.0 }
 0x9f8   : > { %3676 = vadd.xlane.f32.xlu1 %v3675_v52 }
 0xa23   : > { %v3662_v54 = vpop.xlane.xlu0 %3661 }
 0xa24   : > { %v3666_v1 = vmul.f32 0.03125, %v3662_v54  ;;  %v3659_v55 = vpop.xlane.xlu1 %3658 }
 0xa25   : > { %v3665_v21 = vmul.f32 0.03125, %v3659_v55 }
 0xa26   : > { %v3670_v45 = vsub.f32 %v3648_v31, %v3666_v1 }
 0xa27   : > { %v3669_v26 = vsub.f32 %v3647_v44, %v3665_v21 }
 0xa28   : > { %v3674_v14 = vmul.f32 %v3670_v45, %v3670_v45 }
 0xa29   : > { %v3673_v51 = vmul.f32 %v3669_v26, %v3669_v26 }
 0xa2a   : > { %v3684_v43 = vsel %vm553_vm0, %v3674_v14, 0.0 }
 0xa2b   : > { %3685 = vadd.xlane.f32.xlu0 %v3684_v43  ;;  %v3681_v46 = vsel %vm553_vm0, %v3673_v51, 0.0 }
 0xa2c   : > { %3682 = vadd.xlane.f32.xlu1 %v3681_v46 }
 0xa84   : > { %v3680_v20 = vpop.xlane.xlu0 %3679 }
 0xa85   : > { %v3688_v28 = vmul.f32 0.03125, %v3680_v20  ;;  %v3677_v56 = vpop.xlane.xlu1 %3676 }
 0xa86   : > { %v3687_v53 = vmul.f32 0.03125, %v3677_v56 }
 0xa87   : > { %v3692_v27 = vadd.f32 1e-05, %v3688_v28 }
 0xa88   : > { %v3691_v60 = vadd.f32 1e-05, %v3687_v53 }
 0xa89   : > { %4558 = vrsqrt.f32 %v3692_v27 }
 0xa8a   : > { %4560 = vrsqrt.f32 %v3691_v60 }
 0xa93   : > { %v4559_v32 = vpop.eup %4558 }
 0xa94   : > { %v4561_v63 = vpop.eup %4560  ;;  %v3700_v0 = vmul.f32 %v4559_v32, %v3668_v8 }
 0xa95   : > { %v3699_v29 = vmul.f32 %v4561_v63, %v3667_v48 }
 0xa96   : > { %v3710_v37 = vmul.f32 %v4003_v61, %v3700_v0 }
 0xa97   : > { %v3709_v50 = vmul.f32 %v4003_v61, %v3699_v29 }
 0xa98   : > { %v3720_v6 = vadd.f32 %v4004_v4, %v3710_v37 }
 0xa99   : > { %v3719_v9 = vadd.f32 %v4004_v4, %v3709_v50 }
 0xa9a   : > { %3724 = vst.msk [vmem:[%s535_s30 + $0x8] sm:$0xff] %vm553_vm0, %v3720_v6 }
 0xa9b   : > { %3723 = vst.msk [vmem:[%s535_s30] sm:$0xff] %vm553_vm0, %v3719_v9 }
 0xab8   : > { %v3686_v59 = vpop.xlane.xlu0 %3685 }
 0xab9   : > { %v3690_v10 = vmul.f32 0.03125, %v3686_v59  ;;  %v3683_v19 = vpop.xlane.xlu1 %3682 }
 0xaba   : > { %v3689_v12 = vmul.f32 0.03125, %v3683_v19 }
 0xabb   : > { %v3694_v15 = vadd.f32 1e-05, %v3690_v10 }
 0xabc   : > { %v3693_v16 = vadd.f32 1e-05, %v3689_v12 }
 0xabd   : > { %4562 = vrsqrt.f32 %v3694_v15 }
 0xabe   : > { %4564 = vrsqrt.f32 %v3693_v16 }
 0xac7   : > { %v4563_v17 = vpop.eup %4562 }
 0xac8   : > { %v4565_v11 = vpop.eup %4564  ;;  %v3702_v18 = vmul.f32 %v4563_v17, %v3670_v45 }
 0xac9   : > { %v3701_v22 = vmul.f32 %v4565_v11, %v3669_v26 }
 0xaca   : > { %v3712_v23 = vmul.f32 %v4003_v61, %v3702_v18 }
 0xacb   : > { %v3711_v24 = vmul.f32 %v4003_v61, %v3701_v22 }
 0xacc   : > { %v3722_v62 = vadd.f32 %v4004_v4, %v3712_v23 }
 0xacd   : > { %v3721_v25 = vadd.f32 %v4004_v4, %v3711_v24 }
 0xace   : > { %3726 = vst.msk [vmem:[%s535_s30 + $0x18] sm:$0xff] %vm553_vm0, %v3722_v62 }
 0xacf   : > { %3725 = vst.msk [vmem:[%s535_s30 + $0x10] sm:$0xff] %vm553_vm0, %v3721_v25 }
 0xad0   : > { %4893 = shalt.err (!%p4890_p3)
}
 0xad1   : > { %s4894_s30 = scalar_lea.hbm %s5940_s0, 512  ;;  %s4898_s2 = scalar_lea.hbm %s6041_s11, 1024 }
 0xad2   : > { %p4895_p5 = scmp.ne.s32.totalorder %s5940_s0, %s4894_s30  ;;  %p4899_p9 = scmp.lt.u32.totalorder %s5940_s0, %s6041_s11 }
 0xad3   : > { %p4900_p12 = scmp.lt.u32.totalorder %s4898_s2, %s4894_s30  ;;  %p4902_p13 = scmp.lt.u32.totalorder %s4894_s30, %s5940_s0 }
 0xad4   : > { %p4896_p7 = pnand %p4895_p5, %p6042_p0 }
 0xad5   : > { %p4901_p1 = por %p4900_p12, %p4899_p9 }
 0xad6   : > { %p4897_p6 = pneg %p4896_p7 }
 0xad7   : > { %p4903_p2 = por %p4902_p13, %p4901_p1 }
 0xad9   : > { %p4904_p8 = pnand %p4903_p2, %p4897_p6 }
 0xadb   : > { %4907 = shalt.err (!%p4904_p8)
}
 0xadc   : > { %s4992_s26 = smov 128  }
 0xadd   : > { %4368 = dma.vmem_to_hbm [thread:$0]  (%p6042_p0), %s5942_s15, 512, %s5940_s0, %s3728_s23, %s4992_s26, %s4992_s26, %s4988_s22  }
 0xade PF: > { %s3756_s12 = sand.u32 1, %s4954_s17   ;;  %p6043_p4 = scmp.ne.s32.totalorder %s6025_s24, 0 }
 0xadf   : > { %p6044_p10 = scmp.ge.s32.totalorder %s4966_s20, 2  ;;  %s3757_s30 = scalar_lea.sflag [#allocation4], %s3756_s12 }
 0xae1   : > { %p4406_p11 = pnand %p6044_p10, %p6043_p4 }
 0xae3   : > { %4949 = dma.done.wait (!%p4406_p11), %s3757_s30, 512  }
 0xae4   : > { %4951 = vsyncadd (!%p4406_p11), %s3757_s30, 4294966784  ;;  %p29_p3 = scmp.ge.s32.totalorder %s5311_s27, 4   ;;  %s6045_s17 = smov %s4958_s18 }
 0xae5   : > { %s6046_s18 = smov %s4962_s19  ;;  %s6047_s19 = smov %s5322_s13 }
 0xae6   : > { %s6048_s20 = smov %s5311_s27  ;;  %31 = sbr.rel (!%p29_p3) target bundleno = 15 (0xf), region = 149 }
 0xaed   :  { %3762 = vsyncpa [#allocation3], 1 }
 0xaee   :  { %3764 = vsyncpa [#allocation3 + $0x1], 1 }
 0xaef   :  { %3765 = vsyncpa [#allocation6], 1 }
 0xaf0   :  { %3766 = vsyncpa [#allocation9], 1 }
 0xaf1   :  { %3767 = vsyncpa [#allocation12], 1 }
 0xaf2   :  { %3768 = vsyncpa [#allocation15], 1 }
 0xaf3   :  { %3769 = vsyncpa [#allocation18], 1 }
 0xaf4   :  { %3770 = vsyncpa [#allocation4], 1 }
 0xaf5   :  { %3772 = vsyncpa [#allocation4 + $0x1], 1 }

</bundles_post_ra>
